<compile_context>
chip_gen: v7x
topology: tpu7x:2x2x1
jax: 0.10.0
libtpu: 0.0.40
codegen_flags: <defaults>
</compile_context>

<pallas_src>
import jax
import jax.numpy as jnp
from jax.experimental import pallas as pl
from jax.experimental.pallas import tpu as pltpu

EMBED_DIM = 50
EMBED_PAD = 64            # embedding channels padded to 64
INPUT_LEN = 36
VOCAB_SIZE = 500          # small synthetic vocab (original module: 220000)
BN_EPS = 1e-5

LP_A, LREAL_A = 40, 36    # stage-A per-sample rows (36 real + 4 zero pad)
LP_B, LREAL_B = 20, 18    # stage-B per-sample rows (18 real + 2 zero pad)

TB = 8                    # samples per grid step.  VMEM grows ~linearly with TB;
                          # raise to ~128-256 on v7x (64 MiB VMEM) or 512+ on
                          # v5e/v6e (128 MiB) for production batch sizes.


def cnn_kernel(x_ref, ma_ref, mb_ref,
               wc1_ref, b1_ref, wc2_ref, b2_ref,
               wc3_ref, b3_ref, wc4_ref, b4_ref,
               wl1_ref, bl1_ref, wl2_ref, bl2_ref, wl3_ref, bl3_ref,
               out_ref, scr_a, scr_b):
    ma = ma_ref[...]                     # (TB*40, 1) f32 row mask (real vs pad rows)
    mb = mb_ref[...]                     # (TB*20, 1) f32

    m_a = ma.shape[0]                    # TB*40
    m_b = mb.shape[0]                    # TB*20
    tb = m_a // LP_A

    def conv_relu(h_bf16, w_ref, b_ref):
        # Conv1d(kernel=3, padding=1) over the whole batch tile as ONE im2col
        # matmul: (M, 3*Cin) @ (3*Cin, Cout).  Cross-sample bleed is prevented by
        # zero pad rows between samples (re-zeroed each layer by the masks).
        m, c = h_bf16.shape
        zrow = jnp.zeros((1, c), jnp.bfloat16)
        up = jnp.concatenate([zrow, h_bf16[:m - 1, :]], axis=0)     # x[l-1]
        dn = jnp.concatenate([h_bf16[1:, :], zrow], axis=0)         # x[l+1]
        im = jnp.concatenate([up, h_bf16, dn], axis=1)              # (M, 3*Cin)
        acc = jnp.dot(im, w_ref[...], preferred_element_type=jnp.float32)
        return jnp.maximum(acc + b_ref[...], 0.0)                   # bias/BN folded

    x = x_ref[...]                                                   # (TB*40, 64) bf16
    h1 = conv_relu(x, wc1_ref, b1_ref) * ma                          # (TB*40, 64) f32
    h2 = conv_relu(h1.astype(jnp.bfloat16), wc2_ref, b2_ref) * ma    # (TB*40, 64)

    # avg_pool1d(2) #1: strided pairwise row average through VMEM scratch.
    scr_a[...] = h2
    p1 = 0.5 * (scr_a[pl.ds(0, m_b, stride=2), :] +
                scr_a[pl.ds(1, m_b, stride=2), :])                   # (TB*20, 64)

    h3 = conv_relu(p1.astype(jnp.bfloat16), wc3_ref, b3_ref) * mb    # (TB*20, 128)
    h4 = conv_relu(h3.astype(jnp.bfloat16), wc4_ref, b4_ref)         # (TB*20, 128)

    # linear1 (avg_pool1d #2 and the (C,L)-major flatten are folded into wl1):
    # gather the 18 real rows of each sample into a (TB, 18*128) slab, one matmul.
    scr_b[...] = h4
    pieces = [scr_b[pl.ds(l, tb, stride=LP_B), :] for l in range(LREAL_B)]
    g = jnp.concatenate(pieces, axis=1).astype(jnp.bfloat16)         # (TB, 2304)

    z1 = jnp.maximum(
        jnp.dot(g, wl1_ref[...], preferred_element_type=jnp.float32)
        + bl1_ref[...], 0.0)                                         # (TB, 256)
    z2 = jnp.maximum(
        jnp.dot(z1.astype(jnp.bfloat16), wl2_ref[...],
                preferred_element_type=jnp.float32) + bl2_ref[...], 0.0)

    # linear3 padded to 128 lanes (pad bias = -1e30) -> lane-dense logits/output.
    logits = jnp.dot(z2.astype(jnp.bfloat16), wl3_ref[...],
                     preferred_element_type=jnp.float32) + bl3_ref[...]   # (TB, 128)
    m = jnp.max(logits, axis=-1, keepdims=True)
    zc = logits - m
    lse = jnp.log(jnp.sum(jnp.exp(zc), axis=-1, keepdims=True))
    out_ref[...] = (zc - lse).astype(out_ref.dtype)


def make_params(key):
    ks = jax.random.split(key, 15)

    def rnd(k, shape, scale):
        return scale * jax.random.normal(k, shape, dtype=jnp.float32)

    # Eval-mode BatchNorm1d right after construction: running_mean=0, running_var=1,
    # gamma=1, beta=0  ->  y = x / sqrt(1 + eps).  It follows a ReLU and the scale is
    # positive, so it folds exactly into the preceding weights & biases.
    s = 1.0 / jnp.sqrt(jnp.float32(1.0 + BN_EPS))

    emb = rnd(ks[0], (VOCAB_SIZE + 1, EMBED_DIM), 0.1)

    w1 = rnd(ks[1], (3, EMBED_DIM, 64), 0.08);  b1 = rnd(ks[8], (1, 64), 0.01)
    w2 = rnd(ks[2], (3, 64, 64), 0.08);         b2 = rnd(ks[9], (1, 64), 0.01)
    w3 = rnd(ks[3], (3, 64, 128), 0.06);        b3 = rnd(ks[10], (1, 128), 0.01)
    w4 = rnd(ks[4], (3, 128, 128), 0.06);       b4 = rnd(ks[11], (1, 128), 0.01)
    wl1 = rnd(ks[5], (128 * 9, 256), 0.03);     bl1 = rnd(ks[12], (1, 256), 0.01)
    wl2 = rnd(ks[6], (256, 256), 0.03);         bl2 = rnd(ks[13], (1, 256), 0.01)
    wl3 = rnd(ks[7], (256, 2), 0.05);           bl3 = rnd(ks[14], (1, 2), 0.01)

    # conv1: zero-pad the input-channel dim 50 -> 64 (matches the padded embedding).
    w1 = jnp.pad(w1, ((0, 0), (0, EMBED_PAD - EMBED_DIM), (0, 0)))

    def conv_w(w):
        # (3, Cin, Cout) -> im2col layout (3*Cin, Cout); BN scale folded; bf16.
        return (w * s).reshape(-1, w.shape[2]).astype(jnp.bfloat16)

    # linear1: fold (i) PyTorch's (C,L)-major x.view(-1, 9*128) flatten,
    # (ii) the second avg_pool1d(2) (0.5 * row-pair sum) and (iii) the BN5 scale
    # into one (18*128, 256) weight applied to the un-pooled conv4 activations.
    wl1_f = wl1.reshape(128, 9, 256).transpose(1, 0, 2)        # [p, c, n]
    wl1_f = jnp.repeat(wl1_f, 2, axis=0) * 0.5                 # [l, c, n], pool folded
    wl1_f = (wl1_f * s).reshape(LREAL_B * 128, 256).astype(jnp.bfloat16)

    wl2_f = (wl2 * s).astype(jnp.bfloat16)

    # linear3: pad the 2 output units to 128 lanes so the kernel output is
    # lane-dense; pad-lane bias of -1e30 makes them vanish in the log-softmax.
    wl3_f = jnp.pad(wl3, ((0, 0), (0, 128 - 2))).astype(jnp.bfloat16)
    bl3_f = jnp.concatenate(
        [bl3, jnp.full((1, 128 - 2), -1e30, jnp.float32)], axis=1)

    flat = [conv_w(w1), b1 * s, conv_w(w2), b2 * s,
            conv_w(w3), b3 * s, conv_w(w4), b4 * s,
            wl1_f, bl1 * s, wl2_f, bl2 * s, wl3_f, bl3_f]
    return emb, flat


@jax.jit
def cnn_forward(x_ids, emb, flat_params):
    batch = x_ids.shape[0]
    bp = ((batch + TB - 1) // TB) * TB              # pad batch to a multiple of TB

    # nn.Embedding lookup (gather) in plain-JAX glue; pad embed 50->64, L 36->40,
    # batch -> bp, then flatten to the kernel's (rows, channels) layout in bf16.
    x = jnp.take(emb, x_ids, axis=0)                                  # (B, 36, 50)
    x = jnp.pad(x, ((0, bp - batch), (0, LP_A - LREAL_A),
                    (0, EMBED_PAD - EMBED_DIM)))
    x2d = x.reshape(bp * LP_A, EMBED_PAD).astype(jnp.bfloat16)

    # Row masks that re-zero the per-sample pad rows after each conv (constant-folded
    # by XLA; passed in so the kernel never rebuilds constants per grid step).
    mask_a = (jnp.arange(TB * LP_A) % LP_A < LREAL_A).astype(jnp.float32)[:, None]
    mask_b = (jnp.arange(TB * LP_B) % LP_B < LREAL_B).astype(jnp.float32)[:, None]

    resident = lambda a: pl.BlockSpec(a.shape, lambda i: (0, 0))
    in_specs = [pl.BlockSpec((TB * LP_A, EMBED_PAD), lambda i: (i, 0)),
                resident(mask_a), resident(mask_b)]
    in_specs += [resident(p) for p in flat_params]

    out = pl.pallas_call(
        cnn_kernel,
        out_shape=jax.ShapeDtypeStruct((bp, 128), jnp.float32),
        grid=(bp // TB,),
        in_specs=in_specs,
        out_specs=pl.BlockSpec((TB, 128), lambda i: (i, 0)),
        scratch_shapes=[pltpu.VMEM((TB * LP_A, 64), jnp.float32),
                        pltpu.VMEM((TB * LP_B, 128), jnp.float32)],
        compiler_params=pltpu.CompilerParams(
            dimension_semantics=("parallel",)),
    )(x2d, mask_a, mask_b, *flat_params)

    return out[:batch, :2]                           # (B, 2) log-probs


if __name__ == "__main__":
    key = jax.random.PRNGKey(0)
    pkey, xkey = jax.random.split(key)
    emb, flat = make_params(pkey)

    batch = 16
    x_ids = jax.random.randint(xkey, (batch, INPUT_LEN), 0, VOCAB_SIZE + 1,
                               dtype=jnp.int32)

    out = cnn_forward(x_ids, emb, flat)
    out = jax.block_until_ready(out)

    assert out.shape == (batch, 2)
    probs_sum = jnp.sum(jnp.exp(out), axis=1)        # log_softmax sanity check
    assert bool(jnp.all(jnp.abs(probs_sum - 1.0) < 1e-3))
    print("KERNEL_OK")
</pallas_src>

<mosaic_0001>
module attributes {stable_mosaic.version = 11 : i64} {
  func.func @cnn_kernel(%arg0: i32, %arg1: memref<320x64xbf16, #tpu.memory_space<vmem>>, %arg2: memref<320x1xf32, #tpu.memory_space<vmem>>, %arg3: memref<160x1xf32, #tpu.memory_space<vmem>>, %arg4: memref<192x64xbf16, #tpu.memory_space<vmem>>, %arg5: memref<1x64xf32, #tpu.memory_space<vmem>>, %arg6: memref<192x64xbf16, #tpu.memory_space<vmem>>, %arg7: memref<1x64xf32, #tpu.memory_space<vmem>>, %arg8: memref<192x128xbf16, #tpu.memory_space<vmem>>, %arg9: memref<1x128xf32, #tpu.memory_space<vmem>>, %arg10: memref<384x128xbf16, #tpu.memory_space<vmem>>, %arg11: memref<1x128xf32, #tpu.memory_space<vmem>>, %arg12: memref<2304x256xbf16, #tpu.memory_space<vmem>>, %arg13: memref<1x256xf32, #tpu.memory_space<vmem>>, %arg14: memref<256x256xbf16, #tpu.memory_space<vmem>>, %arg15: memref<1x256xf32, #tpu.memory_space<vmem>>, %arg16: memref<256x128xbf16, #tpu.memory_space<vmem>>, %arg17: memref<1x128xf32, #tpu.memory_space<vmem>>, %arg18: memref<8x128xf32, #tpu.memory_space<vmem>>, %arg19: memref<320x64xf32, #tpu.memory_space<vmem>>, %arg20: memref<160x128xf32, #tpu.memory_space<vmem>>) attributes {dimension_semantics = [#tpu.dimension_semantics<parallel>], iteration_bounds = array<i64: 2>, scalar_prefetch = 0 : i64, scratch_operands = 2 : i64, tpu.core_type = #tpu.core_type<tc>, window_params = [{transform_indices = @transform_0, window_bounds = array<i64: 320, 64>}, {pipeline_mode = #tpu.pipeline_mode<synchronous>, transform_indices = @transform_1, window_bounds = array<i64: 320, 1>}, {pipeline_mode = #tpu.pipeline_mode<synchronous>, transform_indices = @transform_2, window_bounds = array<i64: 160, 1>}, {pipeline_mode = #tpu.pipeline_mode<synchronous>, transform_indices = @transform_3, window_bounds = array<i64: 192, 64>}, {pipeline_mode = #tpu.pipeline_mode<synchronous>, transform_indices = @transform_4, window_bounds = array<i64: 1, 64>}, {pipeline_mode = #tpu.pipeline_mode<synchronous>, transform_indices = @transform_5, window_bounds = array<i64: 192, 64>}, {pipeline_mode = #tpu.pipeline_mode<synchronous>, transform_indices = @transform_6, window_bounds = array<i64: 1, 64>}, {pipeline_mode = #tpu.pipeline_mode<synchronous>, transform_indices = @transform_7, window_bounds = array<i64: 192, 128>}, {pipeline_mode = #tpu.pipeline_mode<synchronous>, transform_indices = @transform_8, window_bounds = array<i64: 1, 128>}, {pipeline_mode = #tpu.pipeline_mode<synchronous>, transform_indices = @transform_9, window_bounds = array<i64: 384, 128>}, {pipeline_mode = #tpu.pipeline_mode<synchronous>, transform_indices = @transform_10, window_bounds = array<i64: 1, 128>}, {pipeline_mode = #tpu.pipeline_mode<synchronous>, transform_indices = @transform_11, window_bounds = array<i64: 2304, 256>}, {pipeline_mode = #tpu.pipeline_mode<synchronous>, transform_indices = @transform_12, window_bounds = array<i64: 1, 256>}, {pipeline_mode = #tpu.pipeline_mode<synchronous>, transform_indices = @transform_13, window_bounds = array<i64: 256, 256>}, {pipeline_mode = #tpu.pipeline_mode<synchronous>, transform_indices = @transform_14, window_bounds = array<i64: 1, 256>}, {pipeline_mode = #tpu.pipeline_mode<synchronous>, transform_indices = @transform_15, window_bounds = array<i64: 256, 128>}, {pipeline_mode = #tpu.pipeline_mode<synchronous>, transform_indices = @transform_16, window_bounds = array<i64: 1, 128>}, {transform_indices = @transform_17, window_bounds = array<i64: 8, 128>}]} {
    %c0 = arith.constant 0 : index
    %c0_0 = arith.constant 0 : index
    %0 = vector.load %arg2[%c0, %c0_0] : memref<320x1xf32, #tpu.memory_space<vmem>>, vector<320x1xf32>
    %c0_1 = arith.constant 0 : index
    %c0_2 = arith.constant 0 : index
    %1 = vector.load %arg3[%c0_1, %c0_2] : memref<160x1xf32, #tpu.memory_space<vmem>>, vector<160x1xf32>
    %c0_3 = arith.constant 0 : index
    %c0_4 = arith.constant 0 : index
    %2 = vector.load %arg1[%c0_3, %c0_4] : memref<320x64xbf16, #tpu.memory_space<vmem>>, vector<320x64xbf16>
    %cst = arith.constant 0.000000e+00 : bf16
    %3 = vector.broadcast %cst : bf16 to vector<1x64xbf16>
    %4 = vector.extract_strided_slice %2 {offsets = [0, 0], sizes = [319, 64], strides = [1, 1]} : vector<320x64xbf16> to vector<319x64xbf16>
    %5 = tpu.concatenate %3, %4 in 0 : vector<1x64xbf16>, vector<319x64xbf16> -> vector<320x64xbf16>
    %6 = vector.extract_strided_slice %2 {offsets = [1, 0], sizes = [319, 64], strides = [1, 1]} : vector<320x64xbf16> to vector<319x64xbf16>
    %7 = tpu.concatenate %6, %3 in 0 : vector<319x64xbf16>, vector<1x64xbf16> -> vector<320x64xbf16>
    %8 = tpu.concatenate %5, %2, %7 in 1 : vector<320x64xbf16>, vector<320x64xbf16>, vector<320x64xbf16> -> vector<320x192xbf16>
    %c0_5 = arith.constant 0 : index
    %c0_6 = arith.constant 0 : index
    %9 = vector.load %arg4[%c0_5, %c0_6] : memref<192x64xbf16, #tpu.memory_space<vmem>>, vector<192x64xbf16>
    %cst_7 = arith.constant dense<0.000000e+00> : vector<320x64xf32>
    %10 = tpu.matmul %8, %9, %cst_7 {dimension_numbers = #tpu.dot_dimension_numbers<[1], [0], [0], [1], [0, 0, 1, 1], [], []>} : vector<320x192xbf16>, vector<192x64xbf16>, vector<320x64xf32> -> vector<320x64xf32>
    %c0_8 = arith.constant 0 : index
    %c0_9 = arith.constant 0 : index
    %11 = vector.load %arg5[%c0_8, %c0_9] : memref<1x64xf32, #tpu.memory_space<vmem>>, vector<1x64xf32>
    %12 = vector.broadcast %11 : vector<1x64xf32> to vector<320x64xf32>
    %13 = arith.addf %10, %12 : vector<320x64xf32>
    %cst_10 = arith.constant 0.000000e+00 : f32
    %14 = vector.broadcast %cst_10 : f32 to vector<320x64xf32>
    %15 = arith.maximumf %13, %14 : vector<320x64xf32>
    %16 = vector.broadcast %0 : vector<320x1xf32> to vector<320x64xf32>
    %17 = arith.mulf %15, %16 : vector<320x64xf32>
    %18 = arith.truncf %17 : vector<320x64xf32> to vector<320x64xbf16>
    %cst_11 = arith.constant 0.000000e+00 : bf16
    %19 = vector.broadcast %cst_11 : bf16 to vector<1x64xbf16>
    %20 = vector.extract_strided_slice %18 {offsets = [0, 0], sizes = [319, 64], strides = [1, 1]} : vector<320x64xbf16> to vector<319x64xbf16>
    %21 = tpu.concatenate %19, %20 in 0 : vector<1x64xbf16>, vector<319x64xbf16> -> vector<320x64xbf16>
    %22 = vector.extract_strided_slice %18 {offsets = [1, 0], sizes = [319, 64], strides = [1, 1]} : vector<320x64xbf16> to vector<319x64xbf16>
    %23 = tpu.concatenate %22, %19 in 0 : vector<319x64xbf16>, vector<1x64xbf16> -> vector<320x64xbf16>
    %24 = tpu.concatenate %21, %18, %23 in 1 : vector<320x64xbf16>, vector<320x64xbf16>, vector<320x64xbf16> -> vector<320x192xbf16>
    %c0_12 = arith.constant 0 : index
    %c0_13 = arith.constant 0 : index
    %25 = vector.load %arg6[%c0_12, %c0_13] : memref<192x64xbf16, #tpu.memory_space<vmem>>, vector<192x64xbf16>
    %cst_14 = arith.constant dense<0.000000e+00> : vector<320x64xf32>
    %26 = tpu.matmul %24, %25, %cst_14 {dimension_numbers = #tpu.dot_dimension_numbers<[1], [0], [0], [1], [0, 0, 1, 1], [], []>} : vector<320x192xbf16>, vector<192x64xbf16>, vector<320x64xf32> -> vector<320x64xf32>
    %c0_15 = arith.constant 0 : index
    %c0_16 = arith.constant 0 : index
    %27 = vector.load %arg7[%c0_15, %c0_16] : memref<1x64xf32, #tpu.memory_space<vmem>>, vector<1x64xf32>
    %28 = vector.broadcast %27 : vector<1x64xf32> to vector<320x64xf32>
    %29 = arith.addf %26, %28 : vector<320x64xf32>
    %cst_17 = arith.constant 0.000000e+00 : f32
    %30 = vector.broadcast %cst_17 : f32 to vector<320x64xf32>
    %31 = arith.maximumf %29, %30 : vector<320x64xf32>
    %32 = vector.broadcast %0 : vector<320x1xf32> to vector<320x64xf32>
    %33 = arith.mulf %31, %32 : vector<320x64xf32>
    %c0_18 = arith.constant 0 : index
    %c0_19 = arith.constant 0 : index
    %34 = vector.load %arg19[%c0_18, %c0_19] : memref<320x64xf32, #tpu.memory_space<vmem>>, vector<320x64xf32>
    tpu.vector_store %arg19[%c0_18, %c0_19], %33 {strides = array<i32>} : memref<320x64xf32, #tpu.memory_space<vmem>>, vector<320x64xf32>,
    %c0_20 = arith.constant 0 : index
    %c0_21 = arith.constant 0 : index
    %35 = tpu.strided_load %arg19[%c0_20, %c0_21] {strides = array<i32: 2, 1>} : memref<320x64xf32, #tpu.memory_space<vmem>>, vector<160x64xf32>
    %c1 = arith.constant 1 : index
    %c0_22 = arith.constant 0 : index
    %36 = tpu.strided_load %arg19[%c1, %c0_22] {strides = array<i32: 2, 1>} : memref<320x64xf32, #tpu.memory_space<vmem>>, vector<160x64xf32>
    %37 = arith.addf %35, %36 : vector<160x64xf32>
    %cst_23 = arith.constant 5.000000e-01 : f32
    %38 = vector.broadcast %cst_23 : f32 to vector<160x64xf32>
    %39 = arith.mulf %38, %37 : vector<160x64xf32>
    %40 = arith.truncf %39 : vector<160x64xf32> to vector<160x64xbf16>
    %cst_24 = arith.constant 0.000000e+00 : bf16
    %41 = vector.broadcast %cst_24 : bf16 to vector<1x64xbf16>
    %42 = vector.extract_strided_slice %40 {offsets = [0, 0], sizes = [159, 64], strides = [1, 1]} : vector<160x64xbf16> to vector<159x64xbf16>
    %43 = tpu.concatenate %41, %42 in 0 : vector<1x64xbf16>, vector<159x64xbf16> -> vector<160x64xbf16>
    %44 = vector.extract_strided_slice %40 {offsets = [1, 0], sizes = [159, 64], strides = [1, 1]} : vector<160x64xbf16> to vector<159x64xbf16>
    %45 = tpu.concatenate %44, %41 in 0 : vector<159x64xbf16>, vector<1x64xbf16> -> vector<160x64xbf16>
    %46 = tpu.concatenate %43, %40, %45 in 1 : vector<160x64xbf16>, vector<160x64xbf16>, vector<160x64xbf16> -> vector<160x192xbf16>
    %c0_25 = arith.constant 0 : index
    %c0_26 = arith.constant 0 : index
    %47 = vector.load %arg8[%c0_25, %c0_26] : memref<192x128xbf16, #tpu.memory_space<vmem>>, vector<192x128xbf16>
    %cst_27 = arith.constant dense<0.000000e+00> : vector<160x128xf32>
    %48 = tpu.matmul %46, %47, %cst_27 {dimension_numbers = #tpu.dot_dimension_numbers<[1], [0], [0], [1], [0, 0, 1, 1], [], []>} : vector<160x192xbf16>, vector<192x128xbf16>, vector<160x128xf32> -> vector<160x128xf32>
    %c0_28 = arith.constant 0 : index
    %c0_29 = arith.constant 0 : index
    %49 = vector.load %arg9[%c0_28, %c0_29] : memref<1x128xf32, #tpu.memory_space<vmem>>, vector<1x128xf32>
    %50 = vector.broadcast %49 : vector<1x128xf32> to vector<160x128xf32>
    %51 = arith.addf %48, %50 : vector<160x128xf32>
    %cst_30 = arith.constant 0.000000e+00 : f32
    %52 = vector.broadcast %cst_30 : f32 to vector<160x128xf32>
    %53 = arith.maximumf %51, %52 : vector<160x128xf32>
    %54 = vector.broadcast %1 : vector<160x1xf32> to vector<160x128xf32>
    %55 = arith.mulf %53, %54 : vector<160x128xf32>
    %56 = arith.truncf %55 : vector<160x128xf32> to vector<160x128xbf16>
    %cst_31 = arith.constant 0.000000e+00 : bf16
    %57 = vector.broadcast %cst_31 : bf16 to vector<1x128xbf16>
    %58 = vector.extract_strided_slice %56 {offsets = [0, 0], sizes = [159, 128], strides = [1, 1]} : vector<160x128xbf16> to vector<159x128xbf16>
    %59 = tpu.concatenate %57, %58 in 0 : vector<1x128xbf16>, vector<159x128xbf16> -> vector<160x128xbf16>
    %60 = vector.extract_strided_slice %56 {offsets = [1, 0], sizes = [159, 128], strides = [1, 1]} : vector<160x128xbf16> to vector<159x128xbf16>
    %61 = tpu.concatenate %60, %57 in 0 : vector<159x128xbf16>, vector<1x128xbf16> -> vector<160x128xbf16>
    %62 = tpu.concatenate %59, %56, %61 in 1 : vector<160x128xbf16>, vector<160x128xbf16>, vector<160x128xbf16> -> vector<160x384xbf16>
    %c0_32 = arith.constant 0 : index
    %c0_33 = arith.constant 0 : index
    %63 = vector.load %arg10[%c0_32, %c0_33] : memref<384x128xbf16, #tpu.memory_space<vmem>>, vector<384x128xbf16>
    %cst_34 = arith.constant dense<0.000000e+00> : vector<160x128xf32>
    %64 = tpu.matmul %62, %63, %cst_34 {dimension_numbers = #tpu.dot_dimension_numbers<[1], [0], [0], [1], [0, 0, 1, 1], [], []>} : vector<160x384xbf16>, vector<384x128xbf16>, vector<160x128xf32> -> vector<160x128xf32>
    %c0_35 = arith.constant 0 : index
    %c0_36 = arith.constant 0 : index
    %65 = vector.load %arg11[%c0_35, %c0_36] : memref<1x128xf32, #tpu.memory_space<vmem>>, vector<1x128xf32>
    %66 = vector.broadcast %65 : vector<1x128xf32> to vector<160x128xf32>
    %67 = arith.addf %64, %66 : vector<160x128xf32>
    %cst_37 = arith.constant 0.000000e+00 : f32
    %68 = vector.broadcast %cst_37 : f32 to vector<160x128xf32>
    %69 = arith.maximumf %67, %68 : vector<160x128xf32>
    %c0_38 = arith.constant 0 : index
    %c0_39 = arith.constant 0 : index
    %70 = vector.load %arg20[%c0_38, %c0_39] : memref<160x128xf32, #tpu.memory_space<vmem>>, vector<160x128xf32>
    tpu.vector_store %arg20[%c0_38, %c0_39], %69 {strides = array<i32>} : memref<160x128xf32, #tpu.memory_space<vmem>>, vector<160x128xf32>,
    %c0_40 = arith.constant 0 : index
    %c0_41 = arith.constant 0 : index
    %71 = tpu.strided_load %arg20[%c0_40, %c0_41] {strides = array<i32: 20, 1>} : memref<160x128xf32, #tpu.memory_space<vmem>>, vector<8x128xf32>
    %c1_42 = arith.constant 1 : index
    %c0_43 = arith.constant 0 : index
    %72 = tpu.strided_load %arg20[%c1_42, %c0_43] {strides = array<i32: 20, 1>} : memref<160x128xf32, #tpu.memory_space<vmem>>, vector<8x128xf32>
    %c2 = arith.constant 2 : index
    %c0_44 = arith.constant 0 : index
    %73 = tpu.strided_load %arg20[%c2, %c0_44] {strides = array<i32: 20, 1>} : memref<160x128xf32, #tpu.memory_space<vmem>>, vector<8x128xf32>
    %c3 = arith.constant 3 : index
    %c0_45 = arith.constant 0 : index
    %74 = tpu.strided_load %arg20[%c3, %c0_45] {strides = array<i32: 20, 1>} : memref<160x128xf32, #tpu.memory_space<vmem>>, vector<8x128xf32>
    %c4 = arith.constant 4 : index
    %c0_46 = arith.constant 0 : index
    %75 = tpu.strided_load %arg20[%c4, %c0_46] {strides = array<i32: 20, 1>} : memref<160x128xf32, #tpu.memory_space<vmem>>, vector<8x128xf32>
    %c5 = arith.constant 5 : index
    %c0_47 = arith.constant 0 : index
    %76 = tpu.strided_load %arg20[%c5, %c0_47] {strides = array<i32: 20, 1>} : memref<160x128xf32, #tpu.memory_space<vmem>>, vector<8x128xf32>
    %c6 = arith.constant 6 : index
    %c0_48 = arith.constant 0 : index
    %77 = tpu.strided_load %arg20[%c6, %c0_48] {strides = array<i32: 20, 1>} : memref<160x128xf32, #tpu.memory_space<vmem>>, vector<8x128xf32>
    %c7 = arith.constant 7 : index
    %c0_49 = arith.constant 0 : index
    %78 = tpu.strided_load %arg20[%c7, %c0_49] {strides = array<i32: 20, 1>} : memref<160x128xf32, #tpu.memory_space<vmem>>, vector<8x128xf32>
    %c8 = arith.constant 8 : index
    %c0_50 = arith.constant 0 : index
    %79 = tpu.strided_load %arg20[%c8, %c0_50] {strides = array<i32: 20, 1>} : memref<160x128xf32, #tpu.memory_space<vmem>>, vector<8x128xf32>
    %c9 = arith.constant 9 : index
    %c0_51 = arith.constant 0 : index
    %80 = tpu.strided_load %arg20[%c9, %c0_51] {strides = array<i32: 20, 1>} : memref<160x128xf32, #tpu.memory_space<vmem>>, vector<8x128xf32>
    %c10 = arith.constant 10 : index
    %c0_52 = arith.constant 0 : index
    %81 = tpu.strided_load %arg20[%c10, %c0_52] {strides = array<i32: 20, 1>} : memref<160x128xf32, #tpu.memory_space<vmem>>, vector<8x128xf32>
    %c11 = arith.constant 11 : index
    %c0_53 = arith.constant 0 : index
    %82 = tpu.strided_load %arg20[%c11, %c0_53] {strides = array<i32: 20, 1>} : memref<160x128xf32, #tpu.memory_space<vmem>>, vector<8x128xf32>
    %c12 = arith.constant 12 : index
    %c0_54 = arith.constant 0 : index
    %83 = tpu.strided_load %arg20[%c12, %c0_54] {strides = array<i32: 20, 1>} : memref<160x128xf32, #tpu.memory_space<vmem>>, vector<8x128xf32>
    %c13 = arith.constant 13 : index
    %c0_55 = arith.constant 0 : index
    %84 = tpu.strided_load %arg20[%c13, %c0_55] {strides = array<i32: 20, 1>} : memref<160x128xf32, #tpu.memory_space<vmem>>, vector<8x128xf32>
    %c14 = arith.constant 14 : index
    %c0_56 = arith.constant 0 : index
    %85 = tpu.strided_load %arg20[%c14, %c0_56] {strides = array<i32: 20, 1>} : memref<160x128xf32, #tpu.memory_space<vmem>>, vector<8x128xf32>
    %c15 = arith.constant 15 : index
    %c0_57 = arith.constant 0 : index
    %86 = tpu.strided_load %arg20[%c15, %c0_57] {strides = array<i32: 20, 1>} : memref<160x128xf32, #tpu.memory_space<vmem>>, vector<8x128xf32>
    %c16 = arith.constant 16 : index
    %c0_58 = arith.constant 0 : index
    %87 = tpu.strided_load %arg20[%c16, %c0_58] {strides = array<i32: 20, 1>} : memref<160x128xf32, #tpu.memory_space<vmem>>, vector<8x128xf32>
    %c17 = arith.constant 17 : index
    %c0_59 = arith.constant 0 : index
    %88 = tpu.strided_load %arg20[%c17, %c0_59] {strides = array<i32: 20, 1>} : memref<160x128xf32, #tpu.memory_space<vmem>>, vector<8x128xf32>
    %89 = tpu.concatenate %71, %72, %73, %74, %75, %76, %77, %78, %79, %80, %81, %82, %83, %84, %85, %86 in 1 : vector<8x128xf32>, vector<8x128xf32>, vector<8x128xf32>, vector<8x128xf32>, vector<8x128xf32>, vector<8x128xf32>, vector<8x128xf32>, vector<8x128xf32>, vector<8x128xf32>, vector<8x128xf32>, vector<8x128xf32>, vector<8x128xf32>, vector<8x128xf32>, vector<8x128xf32>, vector<8x128xf32>, vector<8x128xf32> -> vector<8x2048xf32>
    %90 = tpu.concatenate %87, %88 in 1 : vector<8x128xf32>, vector<8x128xf32> -> vector<8x256xf32>
    %91 = tpu.concatenate %89, %90 in 1 : vector<8x2048xf32>, vector<8x256xf32> -> vector<8x2304xf32>
    %92 = arith.truncf %91 : vector<8x2304xf32> to vector<8x2304xbf16>
    %c0_60 = arith.constant 0 : index
    %c0_61 = arith.constant 0 : index
    %93 = vector.load %arg12[%c0_60, %c0_61] : memref<2304x256xbf16, #tpu.memory_space<vmem>>, vector<2304x256xbf16>
    %cst_62 = arith.constant dense<0.000000e+00> : vector<8x256xf32>
    %94 = tpu.matmul %92, %93, %cst_62 {dimension_numbers = #tpu.dot_dimension_numbers<[1], [0], [0], [1], [0, 0, 1, 1], [], []>} : vector<8x2304xbf16>, vector<2304x256xbf16>, vector<8x256xf32> -> vector<8x256xf32>
    %c0_63 = arith.constant 0 : index
    %c0_64 = arith.constant 0 : index
    %95 = vector.load %arg13[%c0_63, %c0_64] : memref<1x256xf32, #tpu.memory_space<vmem>>, vector<1x256xf32>
    %96 = vector.broadcast %95 : vector<1x256xf32> to vector<8x256xf32>
    %97 = arith.addf %94, %96 : vector<8x256xf32>
    %cst_65 = arith.constant 0.000000e+00 : f32
    %98 = vector.broadcast %cst_65 : f32 to vector<8x256xf32>
    %99 = arith.maximumf %97, %98 : vector<8x256xf32>
    %100 = arith.truncf %99 : vector<8x256xf32> to vector<8x256xbf16>
    %c0_66 = arith.constant 0 : index
    %c0_67 = arith.constant 0 : index
    %101 = vector.load %arg14[%c0_66, %c0_67] : memref<256x256xbf16, #tpu.memory_space<vmem>>, vector<256x256xbf16>
    %cst_68 = arith.constant dense<0.000000e+00> : vector<8x256xf32>
    %102 = tpu.matmul %100, %101, %cst_68 {dimension_numbers = #tpu.dot_dimension_numbers<[1], [0], [0], [1], [0, 0, 1, 1], [], []>} : vector<8x256xbf16>, vector<256x256xbf16>, vector<8x256xf32> -> vector<8x256xf32>
    %c0_69 = arith.constant 0 : index
    %c0_70 = arith.constant 0 : index
    %103 = vector.load %arg15[%c0_69, %c0_70] : memref<1x256xf32, #tpu.memory_space<vmem>>, vector<1x256xf32>
    %104 = vector.broadcast %103 : vector<1x256xf32> to vector<8x256xf32>
    %105 = arith.addf %102, %104 : vector<8x256xf32>
    %cst_71 = arith.constant 0.000000e+00 : f32
    %106 = vector.broadcast %cst_71 : f32 to vector<8x256xf32>
    %107 = arith.maximumf %105, %106 : vector<8x256xf32>
    %108 = arith.truncf %107 : vector<8x256xf32> to vector<8x256xbf16>
    %c0_72 = arith.constant 0 : index
    %c0_73 = arith.constant 0 : index
    %109 = vector.load %arg16[%c0_72, %c0_73] : memref<256x128xbf16, #tpu.memory_space<vmem>>, vector<256x128xbf16>
    %cst_74 = arith.constant dense<0.000000e+00> : vector<8x128xf32>
    %110 = tpu.matmul %108, %109, %cst_74 {dimension_numbers = #tpu.dot_dimension_numbers<[1], [0], [0], [1], [0, 0, 1, 1], [], []>} : vector<8x256xbf16>, vector<256x128xbf16>, vector<8x128xf32> -> vector<8x128xf32>
    %c0_75 = arith.constant 0 : index
    %c0_76 = arith.constant 0 : index
    %111 = vector.load %arg17[%c0_75, %c0_76] : memref<1x128xf32, #tpu.memory_space<vmem>>, vector<1x128xf32>
    %112 = vector.broadcast %111 : vector<1x128xf32> to vector<8x128xf32>
    %113 = arith.addf %110, %112 : vector<8x128xf32>
    %cst_77 = arith.constant dense<0xFF800000> : vector<8xf32>
    %114 = vector.multi_reduction <maximumf>, %113, %cst_77 [1] : vector<8x128xf32> to vector<8xf32>
    %115 = vector.shape_cast %114 : vector<8xf32> to vector<8x1xf32>
    %116 = vector.broadcast %115 : vector<8x1xf32> to vector<8x128xf32>
    %117 = arith.subf %113, %116 : vector<8x128xf32>
    %118 = math.exp %117 : vector<8x128xf32>
    %cst_78 = arith.constant dense<0.000000e+00> : vector<8xf32>
    %119 = vector.multi_reduction <add>, %118, %cst_78 [1] : vector<8x128xf32> to vector<8xf32>
    %120 = vector.shape_cast %119 : vector<8xf32> to vector<8x1xf32>
    %121 = math.log %120 : vector<8x1xf32>
    %122 = vector.broadcast %121 : vector<8x1xf32> to vector<8x128xf32>
    %123 = arith.subf %117, %122 : vector<8x128xf32>
    %c0_79 = arith.constant 0 : index
    %c0_80 = arith.constant 0 : index
    %124 = vector.load %arg18[%c0_79, %c0_80] : memref<8x128xf32, #tpu.memory_space<vmem>>, vector<8x128xf32>
    tpu.vector_store %arg18[%c0_79, %c0_80], %123 {strides = array<i32>} : memref<8x128xf32, #tpu.memory_space<vmem>>, vector<8x128xf32>,
    return
  }
  func.func @transform_0(%arg0: i32) -> (i32, i32) {
    %c0_i32 = arith.constant 0 : i32
    %c0_i32_0 = arith.constant 0 : i32
    return %arg0, %c0_i32 : i32, i32
  }
  func.func @transform_1(%arg0: i32) -> (i32, i32) {
    %c0_i32 = arith.constant 0 : i32
    %c0_i32_0 = arith.constant 0 : i32
    %c0_i32_1 = arith.constant 0 : i32
    return %c0_i32, %c0_i32_0 : i32, i32
  }
  func.func @transform_2(%arg0: i32) -> (i32, i32) {
    %c0_i32 = arith.constant 0 : i32
    %c0_i32_0 = arith.constant 0 : i32
    %c0_i32_1 = arith.constant 0 : i32
    return %c0_i32, %c0_i32_0 : i32, i32
  }
  func.func @transform_3(%arg0: i32) -> (i32, i32) {
    %c0_i32 = arith.constant 0 : i32
    %c0_i32_0 = arith.constant 0 : i32
    %c0_i32_1 = arith.constant 0 : i32
    return %c0_i32, %c0_i32_0 : i32, i32
  }
  func.func @transform_4(%arg0: i32) -> (i32, i32) {
    %c0_i32 = arith.constant 0 : i32
    %c0_i32_0 = arith.constant 0 : i32
    %c0_i32_1 = arith.constant 0 : i32
    return %c0_i32, %c0_i32_0 : i32, i32
  }
  func.func @transform_5(%arg0: i32) -> (i32, i32) {
    %c0_i32 = arith.constant 0 : i32
    %c0_i32_0 = arith.constant 0 : i32
    %c0_i32_1 = arith.constant 0 : i32
    return %c0_i32, %c0_i32_0 : i32, i32
  }
  func.func @transform_6(%arg0: i32) -> (i32, i32) {
    %c0_i32 = arith.constant 0 : i32
    %c0_i32_0 = arith.constant 0 : i32
    %c0_i32_1 = arith.constant 0 : i32
    return %c0_i32, %c0_i32_0 : i32, i32
  }
  func.func @transform_7(%arg0: i32) -> (i32, i32) {
    %c0_i32 = arith.constant 0 : i32
    %c0_i32_0 = arith.constant 0 : i32
    %c0_i32_1 = arith.constant 0 : i32
    return %c0_i32, %c0_i32_0 : i32, i32
  }
  func.func @transform_8(%arg0: i32) -> (i32, i32) {
    %c0_i32 = arith.constant 0 : i32
    %c0_i32_0 = arith.constant 0 : i32
    %c0_i32_1 = arith.constant 0 : i32
    return %c0_i32, %c0_i32_0 : i32, i32
  }
  func.func @transform_9(%arg0: i32) -> (i32, i32) {
    %c0_i32 = arith.constant 0 : i32
    %c0_i32_0 = arith.constant 0 : i32
    %c0_i32_1 = arith.constant 0 : i32
    return %c0_i32, %c0_i32_0 : i32, i32
  }
  func.func @transform_10(%arg0: i32) -> (i32, i32) {
    %c0_i32 = arith.constant 0 : i32
    %c0_i32_0 = arith.constant 0 : i32
    %c0_i32_1 = arith.constant 0 : i32
    return %c0_i32, %c0_i32_0 : i32, i32
  }
  func.func @transform_11(%arg0: i32) -> (i32, i32) {
    %c0_i32 = arith.constant 0 : i32
    %c0_i32_0 = arith.constant 0 : i32
    %c0_i32_1 = arith.constant 0 : i32
    return %c0_i32, %c0_i32_0 : i32, i32
  }
  func.func @transform_12(%arg0: i32) -> (i32, i32) {
    %c0_i32 = arith.constant 0 : i32
    %c0_i32_0 = arith.constant 0 : i32
    %c0_i32_1 = arith.constant 0 : i32
    return %c0_i32, %c0_i32_0 : i32, i32
  }
  func.func @transform_13(%arg0: i32) -> (i32, i32) {
    %c0_i32 = arith.constant 0 : i32
    %c0_i32_0 = arith.constant 0 : i32
    %c0_i32_1 = arith.constant 0 : i32
    return %c0_i32, %c0_i32_0 : i32, i32
  }
  func.func @transform_14(%arg0: i32) -> (i32, i32) {
    %c0_i32 = arith.constant 0 : i32
    %c0_i32_0 = arith.constant 0 : i32
    %c0_i32_1 = arith.constant 0 : i32
    return %c0_i32, %c0_i32_0 : i32, i32
  }
  func.func @transform_15(%arg0: i32) -> (i32, i32) {
    %c0_i32 = arith.constant 0 : i32
    %c0_i32_0 = arith.constant 0 : i32
    %c0_i32_1 = arith.constant 0 : i32
    return %c0_i32, %c0_i32_0 : i32, i32
  }
  func.func @transform_16(%arg0: i32) -> (i32, i32) {
    %c0_i32 = arith.constant 0 : i32
    %c0_i32_0 = arith.constant 0 : i32
    %c0_i32_1 = arith.constant 0 : i32
    return %c0_i32, %c0_i32_0 : i32, i32
  }
  func.func @transform_17(%arg0: i32) -> (i32, i32) {
    %c0_i32 = arith.constant 0 : i32
    %c0_i32_0 = arith.constant 0 : i32
    return %arg0, %c0_i32 : i32, i32
  }
}

</mosaic_0001>

<bundles_post_ra>
// kernel: cnn_forward.1
= control target key start
LH: loop header
LB: loop body
LE: loop exit
PB: predicated region body
PF: predicated region fallthrough
CT: control target
= control target key end

     0   :  { %s7924_s24 = smov 0   ;;  %s10549_s0 = inlined_call_operand.vmem [shape: bf16[640,64], index: 0, kind: input, shape index: {}]   ;;  %s10550_s1 = inlined_call_operand.vmem [shape: f32[320,1], index: 1, kind: input, shape index: {}]   ;;  %s10551_s2 = inlined_call_operand.vmem [shape: f32[160,1], index: 2, kind: input, shape index: {}]   ;;  %s10552_s3 = inlined_call_operand.vmem [shape: bf16[192,64], index: 3, kind: input, shape index: {}]   ;;  %s10553_s4 = inlined_call_operand.vmem [shape: f32[1,64], index: 4, kind: input, shape index: {}]   ;;  %s10554_s5 = inlined_call_operand.vmem [shape: bf16[192,64], index: 5, kind: input, shape index: {}]   ;;  %s10555_s6 = inlined_call_operand.vmem [shape: f32[1,64], index: 6, kind: input, shape index: {}]   ;;  %s10556_s7 = inlined_call_operand.vmem [shape: bf16[192,128], index: 7, kind: input, shape index: {}]   ;;  %s10557_s8 = inlined_call_operand.vmem [shape: f32[1,128], index: 8, kind: input, shape index: {}]   ;;  %s10558_s9 = inlined_call_operand.vmem [shape: bf16[384,128], index: 9, kind: input, shape index: {}]   ;;  %s10559_s10 = inlined_call_operand.vmem [shape: f32[1,128], index: 10, kind: input, shape index: {}]   ;;  %s10560_s11 = inlined_call_operand.vmem [shape: bf16[2304,256], index: 11, kind: input, shape index: {}]   ;;  %s10561_s12 = inlined_call_operand.vmem [shape: f32[1,256], index: 12, kind: input, shape index: {}]   ;;  %s10562_s13 = inlined_call_operand.vmem [shape: bf16[256,256], index: 13, kind: input, shape index: {}]   ;;  %s10563_s14 = inlined_call_operand.vmem [shape: f32[1,256], index: 14, kind: input, shape index: {}]   ;;  %s10564_s15 = inlined_call_operand.vmem [shape: bf16[256,128], index: 15, kind: input, shape index: {}]   ;;  %s10565_s16 = inlined_call_operand.vmem [shape: f32[1,128], index: 16, kind: input, shape index: {}]   ;;  %s10566_s17 = inlined_call_operand.vmem [shape: f32[16,128], index: 17, kind: output, shape index: {}]  }
   0x1   :  { %10583 = sst [smem:[#allocation15_spill]] %s10549_s0 }
   0x2   :  { %10584 = sst [smem:[#allocation16_spill]] %s10550_s1 }
   0x3 LB: > { %s7930_s25 = sadd.s32 4294967295, %s7830_s24   ;;  %p6553_p0 = scmp.ge.s32.totalorder %s7830_s24, 1  ;;  %s7830_s24 = sphi %s7924_s24, %s27_s24  }
   0x4   : > { %p488_p1 = scmp.lt.s32.totalorder %s7830_s24, 3 }
   0x6   : > { %p489_p2 = pnand %p6553_p0, %p488_p1 }
   0x8   : > { %492 = sbr.rel (%p489_p2) target bundleno = 3050 (0xbea), region = 88 }
   0xf   : > { %s539_s26 = smul.u32 40, %s7930_s25  ;;  %v7252_v0 = vld [vmem:[%s10552_s3] sm:$0xff]   ;;  %v10568_v1 = vmov 0   ;;  %v7254_v2 = vld [vmem:[%s10552_s3 + $0x8] sm:$0xff]   ;;  %v7255_v3 = vld [vmem:[%s10552_s3 + $0x10] sm:$0xff]   ;;  %s10585_s21 = sld [smem:[#allocation15_spill]] }
  0x10   : > { %1262 = vmatprep.subr.bf16.mxu0 %v10568_v1  ;;  %7241 = vset.pattern.permute.xlu0 %v10568_v1  ;;  %v7256_v5 = vld [vmem:[%s10552_s3 + $0x18] sm:$0xff]   ;;  %s7833_s27 = smov 64   ;;  %v7257_v10 = vld [vmem:[%s10552_s3 + $0x20] sm:$0xff]   ;;  %v7258_v13 = vld [vmem:[%s10552_s3 + $0x28] sm:$0xff]   ;;  %vm1018_vm0 = vcmask 523264   ;;  %s10586_s20 = sld [smem:[#allocation16_spill]] }
  0x11   : > { %p540_p3 = scmp.lt.s32.totalorder %s539_s26, 79  ;;  %1263 = vmatpush1.bf16.msra.mxu0 %v7252_v0  ;;  %7242 = vset.pattern.permute.xlu1 %v10568_v1  ;;  %v7259_v24 = vld [vmem:[%s10552_s3 + $0x30] sm:$0xff]   ;;  %v7260_v34 = vld [vmem:[%s10552_s3 + $0x38] sm:$0xff]   ;;  %vm914_vm1 = vsmask.f32 7424  ;;  %v7261_v52 = vld [vmem:[%s10552_s3 + $0x40] sm:$0xff]  }
  0x12   : > { %1264 = vmatprep.subr.bf16.mxu0 %v10568_v1  ;;  %vm750_vm2 = vsmask.f32 256  ;;  %vm911_vm3 = vcmask 1040384   ;;  %vm975_vm5 = vcmask 1047552   ;;  %p545_p4 = scmp.lt.s32.totalorder %s7930_s25, 1 }
  0x13   : > { %s10616_s26 = smov (!%p540_p3, %s539_s26), 79  ;;  %vm8266_vm4 = vmand %vm911_vm3, %vm750_vm2 }
  0x14   : > { %s6554_s30 = sshll.u32 %s10616_s26, 2  ;;  %vm8383_vm6 = vmand %vm975_vm5, %vm914_vm1  ;;  %s10618_s25 = smov (!%p545_p4, %s7930_s25), 1 }
  0x15   : > { %1265 = vmatpush1.bf16.msra.mxu0 %v7254_v2  ;;  %s7951_s22 = scalar_lea.vmem %s10585_s21, %s6554_s30  ;;  %v7262_v2 = vld [vmem:[%s10552_s3 + $0x48] sm:$0xff]  }
  0x16   : > { %1266 = vmatprep.subr.bf16.mxu0 %v10568_v1  ;;  %v7243_v4 = vld [vmem:[%s7951_s22] sm:$0xff]   ;;  %v7959_v6 = vld [vmem:[%s7951_s22 + $0x8] sm:$0xff]   ;;  %v7963_v7 = vld [vmem:[%s7951_s22 + $0x10] sm:$0xff]  }
  0x17   : > { %978 = vrot.lane.b32.xlu0 %v7243_v4, %s7833_s27  ;;  %982 = vrot.lane.b32.xlu1 %v7963_v7, %s7833_s27  ;;  %v7969_v8 = vld [vmem:[%s7951_s22 + $0x18] sm:$0xff]   ;;  %v7972_v9 = vld [vmem:[%s7951_s22 + $0x20] sm:$0xff]   ;;  %v755_v11 = vshll.u32 %v7243_v4, 16  ;;  %v759_v14 = vshrl.u32 %v7959_v6, 16  ;;  %v767_v16 = vshrl.u32 %v7963_v7, 16  ;;  %v752_v17 = vshrl.u32 %v7243_v4, 16 }
  0x18   : > { %v7980_v12 = vld [vmem:[%s7951_s22 + $0x28] sm:$0xff]   ;;  %v7992_v15 = vld [vmem:[%s7951_s22 + $0x30] sm:$0xff]   ;;  %v762_v18 = vshll.u32 %v7959_v6, 16  ;;  %v770_v20 = vshll.u32 %v7963_v7, 16  ;;  %v775_v21 = vshrl.u32 %v7969_v8, 16  ;;  %v778_v22 = vshll.u32 %v7969_v8, 16 }
  0x19   : > { %1267 = vmatpush1.bf16.msra.mxu0 %v7255_v3  ;;  %v915_v19 = vrot.slane %v755_v11, 1  ;;  %v8003_v23 = vld [vmem:[%s7951_s22 + $0x38] sm:$0xff]   ;;  %v783_v25 = vshrl.u32 %v7972_v9, 16  ;;  %v786_v26 = vshll.u32 %v7972_v9, 16  ;;  %v8013_v28 = vld [vmem:[%s7951_s22 + $0x40] sm:$0xff]   ;;  %v791_v30 = vshrl.u32 %v7980_v12, 16 }
  0x1a   : > { %1268 = vmatprep.subr.bf16.mxu0 %v10568_v1  ;;  %v917_v29 = vrot.slane %v762_v18, 1  ;;  %v754_v31 = vrot.slane %v752_v17, 7  ;;  %v794_v32 = vshll.u32 %v7980_v12, 16  ;;  %v8021_v33 = vld [vmem:[%s7951_s22 + $0x48] sm:$0xff]   ;;  %v920_v36 = vrot.slane %v770_v20, 1  ;;  %v8036_v43 = vld [vmem:[%s7951_s22 + $0x50] sm:$0xff]  }
  0x1b   : > { %980 = vrot.lane.b32.xlu0 %v7959_v6, %s7833_s27  ;;  %984 = vrot.lane.b32.xlu1 %v7969_v8, %s7833_s27  ;;  %v916_v27 = vor.u32 %v915_v19, %v752_v17  ;;  %v761_v39 = vrot.slane %v759_v14, 7  ;;  %v923_v40 = vrot.slane %v778_v22, 1  ;;  %v802_v41 = vshll.u32 %v7992_v15, 16  ;;  %v8046_v49 = vld [vmem:[%s7951_s22 + $0x58] sm:$0xff]   ;;  %v8061_v59 = vld [vmem:[%s7951_s22 + $0x60] sm:$0xff]  }
  0x1c   : > { %v919_v35 = vor.u32 %v917_v29, %v759_v14  ;;  %v8027_v38 = vor.u32 %v755_v11, %v754_v31  ;;  %v922_v44 = vor.u32 %v920_v36, %v767_v16  ;;  %v769_v46 = vrot.slane %v767_v16, 7  ;;  %v8077_v4 = vld [vmem:[%s7951_s22 + $0x68] sm:$0xff]   ;;  %v8102_v14 = vld [vmem:[%s7951_s22 + $0x70] sm:$0xff]   ;;  %v8105_v16 = vld [vmem:[%s7951_s22 + $0x78] sm:$0xff]  }
  0x1d   : > { %1269 = vmatpush1.bf16.msra.mxu0 %v7256_v5  ;;  %v918_v37 = vsel %vm914_vm1, %v916_v27, %v917_v29  ;;  %v764_v45 = vor.u32 %v762_v18, %v761_v39  ;;  %v925_v47 = vor.u32 %v923_v40, %v775_v21  ;;  %v926_v50 = vrot.slane %v786_v26, 1  ;;  %v8132_v27 = vld [vmem:[%s7951_s22 + $0x88] sm:$0xff]   ;;  %v8135_v29 = vld [vmem:[%s7951_s22 + $0x90] sm:$0xff]  }
  0x1e   : > { %1270 = vmatprep.subr.bf16.mxu0 %v10568_v1  ;;  %v8033_v42 = vsel %vm914_vm1, %v919_v35, %v920_v36  ;;  %6589 = vmatprep.mubr.msk.bf16.mxu0 %vm1018_vm0, %v918_v37  ;;  %v8043_v48 = vsel %vm914_vm1, %v922_v44, %v923_v40  ;;  %v777_v51 = vrot.slane %v775_v21, 7  ;;  %v772_v54 = vor.u32 %v770_v20, %v769_v46  ;;  %v8114_v21 = vld [vmem:[%s7951_s22 + $0x80] sm:$0xff]   ;;  %v551_v44 = vld [vmem:[%s10586_s20 + $0x8] sm:$0xff] }
  0x1f   : > { %986 = vrot.lane.b32.xlu0 %v7972_v9, %s7833_s27  ;;  %988 = vrot.lane.b32.xlu1 %v7980_v12, %s7833_s27  ;;  %v8052_v53 = vsel %vm750_vm2, %v754_v31, %v764_v45  ;;  %v929_v55 = vrot.slane %v794_v32, 1  ;;  %v799_v56 = vshrl.u32 %v7992_v15, 16  ;;  %v8058_v57 = vsel %vm914_vm1, %v925_v47, %v926_v50  ;;  %v550_v35 = vld [vmem:[%s10586_s20] sm:$0xff]  ;;  %v553_v45 = vld [vmem:[%s10586_s20 + $0x18] sm:$0xff] }
  0x20   : > { %v780_v58 = vor.u32 %v778_v22, %v777_v51  ;;  %v8065_v60 = vsel %vm750_vm2, %v761_v39, %v772_v54  ;;  %v928_v61 = vor.u32 %v926_v50, %v783_v25  ;;  %v785_v62 = vrot.slane %v783_v25, 7  ;;  %v552_v50 = vld [vmem:[%s10586_s20 + $0x10] sm:$0xff] }
  0x21   : > { %1271 = vmatpush1.bf16.msra.mxu0 %v7257_v10  ;;  %v931_v63 = vor.u32 %v929_v55, %v791_v30  ;;  %v810_v0 = vshll.u32 %v8003_v23, 16  ;;  %v932_v5 = vrot.slane %v802_v41, 1  ;;  %v793_v8 = vrot.slane %v791_v30, 7 }
  0x22   : > { %1272 = vmatprep.subr.bf16.mxu0 %v10568_v1  ;;  %v8074_v3 = vsel %vm750_vm2, %v769_v46, %v780_v58  ;;  %v8082_v6 = vsel %vm914_vm1, %v928_v61, %v929_v55  ;;  %v788_v7 = vor.u32 %v786_v26, %v785_v62  ;;  %v801_v19 = vrot.slane %v799_v56, 7  ;;  %v554_v61 = vld [vmem:[%s10586_s20 + $0x20] sm:$0xff] }
  0x23   : > { %990 = vrot.lane.b32.xlu0 %v7992_v15, %s7833_s27  ;;  %992 = vrot.lane.b32.xlu1 %v8003_v23, %s7833_s27  ;;  %v8087_v9 = vsel %vm914_vm1, %v931_v63, %v932_v5  ;;  %v796_v11 = vor.u32 %v794_v32, %v793_v8  ;;  %v934_v17 = vor.u32 %v932_v5, %v799_v56  ;;  %v935_v18 = vrot.slane %v810_v0, 1  ;;  %v7274_v32 = vld [vmem:[%s7951_s22 + $0x98] sm:$0xff]  }
  0x24   : > { %v8091_v10 = vsel %vm750_vm2, %v777_v51, %v788_v7  ;;  %v807_v20 = vshrl.u32 %v8003_v23, 16  ;;  %v818_v22 = vshll.u32 %v8013_v28, 16  ;;  %v804_v23 = vor.u32 %v802_v41, %v801_v19 }
  0x25   : > { %1273 = vmatpush1.bf16.msra.mxu0 %v7258_v13  ;;  %v8096_v12 = vsel %vm750_vm2, %v785_v62, %v796_v11  ;;  %v7263_v13 = vld [vmem:[%s10552_s3 + $0x50] sm:$0xff]   ;;  %v8121_v25 = vsel %vm914_vm1, %v934_v17, %v935_v18  ;;  %v815_v15 = vshrl.u32 %v8013_v28, 16  ;;  %v826_v36 = vshll.u32 %v8021_v33, 16  ;;  %v557_v62 = vld [vmem:[%s10586_s20 + $0x38] sm:$0xff] }
  0x26   : > { %1274 = vmatprep.subr.bf16.mxu0 %v10568_v1  ;;  %v8127_v26 = vsel %vm750_vm2, %v793_v8, %v804_v23  ;;  %v937_v30 = vor.u32 %v935_v18, %v807_v20  ;;  %v938_v31 = vrot.slane %v818_v22, 1  ;;  %v834_v41 = vshll.u32 %v8036_v43, 16  ;;  %v561_v17 = vld [vmem:[%s10586_s20 + $0x58] sm:$0xff] }
  0x27   : > { %994 = vrot.lane.b32.xlu0 %v8013_v28, %s7833_s27  ;;  %996 = vrot.lane.b32.xlu1 %v8021_v33, %s7833_s27  ;;  %v823_v28 = vshrl.u32 %v8021_v33, 16  ;;  %v941_v47 = vrot.slane %v826_v36, 1  ;;  %v555_v33 = vld [vmem:[%s10586_s20 + $0x28] sm:$0xff]  ;;  %v817_v51 = vrot.slane %v815_v15, 7  ;;  %v831_v56 = vshrl.u32 %v8036_v43, 16 }
  0x28   : > { %v8149_v37 = vsel %vm914_vm1, %v937_v30, %v938_v31  ;;  %v940_v46 = vor.u32 %v938_v31, %v815_v15  ;;  %v842_v58 = vshll.u32 %v8046_v49, 16  ;;  %v850_v30 = vshll.u32 %v8061_v59, 16  ;;  %v563_v31 = vld [vmem:[%s10586_s20 + $0x68] sm:$0xff] }
  0x29   : > { %1275 = vmatpush1.bf16.msra.mxu0 %v7259_v24  ;;  %v7264_v24 = vld [vmem:[%s10552_s3 + $0x58] sm:$0xff]   ;;  %v820_v54 = vor.u32 %v818_v22, %v817_v51  ;;  %v943_v63 = vor.u32 %v941_v47, %v823_v28  ;;  %v825_v5 = vrot.slane %v823_v28, 7  ;;  %v839_v22 = vshrl.u32 %v8046_v49, 16  ;;  %v567_v28 = vld [vmem:[%s10586_s20 + $0x88] sm:$0xff] }
  0x2a   : > { %1276 = vmatprep.subr.bf16.mxu0 %v10568_v1 }
  0x2b   : > { %998 = vrot.lane.b32.xlu0 %v8036_v43, %s7833_s27  ;;  %1000 = vrot.lane.b32.xlu1 %v8046_v49, %s7833_s27  ;;  %v559_v43 = vld [vmem:[%s10586_s20 + $0x48] sm:$0xff]  ;;  %v828_v8 = vor.u32 %v826_v36, %v825_v5  ;;  %v562_v49 = vld [vmem:[%s10586_s20 + $0x60] sm:$0xff]  ;;  %v950_v36 = vrot.slane %v850_v30, 1 }
  0x2d   : > { %1277 = vmatpush1.bf16.msra.mxu0 %v7260_v34  ;;  %v809_v34 = vrot.slane %v807_v20, 7  ;;  %v8193_v11 = vsel %vm750_vm2, %v817_v51, %v828_v8  ;;  %v833_v20 = vrot.slane %v831_v56, 7 }
  0x2e   : > { %1278 = vmatprep.subr.bf16.mxu0 %v10568_v1 }
  0x2f   : > { %1002 = vrot.lane.b32.xlu0 %v8061_v59, %s7833_s27  ;;  %1004 = vrot.lane.b32.xlu1 %v8077_v4, %s7833_s27  ;;  %v812_v39 = vor.u32 %v810_v0, %v809_v34  ;;  %v8173_v55 = vsel %vm750_vm2, %v809_v34, %v820_v54  ;;  %v944_v0 = vrot.slane %v834_v41, 1  ;;  %v565_v34 = vld [vmem:[%s10586_s20 + $0x78] sm:$0xff] }
  0x31   : > { %1279 = vmatpush1.bf16.msra.mxu0 %v7261_v52  ;;  %v8152_v40 = vsel %vm750_vm2, %v801_v19, %v812_v39  ;;  %v8170_v52 = vsel %vm914_vm1, %v940_v46, %v941_v47  ;;  %v8190_v7 = vsel %vm914_vm1, %v943_v63, %v944_v0  ;;  %v946_v18 = vor.u32 %v944_v0, %v831_v56  ;;  %v564_v39 = vld [vmem:[%s10586_s20 + $0x70] sm:$0xff] }
  0x32   : > { %1280 = vmatprep.subr.bf16.mxu0 %v10568_v1  ;;  %v947_v19 = vrot.slane %v842_v58, 1  ;;  %v858_v46 = vshll.u32 %v8077_v4, 16  ;;  %v847_v47 = vshrl.u32 %v8061_v59, 16  ;;  %v855_v63 = vshrl.u32 %v8077_v4, 16 }
  0x33   : > { %1006 = vrot.lane.b32.xlu0 %v8102_v14, %s7833_s27  ;;  %1008 = vrot.lane.b32.xlu1 %v8105_v16, %s7833_s27 }
  0x34   : > { %v8206_v23 = vsel %vm914_vm1, %v946_v18, %v947_v19  ;;  %v952_v54 = vor.u32 %v950_v36, %v847_v47  ;;  %v953_v56 = vrot.slane %v858_v46, 1  ;;  %v863_v18 = vshrl.u32 %v8102_v14, 16 }
  0x35   : > { %1281 = vmatpush1.bf16.msra.mxu0 %v7262_v2  ;;  %v556_v2 = vld [vmem:[%s10586_s20 + $0x30] sm:$0xff] }
  0x36   : > { %1282 = vmatprep.subr.bf16.mxu0 %v10568_v1  ;;  %v8242_v59 = vsel %vm914_vm1, %v952_v54, %v953_v56  ;;  %v865_v4 = vrot.slane %v863_v18, 7 }
  0x37   : > { %1010 = vrot.lane.b32.xlu0 %v8114_v21, %s7833_s27  ;;  %1012 = vrot.lane.b32.xlu1 %v8132_v27, %s7833_s27 }
  0x39   : > { %1283 = vmatpush1.bf16.msra.mxu0 %v7263_v13  ;;  %v558_v13 = vld [vmem:[%s10586_s20 + $0x40] sm:$0xff] }
  0x3a   : > { %1284 = vmatprep.subr.bf16.mxu0 %v10568_v1 }
  0x3b   : > { %1014 = vrot.lane.b32.xlu0 %v8135_v29, %s7833_s27  ;;  %1016 = vrot.lane.b32.xlu1 %v7274_v32, %s7833_s27  ;;  %v836_v32 = vor.u32 %v834_v41, %v833_v20  ;;  %v841_v41 = vrot.slane %v839_v22, 7 }
  0x3d   : > { %1285 = vmatpush1.bf16.msra.mxu0 %v7264_v24  ;;  %v560_v24 = vld [vmem:[%s10586_s20 + $0x50] sm:$0xff]  ;;  %v8219_v15 = vsel %vm750_vm2, %v825_v5, %v836_v32  ;;  %v857_v5 = vrot.slane %v855_v63, 7  ;;  %v871_v32 = vshrl.u32 %v8105_v16, 16 }
  0x3e   : > { %2280 = vmatprep.subr.bf16.mxu0 %v10568_v1 }
  0x3f   : > { %1497 = vperm.xlu0 %7241, %v550_v35   ;;  %1502 = vperm.xlu1 %7242, %v551_v44   ;;  %v949_v35 = vor.u32 %v947_v19, %v839_v22 }
  0x41   : > { %v8228_v44 = vsel %vm914_vm1, %v949_v35, %v950_v36  ;;  %v10587_v35 = vmov 0  ;;  %v873_v36 = vrot.slane %v871_v32, 7 }
  0x42   : > { %v10588_v35 = vsel %vm8266_vm4, 4294967295, %v10587_v35 }
  0x43   : > { %1512 = vperm.xlu0 %7241, %v553_v45   ;;  %1507 = vperm.xlu1 %7242, %v552_v50   ;;  %v844_v45 = vor.u32 %v842_v58, %v841_v41  ;;  %v566_v50 = vld [vmem:[%s10586_s20 + $0x80] sm:$0xff]  ;;  %v849_v58 = vrot.slane %v847_v47, 7  ;;  %10589 = vst [vmem:[#allocation4_spill] sm:$0xff] %v10588_v35 }
  0x45   : > { %v8239_v51 = vsel %vm750_vm2, %v833_v20, %v844_v45 }
  0x47   : > { %1522 = vperm.xlu0 %7241, %v555_v33   ;;  %1517 = vperm.xlu1 %7242, %v554_v61   ;;  %v568_v33 = vld [vmem:[%s10586_s20 + $0x90] sm:$0xff]  ;;  %v852_v61 = vor.u32 %v850_v30, %v849_v58 }
  0x49   : > { %v8247_v0 = vsel %vm750_vm2, %v841_v41, %v852_v61  ;;  %v890_v41 = vshll.u32 %v8132_v27, 16  ;;  %v887_v61 = vshrl.u32 %v8132_v27, 16 }
  0x4b   : > { %1532 = vperm.xlu0 %7241, %v557_v62   ;;  %1527 = vperm.xlu1 %7242, %v556_v2   ;;  %v866_v62 = vshll.u32 %v8102_v14, 16  ;;  %v955_v2 = vor.u32 %v953_v56, %v855_v63  ;;  %v965_v47 = vrot.slane %v890_v41, 1  ;;  %v913_v56 = vsel %vm8266_vm4, 0, %v8027_v38 }
  0x4d   : > { %v868_v30 = vor.u32 %v866_v62, %v865_v4 }
  0x4f   : > { %1542 = vperm.xlu0 %7241, %v559_v43   ;;  %1537 = vperm.xlu1 %7242, %v558_v13   ;;  %v956_v43 = vrot.slane %v866_v62, 1  ;;  %v860_v13 = vor.u32 %v858_v46, %v857_v5 }
  0x51   : > { %v8250_v8 = vsel %vm914_vm1, %v955_v2, %v956_v43  ;;  %v8255_v19 = vsel %vm750_vm2, %v849_v58, %v860_v13  ;;  %v958_v20 = vor.u32 %v956_v43, %v863_v18  ;;  %v898_v58 = vshll.u32 %v8135_v29, 16 }
  0x52   : > { %v967_v2 = vor.u32 %v965_v47, %v887_v61  ;;  %v895_v18 = vshrl.u32 %v8135_v29, 16 }
  0x53   : > { %1552 = vperm.xlu0 %7241, %v561_v17   ;;  %1547 = vperm.xlu1 %7242, %v560_v24   ;;  %v874_v17 = vshll.u32 %v8105_v16, 16  ;;  %v879_v16 = vshrl.u32 %v8114_v21, 16  ;;  %v8290_v43 = vrot.slane %v898_v58, 1 }
  0x55   : > { %v959_v22 = vrot.slane %v874_v17, 1  ;;  %v8296_v38 = vsel %vm914_vm1, %v967_v2, %v8290_v43  ;;  %v7277_v2 = vld [vmem:[%s10554_s5 + $0x10] sm:$0xff]  }
  0x57   : > { %1562 = vperm.xlu0 %7241, %v563_v31   ;;  %1557 = vperm.xlu1 %7242, %v562_v49   ;;  %v8258_v24 = vsel %vm914_vm1, %v958_v20, %v959_v22  ;;  %v882_v31 = vshll.u32 %v8114_v21, 16  ;;  %v8263_v49 = vsel %vm750_vm2, %v857_v5, %v868_v30  ;;  %v889_v5 = vrot.slane %v887_v61, 7 }
  0x59   : > { %v962_v14 = vrot.slane %v882_v31, 1  ;;  %v892_v27 = vor.u32 %v890_v41, %v889_v5 }
  0x5b   : > { %1572 = vperm.xlu0 %7241, %v565_v34   ;;  %1567 = vperm.xlu1 %7242, %v564_v39   ;;  %v961_v34 = vor.u32 %v959_v22, %v871_v32  ;;  %v964_v46 = vor.u32 %v962_v14, %v879_v16 }
  0x5d   : > { %v8271_v39 = vsel %vm914_vm1, %v961_v34, %v962_v14  ;;  %v7823_v14 = vld [vmem:[%s7951_s22 + $0x98] sm:$0xff]   ;;  %s6555_s22 = sshll.u32 %s10618_s25, 3 }
  0x5e   : > { %s548_s19 = scalar_lea.vmem %s10566_s17, %s6555_s22 }
  0x5f   : > { %1582 = vperm.xlu0 %7241, %v567_v28   ;;  %1577 = vperm.xlu1 %7242, %v566_v50   ;;  %v876_v28 = vor.u32 %v874_v17, %v873_v36  ;;  %v881_v50 = vrot.slane %v879_v16, 7 }
  0x61   : > { %v8276_v45 = vsel %vm750_vm2, %v865_v4, %v876_v28  ;;  %v884_v54 = vor.u32 %v882_v31, %v881_v50  ;;  %v8302_v20 = vsel %vm750_vm2, %v881_v50, %v892_v27  ;;  %v7282_v27 = vld [vmem:[%s10554_s5 + $0x38] sm:$0xff]   ;;  %v7323_v50 = vld [vmem:[%s10560_s11] ss:$8 sps:$4 sm:$0xff]  }
  0x63   : > { %1587 = vperm.xlu0 %7241, %v568_v33   ;;  %v8279_v33 = vsel %vm914_vm1, %v964_v46, %v965_v47  ;;  %v8287_v21 = vsel %vm750_vm2, %v873_v36, %v884_v54  ;;  %v906_v36 = vshll.u32 %v7823_v14, 16 }
  0x89   : > { %v979_v62 = vpop.permute.xlu0 %978  ;;  %v983_v22 = vpop.permute.xlu1 %982 }
  0x8a   : > { %v1021_v63 = vsel %vm1018_vm0, %v913_v56, %v979_v62  ;;  %v1029_v30 = vsel %vm1018_vm0, %v8065_v60, %v983_v22  ;;  %v7275_v62 = vld [vmem:[%s10554_s5] sm:$0xff]  }
  0x8b   : > { %1295 = vmatmul.mubr.bf16.vlgmr.msra.gmra.mrb[0].mxu0 %v1021_v63  ;;  %v7276_v63 = vld [vmem:[%s10554_s5 + $0x8] sm:$0xff]   ;;  %v8446_v22 = vld [vmem:[%s10553_s4] ss:$0 sm:$0xff] }
  0x8c   : > { %6590 = vmatprep.mubr.msk.bf16.mxu0 %vm1018_vm0, %v8033_v42  ;;  %v8308_v42 = vrot.slane %v895_v18, 7  ;;  %2281 = vmatpush1.bf16.msra.mxu0 %v7275_v62 }
  0x8d   : > { %v981_v13 = vpop.permute.xlu0 %980  ;;  %v985_v31 = vpop.permute.xlu1 %984  ;;  %2282 = vmatprep.subr.bf16.mxu0 %v10568_v1 }
  0x8e   : > { %v1025_v17 = vsel %vm1018_vm0, %v8052_v53, %v981_v13  ;;  %v900_v4 = vor.u32 %v898_v58, %v8308_v42  ;;  %v7280_v13 = vld [vmem:[%s10554_s5 + $0x28] sm:$0xff]  }
  0x90   : > { %v8314_v53 = vsel %vm750_vm2, %v889_v5, %v900_v4  ;;  %2283 = vmatpush1.bf16.msra.mxu0 %v7276_v63  ;;  %v7279_v5 = vld [vmem:[%s10554_s5 + $0x20] sm:$0xff]  }
  0x91   : > { %v987_v32 = vpop.permute.xlu0 %986  ;;  %v989_v60 = vpop.permute.xlu1 %988  ;;  %2284 = vmatprep.subr.bf16.mxu0 %v10568_v1 }
  0x92   : > { %v1037_v34 = vsel %vm1018_vm0, %v8091_v10, %v987_v32 }
  0x93   : > { %1303 = vmatmul.mubr.bf16.gmra.mrb[4].mxu0 %v1025_v17  ;;  %v7283_v17 = vld [vmem:[%s10554_s5 + $0x40] sm:$0xff]  }
  0x94   : > { %6591 = vmatprep.mubr.msk.bf16.mxu0 %vm1018_vm0, %v8043_v48  ;;  %v1033_v48 = vsel %vm1018_vm0, %v8074_v3, %v985_v31  ;;  %2285 = vmatpush1.bf16.msra.mxu0 %v7277_v2 }
  0x95   : > { %v991_v3 = vpop.permute.xlu0 %990  ;;  %v993_v10 = vpop.permute.xlu1 %992  ;;  %2286 = vmatprep.subr.bf16.mxu0 %v10568_v1 }
  0x9b   : > { %1311 = vmatmul.mubr.bf16.gmra.mrb[8].mxu0 %v1029_v30 }
  0x9c   : > { %6592 = vmatprep.mubr.msk.bf16.mxu0 %vm1018_vm0, %v8058_v57  ;;  %v1041_v57 = vsel %vm1018_vm0, %v8096_v12, %v989_v60  ;;  %v995_v12 = vpop.permute.xlu0 %994 }
  0xa3   : > { %1319 = vmatmul.mubr.bf16.gmra.mrb[12].mxu0 %v1033_v48 }
  0xa4   : > { %6593 = vmatprep.mubr.msk.bf16.mxu0 %vm1018_vm0, %v8082_v6  ;;  %v1045_v6 = vsel %vm1018_vm0, %v8127_v26, %v991_v3  ;;  %v997_v26 = vpop.permute.xlu1 %996 }
  0xab   : > { %1327 = vmatmul.mubr.bf16.gmra.mrb[16].mxu0 %v1037_v34 }
  0xac   : > { %6594 = vmatprep.mubr.msk.bf16.mxu0 %vm1018_vm0, %v8087_v9  ;;  %v1049_v9 = vsel %vm1018_vm0, %v8152_v40, %v993_v10  ;;  %v999_v40 = vpop.permute.xlu0 %998 }
  0xb3   : > { %1335 = vmatmul.mubr.bf16.gmra.mrb[20].mxu0 %v1041_v57 }
  0xb4   : > { %6595 = vmatprep.mubr.msk.bf16.mxu0 %vm1018_vm0, %v8121_v25  ;;  %v1053_v25 = vsel %vm1018_vm0, %v8173_v55, %v995_v12  ;;  %v1001_v55 = vpop.permute.xlu1 %1000 }
  0xbb   : > { %1343 = vmatmul.mubr.bf16.gmra.mrb[24].mxu0 %v1045_v6 }
  0xbc   : > { %6596 = vmatprep.mubr.msk.bf16.mxu0 %vm1018_vm0, %v8149_v37  ;;  %v1057_v37 = vsel %vm1018_vm0, %v8193_v11, %v997_v26  ;;  %v1003_v11 = vpop.permute.xlu0 %1002 }
  0xc3   : > { %1351 = vmatmul.mubr.bf16.gmra.mrb[28].mxu0 %v1049_v9 }
  0xc4   : > { %6597 = vmatprep.mubr.msk.bf16.mxu0 %vm1018_vm0, %v8170_v52  ;;  %v1061_v52 = vsel %vm1018_vm0, %v8219_v15, %v999_v40  ;;  %v1005_v15 = vpop.permute.xlu1 %1004 }
  0xcb   : > { %1359 = vmatmul.mubr.bf16.gmra.mrb[32].mxu0 %v1053_v25 }
  0xcc   : > { %6598 = vmatprep.mubr.msk.bf16.mxu0 %vm1018_vm0, %v8190_v7  ;;  %v1065_v7 = vsel %vm1018_vm0, %v8239_v51, %v1001_v55  ;;  %v1007_v51 = vpop.permute.xlu0 %1006 }
  0xd3   : > { %1367 = vmatmul.mubr.bf16.gmra.mrb[36].mxu0 %v1057_v37 }
  0xd4   : > { %6599 = vmatprep.mubr.msk.bf16.mxu0 %vm1018_vm0, %v8206_v23  ;;  %v1069_v23 = vsel %vm1018_vm0, %v8247_v0, %v1003_v11  ;;  %v1009_v0 = vpop.permute.xlu1 %1008  ;;  %v569_v11 = vld [vmem:[%s10586_s20 + $0x98] sm:$0xff] }
  0xd8   : > { %v1013_v28 = vpop.permute.xlu1 %1012 }
  0xd9   : > { %v1089_v41 = vsel %vm1018_vm0, %v8302_v20, %v1013_v28  ;;  %v7285_v20 = vld [vmem:[%s10554_s5 + $0x50] sm:$0xff]  }
  0xdb   : > { %1375 = vmatmul.mubr.bf16.gmra.mrb[40].mxu0 %v1061_v52 }
  0xdc   : > { %6600 = vmatprep.mubr.msk.bf16.mxu0 %vm1018_vm0, %v8228_v44  ;;  %v1073_v44 = vsel %vm1018_vm0, %v8255_v19, %v1005_v15  ;;  %v1011_v19 = vpop.permute.xlu0 %1010  ;;  %v1017_v61 = vpop.permute.xlu1 %1016 }
  0xe0   : > { %v1015_v29 = vpop.permute.xlu0 %1014  ;;  %v8452_v3 = vpop.permute.xlu1 %1502 }
  0xe3   : > { %1383 = vmatmul.mubr.bf16.gmra.mrb[44].mxu0 %v1065_v7 }
  0xe4   : > { %6601 = vmatprep.mubr.msk.bf16.mxu0 %vm1018_vm0, %v8242_v59  ;;  %v1077_v59 = vsel %vm1018_vm0, %v8263_v49, %v1007_v51  ;;  %v970_v49 = vor.u32 %v8290_v43, %v895_v18  ;;  %v7278_v43 = vld [vmem:[%s10554_s5 + $0x18] sm:$0xff]   ;;  %v7284_v18 = vld [vmem:[%s10554_s5 + $0x48] sm:$0xff]   ;;  %v8450_v57 = vpop.permute.xlu0 %1497 }
  0xe5   : > { %2287 = vmatpush1.bf16.msra.mxu0 %v7278_v43 }
  0xe6   : > { %2288 = vmatprep.subr.bf16.mxu0 %v10568_v1 }
  0xe8   : > { %v8462_v51 = vpop.permute.xlu0 %1512 }
  0xe9   : > { %2289 = vmatpush1.bf16.msra.mxu0 %v7279_v5 }
  0xea   : > { %2290 = vmatprep.subr.bf16.mxu0 %v10568_v1 }
  0xeb   : > { %1391 = vmatmul.mubr.bf16.gmra.mrb[48].mxu0 %v1069_v23 }
  0xec   : > { %6602 = vmatprep.mubr.msk.bf16.mxu0 %vm1018_vm0, %v8250_v8  ;;  %v1081_v8 = vsel %vm1018_vm0, %v8276_v45, %v1009_v0  ;;  %v903_v45 = vshrl.u32 %v7823_v14, 16  ;;  %v570_v14 = vld [vmem:[%s10586_s20 + $0xa0] sm:$0xff]  ;;  %v8481_v62 = vpop.permute.xlu0 %1522 }
  0xed   : > { %2291 = vmatpush1.bf16.msra.mxu0 %v7280_v13 }
  0xee   : > { %v905_v46 = vrot.slane %v903_v45, 7  ;;  %2292 = vmatprep.subr.bf16.mxu0 %v10568_v1 }
  0xf0   : > { %v908_v56 = vor.u32 %v906_v36, %v905_v46 }
  0xf2   : > { %v909_v58 = vsel %vm750_vm2, %v8308_v42, %v908_v56  ;;  %v7286_v42 = vld [vmem:[%s10554_s5 + $0x58] sm:$0xff]  }
  0xf3   : > { %1399 = vmatmul.mubr.bf16.gmra.mrb[52].mxu0 %v1073_v44 }
  0xf4   : > { %6603 = vmatprep.mubr.msk.bf16.mxu0 %vm1018_vm0, %v8258_v24  ;;  %v1085_v24 = vsel %vm1018_vm0, %v8287_v21, %v1011_v19  ;;  %v1097_v21 = vsel %vm1018_vm0, %v909_v58, %v1017_v61 }
  0xfb   : > { %1407 = vmatmul.mubr.bf16.gmra.mrb[56].mxu0 %v1077_v59  ;;  %v8464_v59 = vpop.permute.xlu1 %1507 }
  0xfc   : > { %6604 = vmatprep.mubr.msk.bf16.mxu0 %vm1018_vm0, %v8271_v39  ;;  %v971_v39 = vrot.slane %v906_v36, 1 }
  0xfe   : > { %v972_v16 = vsel %vm914_vm1, %v970_v49, %v971_v39  ;;  %v973_v47 = vor.u32 %v971_v39, %v903_v45 }
 0x100   : > { %v977_v54 = vsel %vm8383_vm6, %v973_v47, 0 }
 0x103   : > { %1415 = vmatmul.mubr.bf16.gmra.mrb[60].mxu0 %v1081_v8 }
 0x104   : > { %6605 = vmatprep.mubr.msk.bf16.mxu0 %vm1018_vm0, %v8279_v33  ;;  %v1093_v33 = vsel %vm1018_vm0, %v8314_v53, %v1015_v29 }
 0x10b   : > { %1423 = vmatmul.mubr.bf16.gmra.mrb[64].mxu0 %v1085_v24 }
 0x10c   : > { %6606 = vmatprep.mubr.msk.bf16.mxu0 %vm1018_vm0, %v8296_v38  ;;  %v7281_v38 = vld [vmem:[%s10554_s5 + $0x30] sm:$0xff]  }
 0x10d   : > { %2293 = vmatpush1.bf16.msra.mxu0 %v7281_v38 }
 0x10e   : > { %2294 = vmatprep.subr.bf16.mxu0 %v10568_v1 }
 0x111   : > { %2295 = vmatpush1.bf16.msra.mxu0 %v7282_v27  ;;  %v572_v27 = vld [vmem:[%s10586_s20 + $0xb0] sm:$0xff] }
 0x112   : > { %2296 = vmatprep.subr.bf16.mxu0 %v10568_v1 }
 0x113   : > { %1431 = vmatmul.mubr.bf16.gmra.mrb[68].mxu0 %v1089_v41 }
 0x114   : > { %6607 = vmatprep.mubr.msk.bf16.mxu0 %vm1018_vm0, %v972_v16 }
 0x115   : > { %2297 = vmatpush1.bf16.msra.mxu0 %v7283_v17 }
 0x116   : > { %2298 = vmatprep.subr.bf16.mxu0 %v10568_v1 }
 0x119   : > { %2299 = vmatpush1.bf16.msra.mxu0 %v7284_v18 }
 0x11a   : > { %2300 = vmatprep.subr.bf16.mxu0 %v10568_v1 }
 0x11b   : > { %1439 = vmatmul.mubr.bf16.gmra.mrb[72].mxu0 %v1093_v33  ;;  %v571_v33 = vld [vmem:[%s10586_s20 + $0xa8] sm:$0xff] }
 0x11c   : > { %6608 = vmatprep.mubr.msk.bf16.mxu0 %vm1018_vm0, %v977_v54  ;;  %v8479_v54 = vpop.permute.xlu1 %1517 }
 0x11d   : > { %2301 = vmatpush1.bf16.msra.mxu0 %v7285_v20 }
 0x11e   : > { %2302 = vmatprep.subr.bf16.mxu0 %v10568_v1 }
 0x121   : > { %2303 = vmatpush1.bf16.msra.mxu0 %v7286_v42 }
 0x122   : > { %3037 = vmatprep.subr.bf16.mxu0 %v10568_v1 }
 0x123   : > { %1447 = vmatmul.mubr.bf16.gmra.mrb[76].mxu0 %v1097_v21 }
 0x15e   : > { %v1296_v4 = vpop.f32.mrb[0].mxu0 }
 0x15f   : > { %v1297_v30 = vadd.f32 %v8446_v22, %v1296_v4  ;;  %v1298_v53 = vpop.f32.mrb[1].mxu0 }
 0x160   : > { %v1299_v31 = vpop.f32.mrb[2].mxu0 }
 0x161   : > { %v1455_v48 = vmax.f32 %v1297_v30, 0.0  ;;  %v1300_v32 = vadd.f32 %v8446_v22, %v1299_v31  ;;  %v1301_v34 = vpop.f32.mrb[3].mxu0 }
 0x162   : > { %v573_v34 = vld [vmem:[%s10586_s20 + $0xb8] sm:$0xff] }
 0x163   : > { %v1456_v60 = vmax.f32 %v1300_v32, 0.0  ;;  %v1695_v6 = vmul.f32 %v8450_v57, %v1455_v48 }
 0x165   : > { %v1696_v10 = vmul.f32 %v8452_v3, %v1456_v60 }
 0x166   : > { %v1304_v9 = vpop.f32.mrb[4].mxu0 }
 0x167   : > { %v1305_v12 = vadd.f32 %v8446_v22, %v1304_v9  ;;  %v1306_v25 = vpop.f32.mrb[5].mxu0  ;;  %v1735_v26 = vpack.c.bf16 %v1696_v10, %v1695_v6  ;;  %v8499_v9 = vpop.permute.xlu0 %1532 }
 0x168   : > { %v1307_v37 = vpop.f32.mrb[6].mxu0 }
 0x169   : > { %v1457_v40 = vmax.f32 %v1305_v12, 0.0  ;;  %v1308_v52 = vadd.f32 %v8446_v22, %v1307_v37  ;;  %v1309_v55 = vpop.f32.mrb[7].mxu0  ;;  %1997 = vrot.lane.b32.xlu1 %v1735_v26, %s7833_s27  ;;  %v1756_v7 = vshrl.u32 %v1735_v26, 16  ;;  %v1759_v15 = vshll.u32 %v1735_v26, 16  ;;  %v8501_v12 = vpop.permute.xlu1 %1527 }
 0x16a   : > { %v574_v55 = vld [vmem:[%s10586_s20 + $0xc0] sm:$0xff] }
 0x16b   : > { %v1458_v23 = vmax.f32 %v1308_v52, 0.0  ;;  %v1758_v44 = vrot.slane %v1756_v7, 7  ;;  %v1697_v0 = vmul.f32 %v8464_v59, %v1457_v40  ;;  %v1916_v28 = vrot.slane %v1759_v15, 1 }
 0x16d   : > { %v1698_v8 = vmul.f32 %v8462_v51, %v1458_v23  ;;  %1592 = vperm.xlu1 %7242, %v569_v11   ;;  %v8468_v19 = vor.u32 %v1759_v15, %v1758_v44  ;;  %v1917_v58 = vor.u32 %v1916_v28, %v1756_v7 }
 0x16e   : > { %v1312_v24 = vpop.f32.mrb[8].mxu0 }
 0x16f   : > { %v1313_v36 = vadd.f32 %v8446_v22, %v1312_v24  ;;  %v1314_v49 = vpop.f32.mrb[9].mxu0  ;;  %v1736_v39 = vpack.c.bf16 %v1698_v8, %v1697_v0 }
 0x170   : > { %v1315_v41 = vpop.f32.mrb[10].mxu0  ;;  %v575_v49 = vld [vmem:[%s10586_s20 + $0xc8] sm:$0xff] }
 0x171   : > { %v1459_v16 = vmax.f32 %v1313_v36, 0.0  ;;  %v1316_v45 = vadd.f32 %v8446_v22, %v1315_v41  ;;  %1999 = vrot.lane.b32.xlu0 %v1736_v39, %s7833_s27  ;;  %v1763_v46 = vshrl.u32 %v1736_v39, 16  ;;  %v1766_v47 = vshll.u32 %v1736_v39, 16  ;;  %1597 = vperm.xlu1 %7242, %v570_v14   ;;  %v1317_v29 = vpop.f32.mrb[11].mxu0 }
 0x173   : > { %v1460_v56 = vmax.f32 %v1316_v45, 0.0  ;;  %v1918_v61 = vrot.slane %v1766_v47, 1  ;;  %v1765_v21 = vrot.slane %v1763_v46, 7  ;;  %v1699_v63 = vmul.f32 %v8479_v54, %v1459_v16  ;;  %v8520_v45 = vpop.permute.xlu0 %1542 }
 0x175   : > { %v1700_v2 = vmul.f32 %v8481_v62, %v1460_v56  ;;  %1602 = vperm.xlu0 %7241, %v571_v33   ;;  %v1919_v43 = vsel %vm914_vm1, %v1917_v58, %v1918_v61  ;;  %v1920_v5 = vor.u32 %v1918_v61, %v1763_v46  ;;  %v1768_v13 = vor.u32 %v1766_v47, %v1765_v21  ;;  %v8522_v46 = vpop.permute.xlu1 %1537  ;;  %v576_v61 = vld [vmem:[%s10586_s20 + $0xd0] sm:$0xff] }
 0x176   : > { %v1320_v38 = vpop.f32.mrb[12].mxu0  ;;  %6622 = vmatprep.mubr.msk.bf16.mxu0 %vm1018_vm0, %v1919_v43 }
 0x177   : > { %v1321_v17 = vadd.f32 %v8446_v22, %v1320_v38  ;;  %v1322_v18 = vpop.f32.mrb[13].mxu0  ;;  %v1737_v20 = vpack.c.bf16 %v1700_v2, %v1699_v63  ;;  %v8492_v42 = vsel %vm750_vm2, %v1758_v44, %v1768_v13 }
 0x178   : > { %v1323_v4 = vpop.f32.mrb[14].mxu0 }
 0x179   : > { %v1461_v30 = vmax.f32 %v1321_v17, 0.0  ;;  %v1324_v53 = vadd.f32 %v8446_v22, %v1323_v4  ;;  %1607 = vperm.xlu0 %7241, %v572_v27   ;;  %v1771_v31 = vshrl.u32 %v1737_v20, 16  ;;  %v1774_v48 = vshll.u32 %v1737_v20, 16  ;;  %2001 = vrot.lane.b32.xlu1 %v1737_v20, %s7833_s27  ;;  %v1325_v32 = vpop.f32.mrb[15].mxu0  ;;  %v577_v20 = vld [vmem:[%s10586_s20 + $0xd8] sm:$0xff] }
 0x17a   : > { %v8543_v32 = vpop.permute.xlu1 %1547 }
 0x17b   : > { %v1462_v60 = vmax.f32 %v1324_v53, 0.0  ;;  %v1921_v6 = vrot.slane %v1774_v48, 1  ;;  %v1773_v10 = vrot.slane %v1771_v31, 7  ;;  %v1701_v25 = vmul.f32 %v8501_v12, %v1461_v30 }
 0x17d   : > { %v1702_v26 = vmul.f32 %v8499_v9, %v1462_v60  ;;  %1612 = vperm.xlu1 %7242, %v573_v34   ;;  %v8506_v37 = vsel %vm914_vm1, %v1920_v5, %v1921_v6  ;;  %v1776_v40 = vor.u32 %v1774_v48, %v1773_v10  ;;  %v1923_v28 = vor.u32 %v1921_v6, %v1771_v31  ;;  %v8541_v48 = vpop.permute.xlu0 %1552 }
 0x17e   : > { %v1328_v52 = vpop.f32.mrb[16].mxu0 }
 0x17f   : > { %v1329_v7 = vadd.f32 %v8446_v22, %v1328_v52  ;;  %v1330_v11 = vpop.f32.mrb[17].mxu0  ;;  %v1738_v23 = vpack.c.bf16 %v1702_v26, %v1701_v25  ;;  %v8513_v15 = vsel %vm750_vm2, %v1765_v21, %v1776_v40  ;;  %v578_v26 = vld [vmem:[%s10586_s20 + $0xe0] sm:$0xff] }
 0x180   : > { %v1331_v44 = vpop.f32.mrb[18].mxu0 }
 0x181   : > { %v1463_v0 = vmax.f32 %v1329_v7, 0.0  ;;  %v1332_v8 = vadd.f32 %v8446_v22, %v1331_v44  ;;  %v1779_v24 = vshrl.u32 %v1738_v23, 16  ;;  %v1782_v14 = vshll.u32 %v1738_v23, 16  ;;  %2003 = vrot.lane.b32.xlu0 %v1738_v23, %s7833_s27  ;;  %1617 = vperm.xlu1 %7242, %v574_v55   ;;  %v1333_v36 = vpop.f32.mrb[19].mxu0 }
 0x183   : > { %v1464_v39 = vmax.f32 %v1332_v8, 0.0  ;;  %v1924_v41 = vrot.slane %v1782_v14, 1  ;;  %v1781_v16 = vrot.slane %v1779_v24, 7  ;;  %v1703_v47 = vmul.f32 %v8522_v46, %v1463_v0 }
 0x185   : > { %v1704_v29 = vmul.f32 %v8520_v45, %v1464_v39  ;;  %1622 = vperm.xlu0 %7241, %v575_v49   ;;  %v8527_v33 = vsel %vm914_vm1, %v1923_v28, %v1924_v41  ;;  %v1784_v56 = vor.u32 %v1782_v14, %v1781_v16  ;;  %v1926_v30 = vor.u32 %v1924_v41, %v1779_v24  ;;  %v579_v14 = vld [vmem:[%s10586_s20 + $0xe8] sm:$0xff]  ;;  %v8562_v41 = vpop.permute.xlu0 %1562 }
 0x186   : > { %v1336_v58 = vpop.f32.mrb[20].mxu0  ;;  %10592 = vst [vmem:[#allocation5_spill] sm:$0xff] %v8562_v41 }
 0x187   : > { %v1337_v21 = vadd.f32 %v8446_v22, %v1336_v58  ;;  %v1338_v63 = vpop.f32.mrb[21].mxu0  ;;  %v1739_v2 = vpack.c.bf16 %v1704_v29, %v1703_v47  ;;  %v8534_v43 = vsel %vm750_vm2, %v1773_v10, %v1784_v56 }
 0x188   : > { %v1339_v5 = vpop.f32.mrb[22].mxu0 }
 0x189   : > { %v1465_v13 = vmax.f32 %v1337_v21, 0.0  ;;  %v1340_v38 = vadd.f32 %v8446_v22, %v1339_v5  ;;  %1627 = vperm.xlu0 %7241, %v576_v61   ;;  %v1787_v27 = vshrl.u32 %v1739_v2, 16  ;;  %v1790_v17 = vshll.u32 %v1739_v2, 16  ;;  %2005 = vrot.lane.b32.xlu1 %v1739_v2, %s7833_s27  ;;  %v1341_v18 = vpop.f32.mrb[23].mxu0  ;;  %v580_v21 = vld [vmem:[%s10586_s20 + $0xf0] sm:$0xff] }
 0x18b   : > { %v1466_v4 = vmax.f32 %v1340_v38, 0.0  ;;  %v1927_v53 = vrot.slane %v1790_v17, 1  ;;  %v1789_v31 = vrot.slane %v1787_v27, 7  ;;  %v1705_v34 = vmul.f32 %v8543_v32, %v1465_v13 }
 0x18d   : > { %v1706_v60 = vmul.f32 %v8541_v48, %v1466_v4  ;;  %1632 = vperm.xlu1 %7242, %v577_v20   ;;  %v8548_v6 = vsel %vm914_vm1, %v1926_v30, %v1927_v53  ;;  %v1792_v10 = vor.u32 %v1790_v17, %v1789_v31  ;;  %v1929_v49 = vor.u32 %v1927_v53, %v1787_v27  ;;  %v581_v30 = vld [vmem:[%s10586_s20 + $0xf8] sm:$0xff] }
 0x18e   : > { %v1344_v25 = vpop.f32.mrb[24].mxu0 }
 0x18f   : > { %v1345_v40 = vadd.f32 %v8446_v22, %v1344_v25  ;;  %v1346_v52 = vpop.f32.mrb[25].mxu0  ;;  %v1740_v55 = vpack.c.bf16 %v1706_v60, %v1705_v34  ;;  %v8555_v7 = vsel %vm750_vm2, %v1781_v16, %v1792_v10  ;;  %v8564_v16 = vpop.permute.xlu1 %1557 }
 0x190   : > { %v1347_v11 = vpop.f32.mrb[26].mxu0 }
 0x191   : > { %v1467_v23 = vmax.f32 %v1345_v40, 0.0  ;;  %v1348_v44 = vadd.f32 %v8446_v22, %v1347_v11  ;;  %v1795_v0 = vshrl.u32 %v1740_v55, 16  ;;  %v1798_v8 = vshll.u32 %v1740_v55, 16  ;;  %2007 = vrot.lane.b32.xlu0 %v1740_v55, %s7833_s27  ;;  %1637 = vperm.xlu1 %7242, %v578_v26   ;;  %v1349_v24 = vpop.f32.mrb[27].mxu0 }
 0x193   : > { %v1468_v36 = vmax.f32 %v1348_v44, 0.0  ;;  %v1930_v39 = vrot.slane %v1798_v8, 1  ;;  %v1797_v28 = vrot.slane %v1795_v0, 7  ;;  %v1707_v47 = vmul.f32 %v8564_v16, %v1467_v23  ;;  %v8585_v25 = vpop.permute.xlu1 %1567  ;;  %v582_v23 = vld [vmem:[%s10586_s20 + $0x100] sm:$0xff] }
 0x194   : > { %10594 = vst [vmem:[#allocation7_spill] sm:$0xff] %v8585_v25 }
 0x195   : > { %v1708_v29 = vmul.f32 %v8562_v41, %v1468_v36  ;;  %1642 = vperm.xlu0 %7241, %v579_v14   ;;  %v8569_v56 = vsel %vm914_vm1, %v1929_v49, %v1930_v39  ;;  %v1800_v58 = vor.u32 %v1798_v8, %v1797_v28  ;;  %v1932_v34 = vor.u32 %v1930_v39, %v1795_v0 }
 0x196   : > { %v1352_v61 = vpop.f32.mrb[28].mxu0 }
 0x197   : > { %v1353_v63 = vadd.f32 %v8446_v22, %v1352_v61  ;;  %v1354_v2 = vpop.f32.mrb[29].mxu0  ;;  %v1741_v5 = vpack.c.bf16 %v1708_v29, %v1707_v47  ;;  %v8576_v13 = vsel %vm750_vm2, %v1789_v31, %v1800_v58  ;;  %v8583_v31 = vpop.permute.xlu0 %1572  ;;  %v583_v58 = vld [vmem:[%s10586_s20 + $0x108] sm:$0xff] }
 0x198   : > { %v1355_v38 = vpop.f32.mrb[30].mxu0  ;;  %10593 = vst [vmem:[#allocation6_spill] sm:$0xff] %v8583_v31 }
 0x199   : > { %v1469_v27 = vmax.f32 %v1353_v63, 0.0  ;;  %v1356_v17 = vadd.f32 %v8446_v22, %v1355_v38  ;;  %1647 = vperm.xlu0 %7241, %v580_v21   ;;  %v1803_v18 = vshrl.u32 %v1741_v5, 16  ;;  %v1806_v20 = vshll.u32 %v1741_v5, 16  ;;  %2009 = vrot.lane.b32.xlu1 %v1741_v5, %s7833_s27  ;;  %v1357_v4 = vpop.f32.mrb[31].mxu0  ;;  %v8606_v5 = vpop.permute.xlu1 %1577 }
 0x19a   : > { %10596 = vst [vmem:[#allocation9_spill] sm:$0xff] %v8606_v5 }
 0x19b   : > { %v1470_v53 = vmax.f32 %v1356_v17, 0.0  ;;  %v1933_v60 = vrot.slane %v1806_v20, 1  ;;  %v1805_v10 = vrot.slane %v1803_v18, 7  ;;  %v1709_v26 = vmul.f32 %v8585_v25, %v1469_v27 }
 0x19d   : > { %v1710_v40 = vmul.f32 %v8583_v31, %v1470_v53  ;;  %1652 = vperm.xlu1 %7242, %v581_v30   ;;  %v8590_v52 = vsel %vm914_vm1, %v1932_v34, %v1933_v60  ;;  %v1808_v55 = vor.u32 %v1806_v20, %v1805_v10  ;;  %v1935_v21 = vor.u32 %v1933_v60, %v1803_v18  ;;  %v584_v18 = vld [vmem:[%s10586_s20 + $0x110] sm:$0xff] }
 0x19e   : > { %v1360_v11 = vpop.f32.mrb[32].mxu0 }
 0x19f   : > { %v1361_v44 = vadd.f32 %v8446_v22, %v1360_v11  ;;  %v1362_v0 = vpop.f32.mrb[33].mxu0  ;;  %v1742_v8 = vpack.c.bf16 %v1710_v40, %v1709_v26  ;;  %v8597_v24 = vsel %vm750_vm2, %v1797_v28, %v1808_v55  ;;  %v8604_v28 = vpop.permute.xlu0 %1582  ;;  %v585_v11 = vld [vmem:[%s10586_s20 + $0x118] sm:$0xff] }
 0x1a0   : > { %v1363_v14 = vpop.f32.mrb[34].mxu0  ;;  %10595 = vst [vmem:[#allocation8_spill] sm:$0xff] %v8604_v28 }
 0x1a1   : > { %v1471_v36 = vmax.f32 %v1361_v44, 0.0  ;;  %v1364_v49 = vadd.f32 %v8446_v22, %v1363_v14  ;;  %v1811_v39 = vshrl.u32 %v1742_v8, 16  ;;  %v1814_v47 = vshll.u32 %v1742_v8, 16  ;;  %2011 = vrot.lane.b32.xlu0 %v1742_v8, %s7833_s27  ;;  %1657 = vperm.xlu1 %7242, %v582_v23   ;;  %v1365_v29 = vpop.f32.mrb[35].mxu0  ;;  %v586_v14 = vld [vmem:[%s10586_s20 + $0x120] sm:$0xff] }
 0x1a3   : > { %v1472_v61 = vmax.f32 %v1364_v49, 0.0  ;;  %v1936_v63 = vrot.slane %v1814_v47, 1  ;;  %v1813_v2 = vrot.slane %v1811_v39, 7  ;;  %v1711_v38 = vmul.f32 %v8606_v5, %v1471_v36 }
 0x1a5   : > { %v1712_v27 = vmul.f32 %v8604_v28, %v1472_v61  ;;  %1662 = vperm.xlu0 %7241, %v583_v58   ;;  %v8611_v17 = vsel %vm914_vm1, %v1935_v21, %v1936_v63  ;;  %v1816_v20 = vor.u32 %v1814_v47, %v1813_v2  ;;  %v1938_v23 = vor.u32 %v1936_v63, %v1811_v39 }
 0x1a6   : > { %v1368_v4 = vpop.f32.mrb[36].mxu0 }
 0x1a7   : > { %v8616_v30 = vpack.c.bf16 %v1712_v27, %v1711_v38  ;;  %v1370_v53 = vpop.f32.mrb[37].mxu0  ;;  %v8619_v34 = vsel %vm750_vm2, %v1805_v10, %v1816_v20 }
 0x1a8   : > { %v1371_v60 = vpop.f32.mrb[38].mxu0 }
 0x1a9   : > { %1667 = vperm.xlu0 %7241, %v584_v18   ;;  %v10570_v26 = vshrl.u32 %v8616_v30, 16  ;;  %v1822_v40 = vshll.u32 %v8616_v30, 16  ;;  %2013 = vrot.lane.b32.xlu1 %v8616_v30, %s7833_s27  ;;  %v1373_v55 = vpop.f32.mrb[39].mxu0 }
 0x1ab   : > { %v8628_v44 = vrot.slane %v1822_v40, 1  ;;  %v8632_v10 = vrot.slane %v10570_v26, 7 }
 0x1ad   : > { %1672 = vperm.xlu1 %7242, %v585_v11   ;;  %v8636_v0 = vsel %vm914_vm1, %v1938_v23, %v8628_v44  ;;  %v1824_v8 = vor.u32 %v1822_v40, %v8632_v10 }
 0x1ae   : > { %v1376_v36 = vpop.f32.mrb[40].mxu0 }
 0x1af   : > { %v1378_v49 = vpop.f32.mrb[41].mxu0  ;;  %v8643_v39 = vsel %vm750_vm2, %v1813_v2, %v1824_v8 }
 0x1b0   : > { %v1379_v47 = vpop.f32.mrb[42].mxu0 }
 0x1b1   : > { %1677 = vperm.xlu1 %7242, %v586_v14   ;;  %v1381_v29 = vpop.f32.mrb[43].mxu0  ;;  %v1380_v5 = vadd.f32 %v8446_v22, %v1379_v47 }
 0x1b6   : > { %v1384_v58 = vpop.f32.mrb[44].mxu0 }
 0x1b7   : > { %v1386_v61 = vpop.f32.mrb[45].mxu0 }
 0x1b8   : > { %v8645_v21 = vpop.f32.mrb[46].mxu0 }
 0x1b9   : > { %v1389_v63 = vpop.f32.mrb[47].mxu0 }
 0x1be   : > { %v8647_v38 = vpop.f32.mrb[48].mxu0 }
 0x1bf   : > { %v1394_v27 = vpop.f32.mrb[49].mxu0 }
 0x1c0   : > { %v8649_v20 = vpop.f32.mrb[50].mxu0 }
 0x1c1   : > { %v1397_v18 = vpop.f32.mrb[51].mxu0 }
 0x1c2   : > { %v1915_v18 = vsel %vm8266_vm4, 0, %v8468_v19  ;;  %v1369_v19 = vadd.f32 %v8446_v22, %v1368_v4  ;;  %v1377_v4 = vadd.f32 %v8446_v22, %v1376_v36  ;;  %v587_v36 = vld [vmem:[%s10586_s20 + $0x128] sm:$0xff] }
 0x1c6   : > { %v8651_v53 = vpop.f32.mrb[52].mxu0 }
 0x1c7   : > { %v1402_v40 = vpop.f32.mrb[53].mxu0 }
 0x1c8   : > { %v8653_v55 = vpop.f32.mrb[54].mxu0 }
 0x1c9   : > { %v1405_v2 = vpop.f32.mrb[55].mxu0 }
 0x1ce   : > { %v8655_v11 = vpop.f32.mrb[56].mxu0 }
 0x1cf   : > { %v1410_v23 = vpop.f32.mrb[57].mxu0 }
 0x1d0   : > { %v8657_v8 = vpop.f32.mrb[58].mxu0  ;;  %v8671_v23 = vpop.permute.xlu0 %1587 }
 0x1d1   : > { %v1413_v14 = vpop.f32.mrb[59].mxu0  ;;  %10597 = vst [vmem:[#allocation10_spill] sm:$0xff] %v8671_v23 }
 0x1d6   : > { %v8659_v49 = vpop.f32.mrb[60].mxu0 }
 0x1d7   : > { %v1418_v29 = vpop.f32.mrb[61].mxu0 }
 0x1d8   : > { %v8661_v61 = vpop.f32.mrb[62].mxu0 }
 0x1d9   : > { %v1421_v63 = vpop.f32.mrb[63].mxu0 }
 0x1db   : > { %v1998_v27 = vpop.permute.xlu1 %1997 }
 0x1dc   : > { %v2039_v40 = vsel %vm1018_vm0, %v1915_v18, %v1998_v27 }
 0x1dd   : > { %2313 = vmatmul.mubr.bf16.vlgmr.msra.gmra.mrb[80].mxu0 %v2039_v40 }
 0x1de   : > { %6623 = vmatprep.mubr.msk.bf16.mxu0 %vm1018_vm0, %v8506_v37  ;;  %v8669_v2 = vpop.f32.mrb[64].mxu0  ;;  %v1372_v37 = vadd.f32 %v8446_v22, %v1371_v60 }
 0x1df   : > { %v1426_v14 = vpop.f32.mrb[65].mxu0 }
 0x1e0   : > { %v8673_v29 = vpop.f32.mrb[66].mxu0  ;;  %v1473_v14 = vmax.f32 %v1369_v19, 0.0 }
 0x1e1   : > { %v1429_v1 = vpop.f32.mrb[67].mxu0 }
 0x1e2   : > { %v1474_v1 = vmax.f32 %v1372_v37, 0.0 }
 0x1e3   : > { %v2000_v63 = vpop.permute.xlu0 %1999 }
 0x1e4   : > { %v2043_v26 = vsel %vm1018_vm0, %v8492_v42, %v2000_v63  ;;  %v1713_v42 = vmul.f32 %v8671_v23, %v1473_v14 }
 0x1e5   : > { %2321 = vmatmul.mubr.bf16.gmra.mrb[84].mxu0 %v2043_v26 }
 0x1e6   : > { %6624 = vmatprep.mubr.msk.bf16.mxu0 %vm1018_vm0, %v8527_v33  ;;  %v8680_v27 = vpop.f32.mrb[68].mxu0 }
 0x1e7   : > { %v1434_v18 = vpop.f32.mrb[69].mxu0 }
 0x1e8   : > { %v8683_v40 = vpop.f32.mrb[70].mxu0 }
 0x1e9   : > { %v1437_v35 = vpop.f32.mrb[71].mxu0 }
 0x1ea   : > { %v1475_v35 = vmax.f32 %v1377_v4, 0.0 }
 0x1ec   : > { %v8685_v28 = vpop.permute.xlu1 %1592 }
 0x1ed   : > { %10598 = vst [vmem:[#allocation11_spill] sm:$0xff] %v8685_v28  ;;  %v1714_v26 = vmul.f32 %v8685_v28, %v1474_v1  ;;  %v1476_v28 = vmax.f32 %v1380_v5, 0.0 }
 0x1ee   : > { %v8690_v63 = vpop.f32.mrb[72].mxu0 }
 0x1ef   : > { %v1744_v33 = vpack.c.bf16 %v1714_v26, %v1713_v42  ;;  %v1442_v60 = vpop.f32.mrb[73].mxu0  ;;  %v10600_v42 = vshrl.u32 %v8616_v30, 16 }
 0x1f0   : > { %v8693_v18 = vpop.permute.xlu1 %1597  ;;  %v8695_v31 = vpop.f32.mrb[74].mxu0  ;;  %v1385_v60 = vadd.f32 %v8446_v22, %v1384_v58 }
 0x1f1   : > { %10599 = vst [vmem:[#allocation12_spill] sm:$0xff] %v8693_v18  ;;  %v1827_v19 = vshrl.u32 %v1744_v33, 16  ;;  %v1830_v37 = vshll.u32 %v1744_v33, 16  ;;  %2015 = vrot.lane.b32.xlu0 %v1744_v33, %s7833_s27  ;;  %v1445_v14 = vpop.f32.mrb[75].mxu0  ;;  %v1941_v47 = vor.u32 %v8628_v44, %v10600_v42  ;;  %v1388_v33 = vadd.f32 %v8446_v22, %v8645_v21  ;;  %v588_v44 = vld [vmem:[%s10586_s20 + $0x130] sm:$0xff] }
 0x1f2   : > { %v1715_v14 = vmul.f32 %v8693_v18, %v1475_v35 }
 0x1f3   : > { %v1829_v1 = vrot.slane %v1827_v19, 7  ;;  %v1942_v26 = vrot.slane %v1830_v37, 1 }
 0x1f4   : > { %v8705_v23 = vpop.permute.xlu0 %1602  ;;  %v2002_v4 = vpop.permute.xlu1 %2001 }
 0x1f5   : > { %10601 = vst [vmem:[#allocation13_spill] sm:$0xff] %v8705_v23  ;;  %v1716_v25 = vmul.f32 %v8705_v23, %v1476_v28  ;;  %1682 = vperm.xlu0 %7241, %v587_v36   ;;  %v2047_v5 = vsel %vm1018_vm0, %v8513_v15, %v2002_v4  ;;  %v8714_v30 = vsel %vm914_vm1, %v1941_v47, %v1942_v26  ;;  %v1477_v36 = vmax.f32 %v1385_v60, 0.0 }
 0x1f6   : > { %2329 = vmatmul.mubr.bf16.gmra.mrb[88].mxu0 %v2047_v5  ;;  %v8719_v58 = vpop.f32.mrb[76].mxu0  ;;  %v8721_v42 = vor.u32 %v1830_v37, %v1829_v1  ;;  %v1478_v5 = vmax.f32 %v1388_v33, 0.0  ;;  %v1396_v60 = vadd.f32 %v8446_v22, %v8649_v20 }
 0x1f7   : > { %v1745_v21 = vpack.c.bf16 %v1716_v25, %v1715_v14  ;;  %6625 = vmatprep.mubr.msk.bf16.mxu0 %vm1018_vm0, %v8548_v6  ;;  %v1450_v28 = vpop.f32.mrb[77].mxu0  ;;  %v589_v25 = vld [vmem:[%s10586_s20 + $0x138] sm:$0xff]  ;;  %v1944_v14 = vor.u32 %v1942_v26, %v1827_v19 }
 0x1f8   : > { %v8725_v35 = vpop.permute.xlu0 %1607  ;;  %v8727_v15 = vpop.f32.mrb[78].mxu0  ;;  %v1393_v28 = vadd.f32 %v8446_v22, %v8647_v38 }
 0x1f9   : > { %v1835_v47 = vshrl.u32 %v1745_v21, 16  ;;  %v1838_v4 = vshll.u32 %v1745_v21, 16  ;;  %1687 = vperm.xlu0 %7241, %v588_v44   ;;  %2017 = vrot.lane.b32.xlu1 %v1745_v21, %s7833_s27  ;;  %v1453_v23 = vpop.f32.mrb[79].mxu0  ;;  %v1717_v33 = vmul.f32 %v8725_v35, %v1477_v36 }
 0x1fa   : > { %v1479_v36 = vmax.f32 %v1393_v28, 0.0 }
 0x1fb   : > { %v1837_v37 = vrot.slane %v1835_v47, 7  ;;  %v1945_v6 = vrot.slane %v1838_v4, 1 }
 0x1fc   : > { %v2004_v18 = vpop.permute.xlu0 %2003  ;;  %v8735_v41 = vpop.permute.xlu1 %1612 }
 0x1fd   : > { %10602 = vst [vmem:[#allocation14_spill] sm:$0xff] %v8735_v41  ;;  %v1718_v23 = vmul.f32 %v8735_v41, %v1478_v5  ;;  %1692 = vperm.xlu1 %7242, %v589_v25   ;;  %v2051_v44 = vsel %vm1018_vm0, %v8534_v43, %v2004_v18  ;;  %v8744_v19 = vsel %vm914_vm1, %v1944_v14, %v1945_v6  ;;  %v1480_v41 = vmax.f32 %v1396_v60, 0.0 }
 0x1fe   : > { %2337 = vmatmul.mubr.bf16.gmra.mrb[92].mxu0 %v2051_v44  ;;  %v1840_v26 = vor.u32 %v1838_v4, %v1837_v37  ;;  %v1947_v18 = vor.u32 %v1945_v6, %v1835_v47  ;;  %v1401_v4 = vadd.f32 %v8446_v22, %v8651_v53 }
 0x1ff   : > { %v1746_v38 = vpack.c.bf16 %v1718_v23, %v1717_v33  ;;  %6626 = vmatprep.mubr.msk.bf16.mxu0 %vm1018_vm0, %v8569_v56  ;;  %v1404_v23 = vadd.f32 %v8446_v22, %v8653_v55 }
 0x200   : > { %v8748_v21 = vpop.permute.xlu1 %1617  ;;  %v8751_v20 = vsel %vm750_vm2, %v1829_v1, %v1840_v26  ;;  %v1481_v26 = vmax.f32 %v1401_v4, 0.0 }
 0x201   : > { %v1843_v5 = vshrl.u32 %v1746_v38, 16  ;;  %v1846_v25 = vshll.u32 %v1746_v38, 16  ;;  %2019 = vrot.lane.b32.xlu0 %v1746_v38, %s7833_s27  ;;  %v1719_v1 = vmul.f32 %v8748_v21, %v1479_v36  ;;  %v1482_v36 = vmax.f32 %v1404_v23, 0.0 }
 0x203   : > { %v1845_v43 = vrot.slane %v1843_v5, 7  ;;  %v1948_v14 = vrot.slane %v1846_v25, 1 }
 0x204   : > { %v8756_v33 = vpop.permute.xlu0 %1622  ;;  %v2006_v56 = vpop.permute.xlu1 %2005 }
 0x205   : > { %v1720_v28 = vmul.f32 %v8756_v33, %v1480_v41  ;;  %v2055_v60 = vsel %vm1018_vm0, %v8555_v7, %v2006_v56  ;;  %v8765_v44 = vsel %vm914_vm1, %v1947_v18, %v1948_v14  ;;  %v1848_v47 = vor.u32 %v1846_v25, %v1845_v43 }
 0x206   : > { %2345 = vmatmul.mubr.bf16.gmra.mrb[96].mxu0 %v2055_v60  ;;  %v1950_v18 = vor.u32 %v1948_v14, %v1843_v5  ;;  %v1409_v25 = vadd.f32 %v8446_v22, %v8655_v11 }
 0x207   : > { %v1747_v6 = vpack.c.bf16 %v1720_v28, %v1719_v1  ;;  %6627 = vmatprep.mubr.msk.bf16.mxu0 %vm1018_vm0, %v8590_v52  ;;  %v8772_v55 = vsel %vm750_vm2, %v1837_v37, %v1848_v47  ;;  %v1412_v52 = vadd.f32 %v8446_v22, %v8657_v8 }
 0x208   : > { %v8769_v53 = vpop.permute.xlu0 %1627  ;;  %v1483_v47 = vmax.f32 %v1409_v25, 0.0 }
 0x209   : > { %v1851_v38 = vshrl.u32 %v1747_v6, 16  ;;  %v1854_v41 = vshll.u32 %v1747_v6, 16  ;;  %2021 = vrot.lane.b32.xlu1 %v1747_v6, %s7833_s27  ;;  %v1721_v37 = vmul.f32 %v8769_v53, %v1481_v26 }
 0x20b   : > { %v1853_v7 = vrot.slane %v1851_v38, 7  ;;  %v1951_v56 = vrot.slane %v1854_v41, 1 }
 0x20c   : > { %v2008_v1 = vpop.permute.xlu0 %2007  ;;  %v8777_v28 = vpop.permute.xlu1 %1632 }
 0x20d   : > { %v1722_v4 = vmul.f32 %v8777_v28, %v1482_v36  ;;  %v2059_v23 = vsel %vm1018_vm0, %v8576_v13, %v2008_v1  ;;  %v8786_v60 = vsel %vm914_vm1, %v1950_v18, %v1951_v56  ;;  %v1856_v5 = vor.u32 %v1854_v41, %v1853_v7 }
 0x20e   : > { %2353 = vmatmul.mubr.bf16.gmra.mrb[100].mxu0 %v2059_v23  ;;  %v1484_v36 = vmax.f32 %v1412_v52, 0.0  ;;  %v1953_v18 = vor.u32 %v1951_v56, %v1851_v38  ;;  %v1417_v41 = vadd.f32 %v8446_v22, %v8659_v49 }
 0x20f   : > { %v1748_v14 = vpack.c.bf16 %v1722_v4, %v1721_v37  ;;  %6628 = vmatprep.mubr.msk.bf16.mxu0 %vm1018_vm0, %v8611_v17  ;;  %v8793_v8 = vsel %vm750_vm2, %v1845_v43, %v1856_v5  ;;  %v1420_v4 = vadd.f32 %v8446_v22, %v8661_v61 }
 0x210   : > { %v8790_v11 = vpop.permute.xlu1 %1637  ;;  %v1485_v5 = vmax.f32 %v1417_v41, 0.0 }
 0x211   : > { %v1859_v6 = vshrl.u32 %v1748_v14, 16  ;;  %v1862_v26 = vshll.u32 %v1748_v14, 16  ;;  %2023 = vrot.lane.b32.xlu0 %v1748_v14, %s7833_s27  ;;  %v1723_v43 = vmul.f32 %v8790_v11, %v1483_v47 }
 0x213   : > { %v1861_v13 = vrot.slane %v1859_v6, 7  ;;  %v1954_v1 = vrot.slane %v1862_v26, 1 }
 0x214   : > { %v8798_v37 = vpop.permute.xlu0 %1642  ;;  %v2010_v17 = vpop.permute.xlu1 %2009 }
 0x215   : > { %v1724_v25 = vmul.f32 %v8798_v37, %v1484_v36  ;;  %v2063_v52 = vsel %vm1018_vm0, %v8597_v24, %v2010_v17  ;;  %v8807_v23 = vsel %vm914_vm1, %v1953_v18, %v1954_v1  ;;  %v1864_v38 = vor.u32 %v1862_v26, %v1861_v13 }
 0x216   : > { %2361 = vmatmul.mubr.bf16.gmra.mrb[104].mxu0 %v2063_v52  ;;  %v1486_v36 = vmax.f32 %v1420_v4, 0.0  ;;  %v1956_v18 = vor.u32 %v1954_v1, %v1859_v6  ;;  %v1425_v26 = vadd.f32 %v8446_v22, %v8669_v2 }
 0x217   : > { %v1749_v56 = vpack.c.bf16 %v1724_v25, %v1723_v43  ;;  %6629 = vmatprep.mubr.msk.bf16.mxu0 %vm1018_vm0, %v8636_v0  ;;  %v8814_v61 = vsel %vm750_vm2, %v1853_v7, %v1864_v38  ;;  %v1428_v0 = vadd.f32 %v8446_v22, %v8673_v29 }
 0x218   : > { %v8811_v49 = vpop.permute.xlu0 %1647  ;;  %v1487_v38 = vmax.f32 %v1425_v26, 0.0 }
 0x219   : > { %v1867_v14 = vshrl.u32 %v1749_v56, 16  ;;  %v1870_v47 = vshll.u32 %v1749_v56, 16  ;;  %2025 = vrot.lane.b32.xlu1 %v1749_v56, %s7833_s27  ;;  %v1725_v7 = vmul.f32 %v8811_v49, %v1485_v5  ;;  %v1488_v56 = vmax.f32 %v1428_v0, 0.0 }
 0x21b   : > { %v1869_v24 = vrot.slane %v1867_v14, 7  ;;  %v1957_v17 = vrot.slane %v1870_v47, 1 }
 0x21c   : > { %v2012_v43 = vpop.permute.xlu0 %2011  ;;  %v8821_v25 = vpop.permute.xlu1 %1652 }
 0x21d   : > { %v1726_v41 = vmul.f32 %v8821_v25, %v1486_v36  ;;  %v2067_v4 = vsel %vm1018_vm0, %v8619_v34, %v2012_v43  ;;  %v8828_v52 = vsel %vm914_vm1, %v1956_v18, %v1957_v17  ;;  %v1872_v6 = vor.u32 %v1870_v47, %v1869_v24 }
 0x21e   : > { %2369 = vmatmul.mubr.bf16.gmra.mrb[108].mxu0 %v2067_v4  ;;  %v1959_v18 = vor.u32 %v1957_v17, %v1867_v14  ;;  %v1433_v47 = vadd.f32 %v8446_v22, %v8680_v27  ;;  %v1436_v14 = vadd.f32 %v8446_v22, %v8683_v40 }
 0x21f   : > { %v1750_v1 = vpack.c.bf16 %v1726_v41, %v1725_v7  ;;  %6630 = vmatprep.mubr.msk.bf16.mxu0 %vm1018_vm0, %v8714_v30  ;;  %v8835_v29 = vsel %vm750_vm2, %v1861_v13, %v1872_v6 }
 0x220   : > { %v8832_v2 = vpop.permute.xlu1 %1657  ;;  %v1489_v6 = vmax.f32 %v1433_v47, 0.0 }
 0x221   : > { %v1875_v5 = vshrl.u32 %v1750_v1, 16  ;;  %v1878_v36 = vshll.u32 %v1750_v1, 16  ;;  %2027 = vrot.lane.b32.xlu0 %v1750_v1, %s7833_s27  ;;  %v1727_v41 = vmul.f32 %v8832_v2, %v1487_v38 }
 0x223   : > { %v1877_v34 = vrot.slane %v1875_v5, 7  ;;  %v1960_v43 = vrot.slane %v1878_v36, 1 }
 0x224   : > { %v8840_v7 = vpop.permute.xlu0 %1662  ;;  %v2014_v30 = vpop.permute.xlu1 %2013 }
 0x225   : > { %v1728_v13 = vmul.f32 %v8840_v7, %v1488_v56  ;;  %v2071_v26 = vsel %vm1018_vm0, %v8643_v39, %v2014_v30  ;;  %v8847_v0 = vsel %vm914_vm1, %v1959_v18, %v1960_v43  ;;  %v1880_v4 = vor.u32 %v1878_v36, %v1877_v34 }
 0x226   : > { %2377 = vmatmul.mubr.bf16.gmra.mrb[112].mxu0 %v2071_v26  ;;  %v1490_v56 = vmax.f32 %v1436_v14, 0.0  ;;  %v1962_v36 = vor.u32 %v1960_v43, %v1875_v5 }
 0x227   : > { %v1751_v17 = vpack.c.bf16 %v1728_v13, %v1727_v41  ;;  %6631 = vmatprep.mubr.msk.bf16.mxu0 %vm1018_vm0, %v8744_v19  ;;  %v8854_v27 = vsel %vm750_vm2, %v1869_v24, %v1880_v4 }
 0x228   : > { %v8857_v39 = vpop.permute.xlu0 %1667 }
 0x229   : > { %v1883_v1 = vshrl.u32 %v1751_v17, 16  ;;  %v1886_v38 = vshll.u32 %v1751_v17, 16  ;;  %2029 = vrot.lane.b32.xlu1 %v1751_v17, %s7833_s27  ;;  %v1729_v40 = vmul.f32 %v8857_v39, %v1489_v6 }
 0x22b   : > { %v1885_v18 = vrot.slane %v1883_v1, 7  ;;  %v1963_v30 = vrot.slane %v1886_v38, 1 }
 0x22c   : > { %v8859_v26 = vpop.permute.xlu1 %1672 }
 0x22d   : > { %v1730_v19 = vmul.f32 %v8859_v26, %v1490_v56  ;;  %v8864_v24 = vsel %vm914_vm1, %v1962_v36, %v1963_v30  ;;  %v1888_v47 = vor.u32 %v1886_v38, %v1885_v18  ;;  %v1965_v43 = vor.u32 %v1963_v30, %v1883_v1 }
 0x22f   : > { %v1752_v41 = vpack.c.bf16 %v1730_v19, %v1729_v40  ;;  %v8867_v13 = vsel %vm750_vm2, %v1877_v34, %v1888_v47  ;;  %v1833_v34 = vsel %vm750_vm2, %v8632_v10, %v8721_v42  ;;  %v1444_v10 = vadd.f32 %v8446_v22, %v8695_v31 }
 0x230   : > { %v8885_v1 = vpop.permute.xlu1 %1677 }
 0x231   : > { %v1891_v4 = vshrl.u32 %v1752_v41, 16  ;;  %v1894_v17 = vshll.u32 %v1752_v41, 16  ;;  %2031 = vrot.lane.b32.xlu0 %v1752_v41, %s7833_s27  ;;  %v1492_v47 = vmax.f32 %v1444_v10, 0.0 }
 0x233   : > { %v8870_v5 = vrot.slane %v1891_v4, 7  ;;  %v1966_v14 = vrot.slane %v1894_v17, 1 }
 0x235   : > { %v8873_v6 = vsel %vm914_vm1, %v1965_v43, %v1966_v14  ;;  %v1896_v56 = vor.u32 %v1894_v17, %v8870_v5 }
 0x237   : > { %v8877_v36 = vsel %vm750_vm2, %v1885_v18, %v1896_v56  ;;  %v1441_v18 = vadd.f32 %v8446_v22, %v8690_v63 }
 0x239   : > { %v1491_v42 = vmax.f32 %v1441_v18, 0.0 }
 0x263   : > { %v2016_v38 = vpop.permute.xlu0 %2015 }
 0x264   : > { %v2075_v40 = vsel %vm1018_vm0, %v1833_v34, %v2016_v38 }
 0x265   : > { %2385 = vmatmul.mubr.bf16.gmra.mrb[116].mxu0 %v2075_v40 }
 0x266   : > { %6632 = vmatprep.mubr.msk.bf16.mxu0 %vm1018_vm0, %v8765_v44  ;;  %v1731_v44 = vmul.f32 %v8885_v1, %v1491_v42 }
 0x26b   : > { %v2018_v30 = vpop.permute.xlu1 %2017 }
 0x26c   : > { %v2079_v19 = vsel %vm1018_vm0, %v8751_v20, %v2018_v30  ;;  %v1449_v20 = vadd.f32 %v8446_v22, %v8719_v58  ;;  %v1968_v30 = vor.u32 %v1966_v14, %v1891_v4 }
 0x26d   : > { %2393 = vmatmul.mubr.bf16.gmra.mrb[120].mxu0 %v2079_v19 }
 0x26e   : > { %6633 = vmatprep.mubr.msk.bf16.mxu0 %vm1018_vm0, %v8786_v60  ;;  %v1452_v60 = vadd.f32 %v8446_v22, %v8727_v15  ;;  %v1493_v31 = vmax.f32 %v1449_v20, 0.0 }
 0x270   : > { %v1494_v34 = vmax.f32 %v1452_v60, 0.0 }
 0x274   : > { %v8895_v41 = vpop.permute.xlu0 %1682 }
 0x275   : > { %v1732_v17 = vmul.f32 %v8895_v41, %v1492_v47 }
 0x277   : > { %v1753_v43 = vpack.c.bf16 %v1732_v17, %v1731_v44 }
 0x278   : > { %v8903_v56 = vpop.permute.xlu0 %1687 }
 0x279   : > { %v1899_v63 = vshrl.u32 %v1753_v43, 16  ;;  %v1902_v38 = vshll.u32 %v1753_v43, 16  ;;  %2033 = vrot.lane.b32.xlu1 %v1753_v43, %s7833_s27  ;;  %v1733_v58 = vmul.f32 %v8903_v56, %v1493_v31 }
 0x27b   : > { %v1901_v40 = vrot.slane %v1899_v63, 7  ;;  %v1969_v19 = vrot.slane %v1902_v38, 1 }
 0x27c   : > { %v2020_v18 = vpop.permute.xlu0 %2019  ;;  %v8906_v10 = vpop.permute.xlu1 %1692 }
 0x27d   : > { %v1734_v42 = vmul.f32 %v8906_v10, %v1494_v34  ;;  %v2083_v22 = vsel %vm1018_vm0, %v8772_v55, %v2020_v18  ;;  %v1970_v15 = vsel %vm914_vm1, %v1968_v30, %v1969_v19  ;;  %v8913_v47 = vor.u32 %v1902_v38, %v1901_v40  ;;  %v7290_v18 = vld [vmem:[%s10556_s7 + $0x18] sm:$0xff]  }
 0x27e   : > { %2401 = vmatmul.mubr.bf16.gmra.mrb[124].mxu0 %v2083_v22  ;;  %v1971_v20 = vor.u32 %v1969_v19, %v1899_v63  ;;  %v7287_v63 = vld [vmem:[%s10556_s7] sm:$0xff]   ;;  %v10603_v30 = vmov 0  }
 0x27f   : > { %v8915_v44 = vpack.c.bf16 %v1734_v42, %v1733_v58  ;;  %6634 = vmatprep.mubr.msk.bf16.mxu0 %vm1018_vm0, %v8807_v23  ;;  %3038 = vmatpush1.bf16.msra.mxu0 %v7287_v63  ;;  %v7292_v42 = vld [vmem:[%s10556_s7 + $0x28] sm:$0xff]  }
 0x280   : > { %v2022_v17 = vpop.permute.xlu1 %2021  ;;  %3039 = vmatprep.subr.bf16.mxu0 %v10603_v30 }
 0x281   : > { %v1910_v4 = vshll.u32 %v8915_v44, 16  ;;  %2035 = vrot.lane.b32.xlu0 %v8915_v44, %s7833_s27  ;;  %v1907_v14 = vshrl.u32 %v8915_v44, 16  ;;  %v2087_v43 = vsel %vm1018_vm0, %v8793_v8, %v2022_v17  ;;  %v7288_v8 = vld [vmem:[%s10556_s7 + $0x8] sm:$0xff]  }
 0x283   : > { %v8923_v55 = vrot.slane %v1910_v4, 1  ;;  %v1909_v60 = vrot.slane %v1907_v14, 7  ;;  %v2024_v34 = vpop.permute.xlu0 %2023  ;;  %3040 = vmatpush1.bf16.msra.mxu0 %v7288_v8 }
 0x284   : > { %v2091_v19 = vsel %vm1018_vm0, %v8814_v61, %v2024_v34  ;;  %3041 = vmatprep.subr.bf16.mxu0 %v10603_v30 }
 0x285   : > { %v1973_v23 = vsel %vm914_vm1, %v1971_v20, %v8923_v55  ;;  %v1912_v38 = vor.u32 %v1910_v4, %v1909_v60  ;;  %v7294_v4 = vld [vmem:[%s10556_s7 + $0x38] sm:$0xff]  }
 0x286   : > { %2409 = vmatmul.mubr.bf16.gmra.mrb[128].mxu0 %v2087_v43 }
 0x287   : > { %6635 = vmatprep.mubr.msk.bf16.mxu0 %vm1018_vm0, %v8828_v52  ;;  %v8934_v31 = vsel %vm750_vm2, %v1901_v40, %v1912_v38  ;;  %v7289_v52 = vld [vmem:[%s10556_s7 + $0x10] sm:$0xff]  }
 0x288   : > { %3042 = vmatpush1.bf16.msra.mxu0 %v7289_v52 }
 0x289   : > { %3043 = vmatprep.subr.bf16.mxu0 %v10603_v30 }
 0x28b   : > { %v2026_v40 = vpop.permute.xlu1 %2025 }
 0x28c   : > { %v2095_v61 = vsel %vm1018_vm0, %v8835_v29, %v2026_v40  ;;  %3044 = vmatpush1.bf16.msra.mxu0 %v7290_v18 }
 0x28d   : > { %3045 = vmatprep.subr.bf16.mxu0 %v10603_v30 }
 0x28e   : > { %2417 = vmatmul.mubr.bf16.gmra.mrb[132].mxu0 %v2091_v19 }
 0x28f   : > { %6636 = vmatprep.mubr.msk.bf16.mxu0 %vm1018_vm0, %v8847_v0  ;;  %v7291_v0 = vld [vmem:[%s10556_s7 + $0x20] sm:$0xff]  }
 0x290   : > { %3046 = vmatpush1.bf16.msra.mxu0 %v7291_v0 }
 0x291   : > { %3047 = vmatprep.subr.bf16.mxu0 %v10603_v30 }
 0x293   : > { %v2028_v58 = vpop.permute.xlu0 %2027 }
 0x294   : > { %v2099_v29 = vsel %vm1018_vm0, %v8854_v27, %v2028_v58  ;;  %3048 = vmatpush1.bf16.msra.mxu0 %v7292_v42 }
 0x295   : > { %3049 = vmatprep.subr.bf16.mxu0 %v10603_v30 }
 0x296   : > { %2425 = vmatmul.mubr.bf16.gmra.mrb[136].mxu0 %v2095_v61 }
 0x297   : > { %6637 = vmatprep.mubr.msk.bf16.mxu0 %vm1018_vm0, %v8864_v24  ;;  %v7293_v24 = vld [vmem:[%s10556_s7 + $0x30] sm:$0xff]  }
 0x298   : > { %3050 = vmatpush1.bf16.msra.mxu0 %v7293_v24 }
 0x299   : > { %3051 = vmatprep.subr.bf16.mxu0 %v10603_v30 }
 0x29b   : > { %v2030_v22 = vpop.permute.xlu1 %2029 }
 0x29c   : > { %v2103_v27 = vsel %vm1018_vm0, %v8867_v13, %v2030_v22  ;;  %3052 = vmatpush1.bf16.msra.mxu0 %v7294_v4  ;;  %v8992_v13 = vld [vmem:[%s10555_s6] ss:$0 sm:$0xff]  ;;  %v7298_v4 = vld [vmem:[%s10556_s7 + $0x58] sm:$0xff]  }
 0x29d   : > { %3053 = vmatprep.subr.bf16.mxu0 %v10603_v30 }
 0x29e   : > { %2433 = vmatmul.mubr.bf16.gmra.mrb[140].mxu0 %v2099_v29 }
 0x29f   : > { %6638 = vmatprep.mubr.msk.bf16.mxu0 %vm1018_vm0, %v8873_v6  ;;  %v7295_v6 = vld [vmem:[%s10556_s7 + $0x40] sm:$0xff]  }
 0x2a0   : > { %3054 = vmatpush1.bf16.msra.mxu0 %v7295_v6 }
 0x2a1   : > { %3055 = vmatprep.subr.bf16.mxu0 %v10603_v30 }
 0x2a3   : > { %v2032_v17 = vpop.permute.xlu0 %2031 }
 0x2a4   : > { %v2107_v20 = vsel %vm1018_vm0, %v8877_v36, %v2032_v17 }
 0x2a6   : > { %2441 = vmatmul.mubr.bf16.gmra.mrb[144].mxu0 %v2103_v27 }
 0x2a7   : > { %6639 = vmatprep.mubr.msk.bf16.mxu0 %vm1018_vm0, %v1970_v15 }
 0x2ae   : > { %2449 = vmatmul.mubr.bf16.gmra.mrb[148].mxu0 %v2107_v20 }
 0x2af   : > { %6640 = vmatprep.mubr.msk.bf16.mxu0 %vm1018_vm0, %v1973_v23  ;;  %v7296_v23 = vld [vmem:[%s10556_s7 + $0x48] sm:$0xff]  }
 0x2b0   : > { %v2314_v15 = vpop.f32.mrb[80].mxu0  ;;  %3056 = vmatpush1.bf16.msra.mxu0 %v7296_v23 }
 0x2b1   : > { %v2315_v60 = vadd.f32 %v8992_v13, %v2314_v15  ;;  %v2316_v43 = vpop.f32.mrb[81].mxu0  ;;  %3057 = vmatprep.subr.bf16.mxu0 %v10603_v30 }
 0x2b2   : > { %v2317_v38 = vpop.f32.mrb[82].mxu0 }
 0x2b3   : > { %v2473_v63 = vmax.f32 %v2315_v60, 0.0  ;;  %v2318_v34 = vadd.f32 %v8992_v13, %v2317_v38  ;;  %v2319_v8 = vpop.f32.mrb[83].mxu0 }
 0x2b5   : > { %v2513_v19 = vmul.f32 %v2473_v63, %v8450_v57  ;;  %v2474_v36 = vmax.f32 %v2318_v34, 0.0 }
 0x2b7   : > { %2553 = vst.msk [vmem:[#allocation2] sm:$0xff] %vm1018_vm0, %v2513_v19  ;;  %v2514_v52 = vmul.f32 %v2474_v36, %v8452_v3  ;;  %v7297_v3 = vld [vmem:[%s10556_s7 + $0x50] sm:$0xff]  }
 0x2b8   : > { %v2322_v40 = vpop.f32.mrb[84].mxu0  ;;  %3058 = vmatpush1.bf16.msra.mxu0 %v7297_v3 }
 0x2b9   : > { %2554 = vst.msk [vmem:[#allocation2 + $0x8] sm:$0xff] %vm1018_vm0, %v2514_v52  ;;  %v2323_v18 = vadd.f32 %v8992_v13, %v2322_v40  ;;  %v2324_v61 = vpop.f32.mrb[85].mxu0  ;;  %3059 = vmatprep.subr.bf16.mxu0 %v10603_v30 }
 0x2ba   : > { %v2325_v0 = vpop.f32.mrb[86].mxu0 }
 0x2bb   : > { %v2475_v57 = vmax.f32 %v2323_v18, 0.0  ;;  %v2326_v58 = vadd.f32 %v8992_v13, %v2325_v0  ;;  %v2327_v42 = vpop.f32.mrb[87].mxu0 }
 0x2bc   : > { %3060 = vmatpush1.bf16.msra.mxu0 %v7298_v4 }
 0x2bd   : > { %v2515_v29 = vmul.f32 %v2475_v57, %v8464_v59  ;;  %v2476_v24 = vmax.f32 %v2326_v58, 0.0 }
 0x2bf   : > { %2555 = vst.msk [vmem:[#allocation2 + $0x10] sm:$0xff] %vm1018_vm0, %v2515_v29  ;;  %v2516_v22 = vmul.f32 %v2476_v24, %v8462_v51 }
 0x2c0   : > { %v2593_v27 = vld [vmem:[#allocation2] ss:$2 sm:$0xff]  ;;  %v2633_v6 = vld [vmem:[#allocation2 + $0x1] ss:$2 sm:$0xff] }
 0x2c1   : > { %2556 = vst.msk [vmem:[#allocation2 + $0x18] sm:$0xff] %vm1018_vm0, %v2516_v22  ;;  %v2672_v17 = vadd.f32 %v2633_v6, %v2593_v27 }
 0x2c3   : > { %v2692_v63 = vmul.f32 0.5, %v2672_v17 }
 0x2c8   : > { %v2595_v20 = vld [vmem:[#allocation2 + $0x10] ss:$2 sm:$0xff]  ;;  %v2635_v59 = vld [vmem:[#allocation2 + $0x11] ss:$2 sm:$0xff] }
 0x2c9   : > { %v2330_v15 = vpop.f32.mrb[88].mxu0  ;;  %v2673_v60 = vadd.f32 %v2635_v59, %v2595_v20 }
 0x2ca   : > { %v2331_v30 = vadd.f32 %v8992_v13, %v2330_v15  ;;  %v2332_v43 = vpop.f32.mrb[89].mxu0 }
 0x2cb   : > { %v2333_v38 = vpop.f32.mrb[90].mxu0  ;;  %v2693_v51 = vmul.f32 0.5, %v2673_v60 }
 0x2cc   : > { %v2477_v34 = vmax.f32 %v2331_v30, 0.0  ;;  %v2334_v8 = vadd.f32 %v8992_v13, %v2333_v38  ;;  %v2335_v19 = vpop.f32.mrb[91].mxu0 }
 0x2cd   : > { %v9020_v36 = vpack.c.bf16 %v2693_v51, %v2692_v63 }
 0x2ce   : > { %v2517_v52 = vmul.f32 %v2477_v34, %v8479_v54  ;;  %v2478_v23 = vmax.f32 %v2334_v8, 0.0 }
 0x2cf   : > { %2844 = vrot.lane.b32.xlu1 %v9020_v36, %s7833_s27  ;;  %v2723_v40 = vshrl.u32 %v9020_v36, 16  ;;  %v2726_v61 = vshll.u32 %v9020_v36, 16  ;;  %v10606_v36 = vld [vmem:[#allocation6_spill] sm:$0xff] }
 0x2d0   : > { %2557 = vst.msk [vmem:[#allocation2 + $0x20] sm:$0xff] %vm1018_vm0, %v2517_v52  ;;  %v2518_v18 = vmul.f32 %v2478_v23, %v8481_v62 }
 0x2d1   : > { %v2338_v0 = vpop.f32.mrb[92].mxu0  ;;  %v9031_v57 = vrot.slane %v2723_v40, 7 }
 0x2d2   : > { %2558 = vst.msk [vmem:[#allocation2 + $0x28] sm:$0xff] %vm1018_vm0, %v2518_v18  ;;  %v2339_v54 = vadd.f32 %v8992_v13, %v2338_v0  ;;  %v2340_v58 = vpop.f32.mrb[93].mxu0 }
 0x2d3   : > { %v2341_v42 = vpop.f32.mrb[94].mxu0  ;;  %v9038_v3 = vor.u32 %v2726_v61, %v9031_v57 }
 0x2d4   : > { %v2479_v29 = vmax.f32 %v2339_v54, 0.0  ;;  %v2342_v62 = vadd.f32 %v8992_v13, %v2341_v42  ;;  %v2343_v24 = vpop.f32.mrb[95].mxu0 }
 0x2d6   : > { %v2519_v22 = vmul.f32 %v2479_v29, %v8501_v12  ;;  %v2480_v4 = vmax.f32 %v2342_v62, 0.0 }
 0x2d8   : > { %2559 = vst.msk [vmem:[#allocation2 + $0x30] sm:$0xff] %vm1018_vm0, %v2519_v22  ;;  %v2520_v27 = vmul.f32 %v2480_v4, %v8499_v9 }
 0x2d9   : > { %v2346_v6 = vpop.f32.mrb[96].mxu0  ;;  %v2597_v43 = vld [vmem:[#allocation2 + $0x20] ss:$2 sm:$0xff]  ;;  %v2637_v38 = vld [vmem:[#allocation2 + $0x21] ss:$2 sm:$0xff] }
 0x2da   : > { %2560 = vst.msk [vmem:[#allocation2 + $0x38] sm:$0xff] %vm1018_vm0, %v2520_v27  ;;  %v2347_v17 = vadd.f32 %v8992_v13, %v2346_v6  ;;  %v2348_v20 = vpop.f32.mrb[97].mxu0  ;;  %v2674_v51 = vadd.f32 %v2637_v38, %v2597_v43 }
 0x2db   : > { %v2349_v59 = vpop.f32.mrb[98].mxu0 }
 0x2dc   : > { %v2481_v15 = vmax.f32 %v2347_v17, 0.0  ;;  %v2350_v60 = vadd.f32 %v8992_v13, %v2349_v59  ;;  %v2351_v30 = vpop.f32.mrb[99].mxu0  ;;  %v2694_v42 = vmul.f32 0.5, %v2674_v51  ;;  %v1974_v17 = vor.u32 %v8923_v55, %v1907_v14 }
 0x2de   : > { %v2521_v12 = vmul.f32 %v2481_v15, %v8522_v46  ;;  %v2482_v63 = vmax.f32 %v2350_v60, 0.0 }
 0x2e0   : > { %2561 = vst.msk [vmem:[#allocation2 + $0x40] sm:$0xff] %vm1018_vm0, %v2521_v12  ;;  %v2522_v9 = vmul.f32 %v2482_v63, %v8520_v45  ;;  %v1976_v63 = vsel %vm8383_vm6, %v1974_v17, 0 }
 0x2e1   : > { %v2354_v34 = vpop.f32.mrb[100].mxu0  ;;  %v2599_v8 = vld [vmem:[#allocation2 + $0x30] ss:$2 sm:$0xff]  ;;  %v2639_v19 = vld [vmem:[#allocation2 + $0x31] ss:$2 sm:$0xff] }
 0x2e2   : > { %2562 = vst.msk [vmem:[#allocation2 + $0x48] sm:$0xff] %vm1018_vm0, %v2522_v9  ;;  %v2355_v52 = vadd.f32 %v8992_v13, %v2354_v34  ;;  %v2356_v23 = vpop.f32.mrb[101].mxu0  ;;  %v2675_v18 = vadd.f32 %v2639_v19, %v2599_v8 }
 0x2e3   : > { %v2357_v0 = vpop.f32.mrb[102].mxu0 }
 0x2e4   : > { %v2483_v54 = vmax.f32 %v2355_v52, 0.0  ;;  %v2358_v58 = vadd.f32 %v8992_v13, %v2357_v0  ;;  %v2359_v46 = vpop.f32.mrb[103].mxu0  ;;  %v2695_v29 = vmul.f32 0.5, %v2675_v18  ;;  %v10604_v52 = vld [vmem:[#allocation5_spill] sm:$0xff] }
 0x2e6   : > { %v2523_v62 = vmul.f32 %v2483_v54, %v8543_v32  ;;  %v2484_v45 = vmax.f32 %v2358_v58, 0.0  ;;  %v2713_v24 = vpack.c.bf16 %v2695_v29, %v2694_v42 }
 0x2e8   : > { %2563 = vst.msk [vmem:[#allocation2 + $0x50] sm:$0xff] %vm1018_vm0, %v2523_v62  ;;  %v2524_v22 = vmul.f32 %v2484_v45, %v8541_v48  ;;  %2846 = vrot.lane.b32.xlu0 %v2713_v24, %s7833_s27  ;;  %v2730_v4 = vshrl.u32 %v2713_v24, 16  ;;  %v2733_v27 = vshll.u32 %v2713_v24, 16  ;;  %v1905_v48 = vsel %vm750_vm2, %v8870_v5, %v8913_v47 }
 0x2e9   : > { %v2362_v6 = vpop.f32.mrb[104].mxu0  ;;  %v2601_v55 = vld [vmem:[#allocation2 + $0x40] ss:$2 sm:$0xff]  ;;  %v2641_v12 = vld [vmem:[#allocation2 + $0x41] ss:$2 sm:$0xff]  ;;  %v2803_v5 = vrot.slane %v2726_v61, 1 }
 0x2ea   : > { %2564 = vst.msk [vmem:[#allocation2 + $0x58] sm:$0xff] %vm1018_vm0, %v2524_v22  ;;  %v2363_v20 = vadd.f32 %v8992_v13, %v2362_v6  ;;  %v2364_v32 = vpop.f32.mrb[105].mxu0  ;;  %v2805_v59 = vrot.slane %v2733_v27, 1  ;;  %v9062_v15 = vrot.slane %v2730_v4, 7  ;;  %v2676_v47 = vadd.f32 %v2641_v12, %v2601_v55  ;;  %v10605_v6 = vld [vmem:[#allocation7_spill] sm:$0xff] }
 0x2eb   : > { %v2034_v60 = vpop.permute.xlu1 %2033  ;;  %v2365_v30 = vpop.f32.mrb[106].mxu0  ;;  %v2804_v29 = vor.u32 %v2803_v5, %v2723_v40  ;;  %v10607_v5 = vld [vmem:[#allocation9_spill] sm:$0xff] }
 0x2ec   : > { %v2485_v43 = vmax.f32 %v2363_v20, 0.0  ;;  %v2366_v38 = vadd.f32 %v8992_v13, %v2365_v30  ;;  %v2367_v44 = vpop.f32.mrb[107].mxu0  ;;  %v2111_v14 = vsel %vm1018_vm0, %v1905_v48, %v2034_v60  ;;  %v2807_v9 = vor.u32 %v2805_v59, %v2730_v4 }
 0x2ed   : > { %2457 = vmatmul.mubr.bf16.gmra.mrb[152].mxu0 %v2111_v14  ;;  %v2735_v51 = vor.u32 %v2733_v27, %v9062_v15  ;;  %v2806_v27 = vsel %vm914_vm1, %v2804_v29, %v2805_v59 }
 0x2ee   : > { %v2525_v34 = vmul.f32 %v2485_v43, %v8564_v16  ;;  %v2486_v8 = vmax.f32 %v2366_v38, 0.0  ;;  %6641 = vmatprep.mubr.msk.bf16.mxu0 %vm1018_vm0, %v1976_v63 }
 0x2ef   : > { %v9078_v19 = vsel %vm750_vm2, %v9031_v57, %v2735_v51  ;;  %v2696_v57 = vmul.f32 0.5, %v2676_v47 }
 0x2f0   : > { %2565 = vst.msk [vmem:[#allocation2 + $0x60] sm:$0xff] %vm1018_vm0, %v2525_v34  ;;  %v2526_v23 = vmul.f32 %v2486_v8, %v10604_v52 }
 0x2f1   : > { %v2370_v18 = vpop.f32.mrb[108].mxu0  ;;  %v2603_v0 = vld [vmem:[#allocation2 + $0x50] ss:$2 sm:$0xff]  ;;  %v2643_v54 = vld [vmem:[#allocation2 + $0x51] ss:$2 sm:$0xff] }
 0x2f2   : > { %2566 = vst.msk [vmem:[#allocation2 + $0x68] sm:$0xff] %vm1018_vm0, %v2526_v23  ;;  %v2371_v16 = vadd.f32 %v8992_v13, %v2370_v18  ;;  %v2372_v58 = vpop.f32.mrb[109].mxu0  ;;  %v2677_v46 = vadd.f32 %v2643_v54, %v2603_v0  ;;  %v10608_v18 = vld [vmem:[#allocation8_spill] sm:$0xff] }
 0x2f3   : > { %v2036_v42 = vpop.permute.xlu0 %2035  ;;  %v2373_v61 = vpop.f32.mrb[110].mxu0 }
 0x2f4   : > { %v2487_v62 = vmax.f32 %v2371_v16, 0.0  ;;  %v2374_v45 = vadd.f32 %v8992_v13, %v2373_v61  ;;  %v2375_v24 = vpop.f32.mrb[111].mxu0  ;;  %v2115_v22 = vsel %vm1018_vm0, %v8934_v31, %v2036_v42  ;;  %v2697_v4 = vmul.f32 0.5, %v2677_v46 }
 0x2f5   : > { %2465 = vmatmul.mubr.bf16.gmra.mrb[156].mxu0 %v2115_v22 }
 0x2f6   : > { %v2527_v17 = vmul.f32 %v2487_v62, %v10605_v6  ;;  %v2488_v20 = vmax.f32 %v2374_v45, 0.0  ;;  %6655 = vmatprep.mubr.msk.bf16.mxu0 %vm1018_vm0, %v2806_v27  ;;  %v2714_v32 = vpack.c.bf16 %v2697_v4, %v2696_v57 }
 0x2f8   : > { %2567 = vst.msk [vmem:[#allocation2 + $0x70] sm:$0xff] %vm1018_vm0, %v2527_v17  ;;  %v2528_v40 = vmul.f32 %v2488_v20, %v10606_v36  ;;  %v2738_v60 = vshrl.u32 %v2714_v32, 16  ;;  %v2741_v30 = vshll.u32 %v2714_v32, 16  ;;  %2848 = vrot.lane.b32.xlu1 %v2714_v32, %s7833_s27 }
 0x2f9   : > { %v2378_v48 = vpop.f32.mrb[112].mxu0  ;;  %v2605_v51 = vld [vmem:[#allocation2 + $0x60] ss:$2 sm:$0xff]  ;;  %v2645_v34 = vld [vmem:[#allocation2 + $0x61] ss:$2 sm:$0xff] }
 0x2fa   : > { %2568 = vst.msk [vmem:[#allocation2 + $0x78] sm:$0xff] %vm1018_vm0, %v2528_v40  ;;  %v2379_v31 = vadd.f32 %v8992_v13, %v2378_v48  ;;  %v2380_v59 = vpop.f32.mrb[113].mxu0  ;;  %v2808_v43 = vrot.slane %v2741_v30, 1  ;;  %v2740_v38 = vrot.slane %v2738_v60, 7  ;;  %v2678_v54 = vadd.f32 %v2645_v34, %v2605_v51 }
 0x2fb   : > { %v2381_v44 = vpop.f32.mrb[114].mxu0 }
 0x2fc   : > { %v2489_v14 = vmax.f32 %v2379_v31, 0.0  ;;  %v2382_v55 = vadd.f32 %v8992_v13, %v2381_v44  ;;  %v2383_v12 = vpop.f32.mrb[115].mxu0  ;;  %v2809_v63 = vsel %vm914_vm1, %v2807_v9, %v2808_v43  ;;  %v2743_v8 = vor.u32 %v2741_v30, %v2740_v38  ;;  %v10610_v31 = vld [vmem:[#allocation11_spill] sm:$0xff] }
 0x2fd   : > { %v2698_v46 = vmul.f32 0.5, %v2678_v54  ;;  %v2802_v12 = vsel %vm8266_vm4, 0, %v9038_v3 }
 0x2fe   : > { %v2529_v47 = vmul.f32 %v2489_v14, %v10607_v5  ;;  %v2490_v52 = vmax.f32 %v2382_v55, 0.0  ;;  %v9102_v23 = vsel %vm750_vm2, %v9062_v15, %v2743_v8  ;;  %v2810_v15 = vor.u32 %v2808_v43, %v2738_v60  ;;  %v10609_v60 = vld [vmem:[#allocation10_spill] sm:$0xff] }
 0x300   : > { %2569 = vst.msk [vmem:[#allocation2 + $0x80] sm:$0xff] %vm1018_vm0, %v2529_v47  ;;  %v2530_v0 = vmul.f32 %v2490_v52, %v10608_v18 }
 0x301   : > { %v2607_v16 = vld [vmem:[#allocation2 + $0x70] ss:$2 sm:$0xff]  ;;  %v2647_v58 = vld [vmem:[#allocation2 + $0x71] ss:$2 sm:$0xff] }
 0x302   : > { %2570 = vst.msk [vmem:[#allocation2 + $0x88] sm:$0xff] %vm1018_vm0, %v2530_v0  ;;  %v2679_v9 = vadd.f32 %v2647_v58, %v2607_v16  ;;  %v10612_v0 = vld [vmem:[#allocation12_spill] sm:$0xff]  ;;  %v10613_v58 = vld [vmem:[#allocation13_spill] sm:$0xff] }
 0x304   : > { %v2699_v42 = vmul.f32 0.5, %v2679_v9 }
 0x306   : > { %v9107_v61 = vpack.c.bf16 %v2699_v42, %v2698_v46 }
 0x308   : > { %v2746_v29 = vshrl.u32 %v9107_v61, 16  ;;  %v2749_v57 = vshll.u32 %v9107_v61, 16  ;;  %2850 = vrot.lane.b32.xlu0 %v9107_v61, %s7833_s27 }
 0x309   : > { %v2609_v52 = vld [vmem:[#allocation2 + $0x80] ss:$2 sm:$0xff]  ;;  %v2649_v18 = vld [vmem:[#allocation2 + $0x81] ss:$2 sm:$0xff] }
 0x30a   : > { %v9113_v62 = vrot.slane %v2749_v57, 1  ;;  %v9117_v45 = vrot.slane %v2746_v29, 7  ;;  %v2680_v3 = vadd.f32 %v2649_v18, %v2609_v52 }
 0x30c   : > { %v9121_v24 = vsel %vm914_vm1, %v2810_v15, %v9113_v62  ;;  %v2751_v22 = vor.u32 %v2749_v57, %v9117_v45  ;;  %v2700_v15 = vmul.f32 0.5, %v2680_v3 }
 0x30e   : > { %v9125_v4 = vsel %vm750_vm2, %v2740_v38, %v2751_v22 }
 0x338   : > { %v2386_v27 = vpop.f32.mrb[116].mxu0 }
 0x339   : > { %v2387_v6 = vadd.f32 %v8992_v13, %v2386_v27  ;;  %v2388_v17 = vpop.f32.mrb[117].mxu0 }
 0x33a   : > { %v2389_v20 = vpop.f32.mrb[118].mxu0 }
 0x33b   : > { %v2491_v32 = vmax.f32 %v2387_v6, 0.0  ;;  %v2390_v36 = vadd.f32 %v8992_v13, %v2389_v20  ;;  %v2391_v40 = vpop.f32.mrb[119].mxu0 }
 0x33d   : > { %v2531_v30 = vmul.f32 %v2491_v32, %v10609_v60  ;;  %v2492_v48 = vmax.f32 %v2390_v36, 0.0 }
 0x33f   : > { %2571 = vst.msk [vmem:[#allocation2 + $0x90] sm:$0xff] %vm1018_vm0, %v2531_v30  ;;  %v2532_v59 = vmul.f32 %v2492_v48, %v10610_v31 }
 0x340   : > { %v2394_v43 = vpop.f32.mrb[120].mxu0 }
 0x341   : > { %2572 = vst.msk [vmem:[#allocation2 + $0x98] sm:$0xff] %vm1018_vm0, %v2532_v59  ;;  %v2395_v38 = vadd.f32 %v8992_v13, %v2394_v43  ;;  %v2396_v44 = vpop.f32.mrb[121].mxu0  ;;  %v2845_v14 = vpop.permute.xlu1 %2844 }
 0x342   : > { %v2866_v51 = vsel %vm1018_vm0, %v2802_v12, %v2845_v14  ;;  %v2397_v34 = vpop.f32.mrb[122].mxu0 }
 0x343   : > { %v2493_v8 = vmax.f32 %v2395_v38, 0.0  ;;  %v2398_v5 = vadd.f32 %v8992_v13, %v2397_v34  ;;  %v2399_v47 = vpop.f32.mrb[123].mxu0  ;;  %3070 = vmatmul.mubr.bf16.vlgmr.msra.gmra.mrb[160].mxu0 %v2866_v51  ;;  %v10614_v38 = vld [vmem:[#allocation14_spill] sm:$0xff] }
 0x344   : > { %6656 = vmatprep.mubr.msk.bf16.mxu0 %vm1018_vm0, %v2809_v63 }
 0x345   : > { %v2533_v54 = vmul.f32 %v2493_v8, %v10612_v0  ;;  %v2494_v16 = vmax.f32 %v2398_v5, 0.0 }
 0x347   : > { %2573 = vst.msk [vmem:[#allocation2 + $0xa0] sm:$0xff] %vm1018_vm0, %v2533_v54  ;;  %v2534_v9 = vmul.f32 %v2494_v16, %v10613_v58 }
 0x348   : > { %v2611_v46 = vld [vmem:[#allocation2 + $0x90] ss:$2 sm:$0xff]  ;;  %v2651_v42 = vld [vmem:[#allocation2 + $0x91] ss:$2 sm:$0xff] }
 0x349   : > { %2574 = vst.msk [vmem:[#allocation2 + $0xa8] sm:$0xff] %vm1018_vm0, %v2534_v9  ;;  %v2681_v57 = vadd.f32 %v2651_v42, %v2611_v46 }
 0x34b   : > { %v2701_v22 = vmul.f32 0.5, %v2681_v57 }
 0x34d   : > { %v9144_v27 = vpack.c.bf16 %v2701_v22, %v2700_v15 }
 0x34f   : > { %v2754_v63 = vshrl.u32 %v9144_v27, 16  ;;  %2852 = vrot.lane.b32.xlu1 %v9144_v27, %s7833_s27  ;;  %v2757_v6 = vshll.u32 %v9144_v27, 16 }
 0x350   : > { %v2613_v18 = vld [vmem:[#allocation2 + $0xa0] ss:$2 sm:$0xff]  ;;  %v2653_v0 = vld [vmem:[#allocation2 + $0xa1] ss:$2 sm:$0xff] }
 0x351   : > { %v2402_v17 = vpop.f32.mrb[124].mxu0  ;;  %v9152_v20 = vrot.slane %v2754_v63, 7  ;;  %v2682_v9 = vadd.f32 %v2653_v0, %v2613_v18 }
 0x352   : > { %v2403_v32 = vadd.f32 %v8992_v13, %v2402_v17  ;;  %v2404_v36 = vpop.f32.mrb[125].mxu0 }
 0x353   : > { %v2405_v40 = vpop.f32.mrb[126].mxu0  ;;  %v9156_v60 = vor.u32 %v2757_v6, %v9152_v20 }
 0x354   : > { %v2495_v30 = vmax.f32 %v2403_v32, 0.0  ;;  %v2406_v48 = vadd.f32 %v8992_v13, %v2405_v40  ;;  %v2407_v31 = vpop.f32.mrb[127].mxu0  ;;  %v2702_v32 = vmul.f32 0.5, %v2682_v9 }
 0x356   : > { %v2535_v59 = vmul.f32 %v2495_v30, %v8725_v35  ;;  %v2496_v43 = vmax.f32 %v2406_v48, 0.0 }
 0x358   : > { %2575 = vst.msk [vmem:[#allocation2 + $0xb0] sm:$0xff] %vm1018_vm0, %v2535_v59  ;;  %v2536_v44 = vmul.f32 %v2496_v43, %v10614_v38  ;;  %v2814_v43 = vrot.slane %v2757_v6, 1 }
 0x359   : > { %v2410_v14 = vpop.f32.mrb[128].mxu0 }
 0x35a   : > { %2576 = vst.msk [vmem:[#allocation2 + $0xb8] sm:$0xff] %vm1018_vm0, %v2536_v44  ;;  %v2411_v12 = vadd.f32 %v8992_v13, %v2410_v14  ;;  %v2412_v51 = vpop.f32.mrb[129].mxu0  ;;  %v2847_v34 = vpop.permute.xlu0 %2846 }
 0x35b   : > { %v2413_v8 = vpop.f32.mrb[130].mxu0  ;;  %v2870_v5 = vsel %vm1018_vm0, %v9078_v19, %v2847_v34 }
 0x35c   : > { %v2497_v47 = vmax.f32 %v2411_v12, 0.0  ;;  %v2414_v52 = vadd.f32 %v8992_v13, %v2413_v8  ;;  %v2415_v35 = vpop.f32.mrb[131].mxu0  ;;  %3078 = vmatmul.mubr.bf16.gmra.mrb[164].mxu0 %v2870_v5 }
 0x35d   : > { %6657 = vmatprep.mubr.msk.bf16.mxu0 %vm1018_vm0, %v9121_v24 }
 0x35e   : > { %v2537_v54 = vmul.f32 %v2497_v47, %v8748_v21  ;;  %v2498_v16 = vmax.f32 %v2414_v52, 0.0 }
 0x360   : > { %2577 = vst.msk [vmem:[#allocation2 + $0xc0] sm:$0xff] %vm1018_vm0, %v2537_v54  ;;  %v2538_v58 = vmul.f32 %v2498_v16, %v8756_v33 }
 0x361   : > { %v2418_v3 = vpop.f32.mrb[132].mxu0  ;;  %v2615_v19 = vld [vmem:[#allocation2 + $0xb0] ss:$2 sm:$0xff]  ;;  %v2655_v46 = vld [vmem:[#allocation2 + $0xb1] ss:$2 sm:$0xff] }
 0x362   : > { %2578 = vst.msk [vmem:[#allocation2 + $0xc8] sm:$0xff] %vm1018_vm0, %v2538_v58  ;;  %v2419_v42 = vadd.f32 %v8992_v13, %v2418_v3  ;;  %v2420_v57 = vpop.f32.mrb[133].mxu0  ;;  %v2683_v15 = vadd.f32 %v2655_v46, %v2615_v19 }
 0x363   : > { %v2421_v24 = vpop.f32.mrb[134].mxu0 }
 0x364   : > { %v2499_v22 = vmax.f32 %v2419_v42, 0.0  ;;  %v2422_v17 = vadd.f32 %v8992_v13, %v2421_v24  ;;  %v2423_v21 = vpop.f32.mrb[135].mxu0  ;;  %v2703_v36 = vmul.f32 0.5, %v2683_v15 }
 0x366   : > { %v2539_v40 = vmul.f32 %v2499_v22, %v8769_v53  ;;  %v2500_v33 = vmax.f32 %v2422_v17, 0.0  ;;  %v2717_v30 = vpack.c.bf16 %v2703_v36, %v2702_v32  ;;  %v2813_v53 = vor.u32 %v9113_v62, %v2746_v29 }
 0x368   : > { %2579 = vst.msk [vmem:[#allocation2 + $0xd0] sm:$0xff] %vm1018_vm0, %v2539_v40  ;;  %v2540_v48 = vmul.f32 %v2500_v33, %v8777_v28  ;;  %v2762_v31 = vshrl.u32 %v2717_v30, 16  ;;  %v2765_v59 = vshll.u32 %v2717_v30, 16  ;;  %2854 = vrot.lane.b32.xlu0 %v2717_v30, %s7833_s27  ;;  %v2815_v52 = vsel %vm914_vm1, %v2813_v53, %v2814_v43 }
 0x369   : > { %v2426_v38 = vpop.f32.mrb[136].mxu0  ;;  %v2617_v35 = vld [vmem:[#allocation2 + $0xc0] ss:$2 sm:$0xff]  ;;  %v2657_v61 = vld [vmem:[#allocation2 + $0xc1] ss:$2 sm:$0xff] }
 0x36a   : > { %2580 = vst.msk [vmem:[#allocation2 + $0xd8] sm:$0xff] %vm1018_vm0, %v2540_v48  ;;  %v2427_v44 = vadd.f32 %v8992_v13, %v2426_v38  ;;  %v2428_v14 = vpop.f32.mrb[137].mxu0  ;;  %v2849_v12 = vpop.permute.xlu1 %2848  ;;  %v2817_v51 = vrot.slane %v2765_v59, 1  ;;  %v9184_v34 = vrot.slane %v2762_v31, 7  ;;  %v2684_v16 = vadd.f32 %v2657_v61, %v2617_v35 }
 0x36b   : > { %v2429_v28 = vpop.f32.mrb[138].mxu0  ;;  %v2874_v8 = vsel %vm1018_vm0, %v9102_v23, %v2849_v12 }
 0x36c   : > { %v2501_v5 = vmax.f32 %v2427_v44, 0.0  ;;  %v2430_v6 = vadd.f32 %v8992_v13, %v2429_v28  ;;  %v2431_v47 = vpop.f32.mrb[139].mxu0  ;;  %3086 = vmatmul.mubr.bf16.gmra.mrb[168].mxu0 %v2874_v8  ;;  %v2819_v18 = vor.u32 %v2817_v51, %v2762_v31  ;;  %v2767_v29 = vor.u32 %v2765_v59, %v9184_v34 }
 0x36d   : > { %6658 = vmatprep.mubr.msk.bf16.mxu0 %vm1018_vm0, %v2815_v52  ;;  %v2704_v24 = vmul.f32 0.5, %v2684_v16 }
 0x36e   : > { %v2541_v62 = vmul.f32 %v2501_v5, %v8790_v11  ;;  %v2502_v0 = vmax.f32 %v2430_v6, 0.0  ;;  %v9195_v23 = vsel %vm750_vm2, %v9152_v20, %v2767_v29 }
 0x370   : > { %2581 = vst.msk [vmem:[#allocation2 + $0xe0] sm:$0xff] %vm1018_vm0, %v2541_v62  ;;  %v2542_v54 = vmul.f32 %v2502_v0, %v8798_v37 }
 0x371   : > { %v2434_v58 = vpop.f32.mrb[140].mxu0  ;;  %v2619_v9 = vld [vmem:[#allocation2 + $0xd0] ss:$2 sm:$0xff]  ;;  %v2659_v3 = vld [vmem:[#allocation2 + $0xd1] ss:$2 sm:$0xff] }
 0x372   : > { %2582 = vst.msk [vmem:[#allocation2 + $0xe8] sm:$0xff] %vm1018_vm0, %v2542_v54  ;;  %v2435_v19 = vadd.f32 %v8992_v13, %v2434_v58  ;;  %v2436_v46 = vpop.f32.mrb[141].mxu0  ;;  %v2685_v42 = vadd.f32 %v2659_v3, %v2619_v9 }
 0x373   : > { %v2437_v11 = vpop.f32.mrb[142].mxu0 }
 0x374   : > { %v2503_v57 = vmax.f32 %v2435_v19, 0.0  ;;  %v2438_v15 = vadd.f32 %v8992_v13, %v2437_v11  ;;  %v2439_v20 = vpop.f32.mrb[143].mxu0  ;;  %v2705_v22 = vmul.f32 0.5, %v2685_v42 }
 0x376   : > { %v2543_v17 = vmul.f32 %v2503_v57, %v8811_v49  ;;  %v2504_v37 = vmax.f32 %v2438_v15, 0.0  ;;  %v2718_v21 = vpack.c.bf16 %v2705_v22, %v2704_v24  ;;  %v2816_v49 = vor.u32 %v2814_v43, %v2754_v63 }
 0x378   : > { %2583 = vst.msk [vmem:[#allocation2 + $0xf0] sm:$0xff] %vm1018_vm0, %v2543_v17  ;;  %v2544_v32 = vmul.f32 %v2504_v37, %v8821_v25  ;;  %v2770_v36 = vshrl.u32 %v2718_v21, 16  ;;  %v2773_v40 = vshll.u32 %v2718_v21, 16  ;;  %2856 = vrot.lane.b32.xlu1 %v2718_v21, %s7833_s27  ;;  %v2818_v28 = vsel %vm914_vm1, %v2816_v49, %v2817_v51 }
 0x379   : > { %v2442_v33 = vpop.f32.mrb[144].mxu0  ;;  %v2621_v27 = vld [vmem:[#allocation2 + $0xe0] ss:$2 sm:$0xff]  ;;  %v2661_v63 = vld [vmem:[#allocation2 + $0xe1] ss:$2 sm:$0xff] }
 0x37a   : > { %2584 = vst.msk [vmem:[#allocation2 + $0xf8] sm:$0xff] %vm1018_vm0, %v2544_v32  ;;  %v2443_v30 = vadd.f32 %v8992_v13, %v2442_v33  ;;  %v2444_v48 = vpop.f32.mrb[145].mxu0  ;;  %v2851_v31 = vpop.permute.xlu0 %2850  ;;  %v2820_v59 = vrot.slane %v2773_v40, 1  ;;  %v2772_v38 = vrot.slane %v2770_v36, 7  ;;  %v2686_v51 = vadd.f32 %v2661_v63, %v2621_v27  ;;  %v598_v27 = vld [vmem:[%s10551_s2 + $0x40] sm:$0xff]  ;;  %v600_v63 = vld [vmem:[%s10551_s2 + $0x50] sm:$0xff] }
 0x37b   : > { %v2445_v44 = vpop.f32.mrb[146].mxu0  ;;  %v2878_v25 = vsel %vm1018_vm0, %v9125_v4, %v2851_v31  ;;  %v590_v31 = vld [vmem:[%s10551_s2] sm:$0xff] }
 0x37c   : > { %v2505_v14 = vmax.f32 %v2443_v30, 0.0  ;;  %v2446_v12 = vadd.f32 %v8992_v13, %v2445_v44  ;;  %v2447_v53 = vpop.f32.mrb[147].mxu0  ;;  %3094 = vmatmul.mubr.bf16.gmra.mrb[172].mxu0 %v2878_v25  ;;  %v9215_v8 = vsel %vm914_vm1, %v2819_v18, %v2820_v59  ;;  %v2775_v43 = vor.u32 %v2773_v40, %v2772_v38 }
 0x37d   : > { %6659 = vmatprep.mubr.msk.bf16.mxu0 %vm1018_vm0, %v2818_v28  ;;  %v2706_v16 = vmul.f32 0.5, %v2686_v51  ;;  %v2822_v11 = vor.u32 %v2820_v59, %v2770_v36  ;;  %v592_v53 = vld [vmem:[%s10551_s2 + $0x10] sm:$0xff] }
 0x37e   : > { %v2545_v5 = vmul.f32 %v2505_v14, %v8832_v2  ;;  %v2506_v6 = vmax.f32 %v2446_v12, 0.0  ;;  %v9221_v4 = vsel %vm750_vm2, %v9184_v34, %v2775_v43  ;;  %v594_v14 = vld [vmem:[%s10551_s2 + $0x20] sm:$0xff]  ;;  %v596_v28 = vld [vmem:[%s10551_s2 + $0x30] sm:$0xff] }
 0x37f   : > { %v602_v43 = vld [vmem:[%s10551_s2 + $0x60] sm:$0xff] }
 0x380   : > { %2585 = vst.msk [vmem:[#allocation2 + $0x100] sm:$0xff] %vm1018_vm0, %v2545_v5  ;;  %v2546_v47 = vmul.f32 %v2506_v6, %v8840_v7  ;;  %v604_v5 = vld [vmem:[%s10551_s2 + $0x70] sm:$0xff]  ;;  %v606_v6 = vld [vmem:[%s10551_s2 + $0x80] sm:$0xff] }
 0x381   : > { %v2450_v52 = vpop.f32.mrb[148].mxu0  ;;  %v2623_v35 = vld [vmem:[#allocation2 + $0xf0] ss:$2 sm:$0xff]  ;;  %v2663_v61 = vld [vmem:[#allocation2 + $0xf1] ss:$2 sm:$0xff] }
 0x382   : > { %2586 = vst.msk [vmem:[#allocation2 + $0x108] sm:$0xff] %vm1018_vm0, %v2546_v47  ;;  %v2451_v18 = vadd.f32 %v8992_v13, %v2450_v52  ;;  %v2452_v29 = vpop.f32.mrb[149].mxu0  ;;  %v2687_v62 = vadd.f32 %v2663_v61, %v2623_v35  ;;  %v608_v47 = vld [vmem:[%s10551_s2 + $0x90] sm:$0xff] }
 0x383   : > { %v2453_v2 = vpop.f32.mrb[150].mxu0 }
 0x384   : > { %v2507_v0 = vmax.f32 %v2451_v18, 0.0  ;;  %v2454_v54 = vadd.f32 %v8992_v13, %v2453_v2  ;;  %v2455_v34 = vpop.f32.mrb[151].mxu0  ;;  %v2707_v58 = vmul.f32 0.5, %v2687_v62  ;;  %v2760_v18 = vsel %vm750_vm2, %v9117_v45, %v9156_v60 }
 0x385   : > { %v7299_v34 = vld [vmem:[%s10558_s9 + $0x40] sm:$0xff]  }
 0x386   : > { %v2547_v9 = vmul.f32 %v2507_v0, %v8857_v39  ;;  %v2508_v7 = vmax.f32 %v2454_v54, 0.0  ;;  %v2719_v3 = vpack.c.bf16 %v2707_v58, %v2706_v16  ;;  %v7300_v16 = vld [vmem:[%s10558_s9] sm:$0xff]   ;;  %7029 = vmatprep.subr.bf16.mxu0 %v7299_v34  ;;  %7181 = vmatprep.subr.bf16.mxu1 %v7299_v34 }
 0x387   : > { %7030 = vmatpush3.bf16.msra.mxu0 %v7300_v16  ;;  %7189 = vmatpush3.bf16.msra.mxu1 %v7300_v16 }
 0x388   : > { %2587 = vst.msk [vmem:[#allocation2 + $0x110] sm:$0xff] %vm1018_vm0, %v2547_v9  ;;  %v2548_v19 = vmul.f32 %v2508_v7, %v8859_v26  ;;  %v2778_v46 = vshrl.u32 %v2719_v3, 16  ;;  %v2781_v42 = vshll.u32 %v2719_v3, 16  ;;  %2858 = vrot.lane.b32.xlu0 %v2719_v3, %s7833_s27 }
 0x389   : > { %v2625_v39 = vld [vmem:[#allocation2 + $0x100] ss:$2 sm:$0xff]  ;;  %v2665_v22 = vld [vmem:[#allocation2 + $0x101] ss:$2 sm:$0xff] }
 0x38a   : > { %2588 = vst.msk [vmem:[#allocation2 + $0x118] sm:$0xff] %vm1018_vm0, %v2548_v19  ;;  %v2823_v57 = vrot.slane %v2781_v42, 1  ;;  %v2780_v15 = vrot.slane %v2778_v46, 7  ;;  %v2688_v37 = vadd.f32 %v2665_v22, %v2625_v39  ;;  %v7305_v39 = vld [vmem:[%s10558_s9 + $0x58] sm:$0xff]  }
 0x38c   : > { %v9234_v20 = vsel %vm914_vm1, %v2822_v11, %v2823_v57  ;;  %v2783_v24 = vor.u32 %v2781_v42, %v2780_v15  ;;  %v2708_v40 = vmul.f32 0.5, %v2688_v37  ;;  %v2825_v49 = vor.u32 %v2823_v57, %v2778_v46  ;;  %v7301_v57 = vld [vmem:[%s10558_s9 + $0x48] sm:$0xff]   ;;  %v7306_v37 = vld [vmem:[%s10558_s9 + $0x18] sm:$0xff]  }
 0x38d   : > { %7031 = vmatprep.subr.bf16.mxu0 %v7301_v57  ;;  %7182 = vmatprep.subr.bf16.mxu1 %v7301_v57 }
 0x38e   : > { %v9237_v17 = vsel %vm750_vm2, %v2772_v38, %v2783_v24 }
 0x391   : > { %v2627_v26 = vld [vmem:[#allocation2 + $0x110] ss:$2 sm:$0xff]  ;;  %v2667_v21 = vld [vmem:[#allocation2 + $0x111] ss:$2 sm:$0xff] }
 0x392   : > { %v2689_v32 = vadd.f32 %v2667_v21, %v2627_v26 }
 0x394   : > { %v2709_v33 = vmul.f32 0.5, %v2689_v32  ;;  %v7307_v32 = vld [vmem:[%s10558_s9 + $0x60] sm:$0xff]  }
 0x396   : > { %v9239_v30 = vpack.c.bf16 %v2709_v33, %v2708_v40 }
 0x398   : > { %v2786_v36 = vshrl.u32 %v9239_v30, 16  ;;  %v2789_v48 = vshll.u32 %v9239_v30, 16  ;;  %2860 = vrot.lane.b32.xlu1 %v9239_v30, %s7833_s27  ;;  %v607_v30 = vld [vmem:[%s10551_s2 + $0x88] sm:$0xff] }
 0x39a   : > { %v9248_v59 = vrot.slane %v2789_v48, 1  ;;  %v9252_v38 = vrot.slane %v2786_v36, 7 }
 0x39c   : > { %3172 = vperm.xlu1 %7242, %v590_v31   ;;  %v9256_v44 = vsel %vm914_vm1, %v2825_v49, %v9248_v59  ;;  %v2791_v25 = vor.u32 %v2789_v48, %v9252_v38 }
 0x39e   : > { %v9263_v12 = vsel %vm750_vm2, %v2780_v15, %v2791_v25  ;;  %v7302_v15 = vld [vmem:[%s10558_s9 + $0x8] sm:$0xff]   ;;  %v7308_v25 = vld [vmem:[%s10558_s9 + $0x20] sm:$0xff]  }
 0x39f   : > { %7032 = vmatpush3.bf16.msra.mxu0 %v7302_v15  ;;  %7190 = vmatpush3.bf16.msra.mxu1 %v7302_v15 }
 0x3a0   : > { %3192 = vperm.xlu1 %7242, %v594_v14   ;;  %v7309_v14 = vld [vmem:[%s10558_s9 + $0x68] sm:$0xff]  }
 0x3a4   : > { %3182 = vperm.xlu1 %7242, %v592_v53  }
 0x3a8   : > { %3202 = vperm.xlu1 %7242, %v596_v28   ;;  %v591_v28 = vld [vmem:[%s10551_s2 + $0x8] sm:$0xff] }
 0x3ac   : > { %3212 = vperm.xlu1 %7242, %v598_v27  }
 0x3b0   : > { %3222 = vperm.xlu1 %7242, %v600_v63  }
 0x3b4   : > { %3232 = vperm.xlu1 %7242, %v602_v43   ;;  %v7310_v43 = vld [vmem:[%s10558_s9 + $0x28] sm:$0xff]  }
 0x3b8   : > { %3242 = vperm.xlu1 %7242, %v604_v5   ;;  %v595_v5 = vld [vmem:[%s10551_s2 + $0x28] sm:$0xff] }
 0x3bc   : > { %3252 = vperm.xlu1 %7242, %v606_v6   ;;  %v7311_v6 = vld [vmem:[%s10558_s9 + $0x70] sm:$0xff]  }
 0x3c0   : > { %v2458_v51 = vpop.f32.mrb[152].mxu0  ;;  %3262 = vperm.xlu1 %7242, %v608_v47   ;;  %v7312_v47 = vld [vmem:[%s10558_s9 + $0x30] sm:$0xff]  }
 0x3c1   : > { %v2459_v52 = vadd.f32 %v8992_v13, %v2458_v51  ;;  %v2460_v35 = vpop.f32.mrb[153].mxu0  ;;  %v2853_v61 = vpop.permute.xlu1 %2852  ;;  %v593_v51 = vld [vmem:[%s10551_s2 + $0x18] sm:$0xff] }
 0x3c2   : > { %v2461_v29 = vpop.f32.mrb[154].mxu0  ;;  %v2882_v62 = vsel %vm1018_vm0, %v2760_v18, %v2853_v61  ;;  %v7314_v35 = vld [vmem:[%s10558_s9 + $0x38] sm:$0xff]  }
 0x3c3   : > { %v2509_v2 = vmax.f32 %v2459_v52, 0.0  ;;  %v2462_v0 = vadd.f32 %v8992_v13, %v2461_v29  ;;  %v2463_v54 = vpop.f32.mrb[155].mxu0  ;;  %3102 = vmatmul.mubr.bf16.gmra.mrb[176].mxu0 %v2882_v62  ;;  %v7313_v52 = vld [vmem:[%s10558_s9 + $0x78] sm:$0xff]   ;;  %v9379_v62 = vld [vmem:[%s10558_s9 + $0x80] sm:$0xff]  }
 0x3c4   : > { %6660 = vmatprep.mubr.msk.bf16.mxu0 %vm1018_vm0, %v9215_v8  ;;  %v597_v29 = vld [vmem:[%s10551_s2 + $0x38] sm:$0xff] }
 0x3c5   : > { %v2549_v45 = vmul.f32 %v2509_v2, %v8885_v1  ;;  %v2510_v60 = vmax.f32 %v2462_v0, 0.0  ;;  %v601_v2 = vld [vmem:[%s10551_s2 + $0x58] sm:$0xff]  ;;  %v603_v0 = vld [vmem:[%s10551_s2 + $0x68] sm:$0xff] }
 0x3c7   : > { %2589 = vst.msk [vmem:[#allocation2 + $0x120] sm:$0xff] %vm1018_vm0, %v2549_v45  ;;  %v2550_v58 = vmul.f32 %v2510_v60, %v8895_v41  ;;  %v605_v60 = vld [vmem:[%s10551_s2 + $0x78] sm:$0xff] }
 0x3c8   : > { %v2466_v8 = vpop.f32.mrb[156].mxu0 }
 0x3c9   : > { %2590 = vst.msk [vmem:[#allocation2 + $0x128] sm:$0xff] %vm1018_vm0, %v2550_v58  ;;  %v2467_v9 = vadd.f32 %v8992_v13, %v2466_v8  ;;  %v2468_v7 = vpop.f32.mrb[157].mxu0 }
 0x3ca   : > { %v2469_v3 = vpop.f32.mrb[158].mxu0 }
 0x3cb   : > { %v2511_v19 = vmax.f32 %v2467_v9, 0.0  ;;  %v2470_v46 = vadd.f32 %v8992_v13, %v2469_v3  ;;  %v2471_v1 = vpop.f32.mrb[159].mxu0 }
 0x3cd   : > { %v2551_v42 = vmul.f32 %v2511_v19, %v8903_v56  ;;  %v2512_v11 = vmax.f32 %v2470_v46, 0.0  ;;  %v7303_v56 = vld [vmem:[%s10558_s9 + $0x50] sm:$0xff]  }
 0x3ce   : > { %7033 = vmatprep.subr.bf16.mxu0 %v7303_v56  ;;  %7183 = vmatprep.subr.bf16.mxu1 %v7303_v56 }
 0x3cf   : > { %2591 = vst.msk [vmem:[#allocation2 + $0x130] sm:$0xff] %vm1018_vm0, %v2551_v42  ;;  %v2552_v41 = vmul.f32 %v2512_v11, %v8906_v10  ;;  %v7304_v10 = vld [vmem:[%s10558_s9 + $0x10] sm:$0xff]  }
 0x3d0   : > { %v2629_v13 = vld [vmem:[#allocation2 + $0x120] ss:$2 sm:$0xff]  ;;  %v2669_v24 = vld [vmem:[#allocation2 + $0x121] ss:$2 sm:$0xff]  ;;  %7034 = vmatpush3.bf16.msra.mxu0 %v7304_v10  ;;  %7191 = vmatpush3.bf16.msra.mxu1 %v7304_v10 }
 0x3d1   : > { %2592 = vst.msk [vmem:[#allocation2 + $0x138] sm:$0xff] %vm1018_vm0, %v2552_v41  ;;  %v2690_v22 = vadd.f32 %v2669_v24, %v2629_v13  ;;  %7035 = vmatprep.subr.bf16.mxu0 %v7305_v39  ;;  %7184 = vmatprep.subr.bf16.mxu1 %v7305_v39 }
 0x3d3   : > { %v2710_v31 = vmul.f32 0.5, %v2690_v22 }
 0x3d4   : > { %7036 = vmatpush3.bf16.msra.mxu0 %v7306_v37  ;;  %7192 = vmatpush3.bf16.msra.mxu1 %v7306_v37 }
 0x3d5   : > { %7037 = vmatprep.subr.bf16.mxu0 %v7307_v32  ;;  %7185 = vmatprep.subr.bf16.mxu1 %v7307_v32 }
 0x3d8   : > { %v2631_v26 = vld [vmem:[#allocation2 + $0x130] ss:$2 sm:$0xff]  ;;  %v2671_v21 = vld [vmem:[#allocation2 + $0x131] ss:$2 sm:$0xff]  ;;  %7038 = vmatpush3.bf16.msra.mxu0 %v7308_v25  ;;  %7193 = vmatpush3.bf16.msra.mxu1 %v7308_v25 }
 0x3d9   : > { %v2691_v40 = vadd.f32 %v2671_v21, %v2631_v26  ;;  %7039 = vmatprep.subr.bf16.mxu0 %v7309_v14  ;;  %7186 = vmatprep.subr.bf16.mxu1 %v7309_v14  ;;  %v9421_v26 = vld [vmem:[%s10557_s8] ss:$0 sm:$0xff] }
 0x3da   : > { %v2855_v33 = vpop.permute.xlu0 %2854 }
 0x3db   : > { %v2886_v48 = vsel %vm1018_vm0, %v9195_v23, %v2855_v33  ;;  %v2711_v49 = vmul.f32 0.5, %v2691_v40 }
 0x3dc   : > { %3110 = vmatmul.mubr.bf16.gmra.mrb[180].mxu0 %v2886_v48  ;;  %7194 = vmatpush3.bf16.msra.mxu1 %v7310_v43 }
 0x3dd   : > { %6661 = vmatprep.mubr.msk.bf16.mxu0 %vm1018_vm0, %v9234_v20  ;;  %v2721_v53 = vpack.c.bf16 %v2711_v49, %v2710_v31  ;;  %7040 = vmatpush3.bf16.msra.mxu0 %v7310_v43 }
 0x3de   : > { %7041 = vmatprep.subr.bf16.mxu0 %v7311_v6  ;;  %7187 = vmatprep.subr.bf16.mxu1 %v7311_v6 }
 0x3df   : > { %2862 = vrot.lane.b32.xlu0 %v2721_v53, %s7833_s27  ;;  %v2794_v23 = vshrl.u32 %v2721_v53, 16  ;;  %v2797_v27 = vshll.u32 %v2721_v53, 16 }
 0x3e0   : > { %7195 = vmatpush3.bf16.msra.mxu1 %v7312_v47 }
 0x3e1   : > { %v2796_v63 = vrot.slane %v2794_v23, 7  ;;  %7042 = vmatpush3.bf16.msra.mxu0 %v7312_v47  ;;  %7188 = vmatprep.subr.bf16.mxu1 %v7313_v52  ;;  %v2829_v54 = vrot.slane %v2797_v27, 1 }
 0x3e2   : > { %7043 = vmatprep.subr.bf16.mxu0 %v7313_v52 }
 0x3e3   : > { %3177 = vperm.xlu0 %7241, %v591_v28   ;;  %v9351_v20 = vor.u32 %v2797_v27, %v2796_v63 }
 0x3e4   : > { %7196 = vmatpush3.bf16.msra.mxu1 %v7314_v35 }
 0x3e5   : > { %7044 = vmatpush3.bf16.msra.mxu0 %v7314_v35  ;;  %v2800_v39 = vsel %vm750_vm2, %v9252_v38, %v9351_v20 }
 0x3e6   : > { %7145 = vmatprep.subr.bf16.mxu0 %v9379_v62 }
 0x3e7   : > { %3197 = vperm.xlu0 %7241, %v595_v5  }
 0x3ea   : > { %v2857_v61 = vpop.permute.xlu1 %2856 }
 0x3eb   : > { %3187 = vperm.xlu0 %7241, %v593_v51   ;;  %v2890_v18 = vsel %vm1018_vm0, %v9221_v4, %v2857_v61  ;;  %v599_v4 = vld [vmem:[%s10551_s2 + $0x48] sm:$0xff] }
 0x3ec   : > { %3118 = vmatmul.mubr.bf16.gmra.mrb[184].mxu0 %v2890_v18 }
 0x3ed   : > { %6662 = vmatprep.mubr.msk.bf16.mxu0 %vm1018_vm0, %v9256_v44  ;;  %v2828_v44 = vor.u32 %v9248_v59, %v2786_v36  ;;  %v609_v36 = vld [vmem:[%s10551_s2 + $0x98] sm:$0xff] }
 0x3ef   : > { %3207 = vperm.xlu0 %7241, %v597_v29   ;;  %v2830_v45 = vsel %vm914_vm1, %v2828_v44, %v2829_v54 }
 0x3f3   : > { %3217 = vperm.xlu0 %7241, %v599_v4  }
 0x3f7   : > { %3227 = vperm.xlu0 %7241, %v601_v2  }
 0x3fa   : > { %v2859_v34 = vpop.permute.xlu0 %2858 }
 0x3fb   : > { %3237 = vperm.xlu0 %7241, %v603_v0   ;;  %v2894_v16 = vsel %vm1018_vm0, %v9237_v17, %v2859_v34  ;;  %v2831_v17 = vor.u32 %v2829_v54, %v2794_v23 }
 0x3fc   : > { %3126 = vmatmul.mubr.bf16.gmra.mrb[188].mxu0 %v2894_v16 }
 0x3fd   : > { %6663 = vmatprep.mubr.msk.bf16.mxu0 %vm1018_vm0, %v2830_v45  ;;  %v2833_v8 = vsel %vm8383_vm6, %v2831_v17, 0 }
 0x3ff   : > { %3247 = vperm.xlu0 %7241, %v605_v60  }
 0x403   : > { %3257 = vperm.xlu0 %7241, %v607_v30   ;;  %v7316_v30 = vld [vmem:[%s10558_s9 + $0x88] sm:$0xff]  }
 0x407   : > { %3267 = vperm.xlu0 %7241, %v609_v36  }
 0x40a   : > { %v2861_v59 = vpop.permute.xlu1 %2860 }
 0x40b   : > { %v2898_v58 = vsel %vm1018_vm0, %v9263_v12, %v2861_v59 }
 0x40c   : > { %3134 = vmatmul.mubr.bf16.gmra.mrb[192].mxu0 %v2898_v58 }
 0x40d   : > { %6664 = vmatprep.mubr.msk.bf16.mxu0 %vm1018_vm0, %v2833_v8 }
 0x416   : > { %v3071_v9 = vpop.f32.mrb[160].mxu0 }
 0x417   : > { %v3073_v7 = vpop.f32.mrb[161].mxu0  ;;  %v3072_v21 = vadd.f32 %v9421_v26, %v3071_v9 }
 0x418   : > { %v3074_v3 = vpop.f32.mrb[162].mxu0 }
 0x419   : > { %v3076_v19 = vpop.f32.mrb[163].mxu0  ;;  %v3075_v40 = vadd.f32 %v9421_v26, %v3074_v3  ;;  %v3150_v33 = vmax.f32 %v3072_v21, 0.0 }
 0x41b   : > { %v3173_v32 = vpop.permute.xlu1 %3172  ;;  %v3151_v31 = vmax.f32 %v3075_v40, 0.0 }
 0x41c   : > { %v3270_v53 = vmul.f32 %v3173_v32, %v3150_v33 }
 0x41f   : > { %v3193_v49 = vpop.permute.xlu1 %3192 }
 0x423   : > { %v3183_v35 = vpop.permute.xlu1 %3182 }
 0x427   : > { %v3203_v8 = vpop.permute.xlu1 %3202 }
 0x42f   : > { %v3079_v46 = vpop.f32.mrb[164].mxu0 }
 0x430   : > { %v3081_v1 = vpop.f32.mrb[165].mxu0  ;;  %v3080_v25 = vadd.f32 %v9421_v26, %v3079_v46 }
 0x431   : > { %v3082_v42 = vpop.f32.mrb[166].mxu0 }
 0x432   : > { %v3084_v11 = vpop.f32.mrb[167].mxu0  ;;  %v3083_v27 = vadd.f32 %v9421_v26, %v3082_v42  ;;  %v3152_v20 = vmax.f32 %v3080_v25, 0.0  ;;  %v7320_v25 = vld [vmem:[%s10558_s9 + $0xa8] sm:$0xff]  }
 0x433   : > { %v7317_v11 = vld [vmem:[%s10558_s9 + $0x90] sm:$0xff]  }
 0x434   : > { %v3153_v61 = vmax.f32 %v3083_v27, 0.0  ;;  %v3272_v0 = vmul.f32 %v3183_v35, %v3152_v20 }
 0x43f   : > { %v3087_v41 = vpop.f32.mrb[168].mxu0 }
 0x440   : > { %v3089_v57 = vpop.f32.mrb[169].mxu0  ;;  %v3088_v48 = vadd.f32 %v9421_v26, %v3087_v41 }
 0x441   : > { %v3090_v15 = vpop.f32.mrb[170].mxu0 }
 0x442   : > { %v3092_v13 = vpop.f32.mrb[171].mxu0  ;;  %v3091_v38 = vadd.f32 %v9421_v26, %v3090_v15  ;;  %v3154_v23 = vmax.f32 %v3088_v48, 0.0 }
 0x444   : > { %v3155_v63 = vmax.f32 %v3091_v38, 0.0  ;;  %v3274_v6 = vmul.f32 %v3193_v49, %v3154_v23  ;;  %v7319_v38 = vld [vmem:[%s10558_s9 + $0xa0] sm:$0xff]  }
 0x44f   : > { %v3095_v24 = vpop.f32.mrb[172].mxu0 }
 0x450   : > { %v3097_v12 = vpop.f32.mrb[173].mxu0  ;;  %v3096_v47 = vadd.f32 %v9421_v26, %v3095_v24 }
 0x451   : > { %v2863_v56 = vpop.permute.xlu0 %2862  ;;  %v3098_v10 = vpop.f32.mrb[174].mxu0 }
 0x452   : > { %v3100_v22 = vpop.f32.mrb[175].mxu0  ;;  %v2902_v37 = vsel %vm1018_vm0, %v2800_v39, %v2863_v56  ;;  %v3099_v18 = vadd.f32 %v9421_v26, %v3098_v10  ;;  %v3156_v34 = vmax.f32 %v3096_v47, 0.0  ;;  %v3213_v47 = vpop.permute.xlu1 %3212 }
 0x453   : > { %3142 = vmatmul.mubr.bf16.gmra.mrb[196].mxu0 %v2902_v37  ;;  %v7318_v22 = vld [vmem:[%s10558_s9 + $0x98] sm:$0xff]  }
 0x454   : > { %v3157_v36 = vmax.f32 %v3099_v18, 0.0  ;;  %v3276_v3 = vmul.f32 %v3203_v8, %v3156_v34 }
 0x456   : > { %v3223_v8 = vpop.permute.xlu1 %3222 }
 0x462   : > { %v3178_v14 = vpop.permute.xlu0 %3177 }
 0x463   : > { %v3271_v28 = vmul.f32 %v3178_v14, %v3151_v31  ;;  %v7321_v14 = vld [vmem:[%s10558_s9 + $0xb0] sm:$0xff]  }
 0x465   : > { %v3290_v43 = vpack.c.bf16 %v3271_v28, %v3270_v53  ;;  %v7322_v53 = vld [vmem:[%s10558_s9 + $0xb8] sm:$0xff]  }
 0x466   : > { %v3198_v5 = vpop.permute.xlu0 %3197 }
 0x467   : > { %v3301_v51 = vshrl.u32 %v3290_v43, 16  ;;  %v3275_v52 = vmul.f32 %v3198_v5, %v3155_v63  ;;  %3661 = vmatprep.mubr.bf16.mxu0 %v3290_v43  ;;  %v3304_v4 = vshll.u32 %v3290_v43, 16 }
 0x469   : > { %v3303_v29 = vrot.slane %v3301_v51, 7  ;;  %v3292_v2 = vpack.c.bf16 %v3275_v52, %v3274_v6  ;;  %v3390_v7 = vrot.slane %v3304_v4, 1 }
 0x46a   : > { %v3188_v54 = vpop.permute.xlu0 %3187 }
 0x46b   : > { %v3316_v44 = vshrl.u32 %v3292_v2, 16  ;;  %v3273_v16 = vmul.f32 %v3188_v54, %v3153_v61  ;;  %3677 = vmatprep.mubr.bf16.mxu1 %v3292_v2  ;;  %v3306_v45 = vor.u32 %v3304_v4, %v3303_v29  ;;  %v3319_v60 = vshll.u32 %v3292_v2, 16 }
 0x46c   : > { %v3391_v13 = vor.u32 %v3390_v7, %v3301_v51 }
 0x46d   : > { %v3291_v17 = vpack.c.bf16 %v3273_v16, %v3272_v0  ;;  %v3389_v59 = vsel %vm8266_vm4, 0, %v3306_v45  ;;  %v3318_v58 = vrot.slane %v3316_v44, 7  ;;  %v3395_v42 = vrot.slane %v3319_v60, 1 }
 0x46e   : > { %v3208_v9 = vpop.permute.xlu0 %3207  ;;  %3662 = vmatmul.mubr.bf16.vlgmr.msra.gmra.mrb[200].mxu0 %v3389_v59 }
 0x46f   : > { %v3308_v19 = vshrl.u32 %v3291_v17, 16  ;;  %v3311_v46 = vshll.u32 %v3291_v17, 16  ;;  %v3277_v1 = vmul.f32 %v3208_v9, %v3157_v36  ;;  %7146 = vmatpush3.bf16.msra.mxu0 %v9379_v62  ;;  %3669 = vmatprep.mubr.bf16.mxu0 %v3291_v17  ;;  %v3321_v57 = vor.u32 %v3319_v60, %v3318_v58 }
 0x470   : > { %7147 = vmatprep.subr.bf16.mxu0 %v7316_v30  ;;  %v3397_v32 = vor.u32 %v3395_v42, %v3316_v44 }
 0x471   : > { %v3293_v55 = vpack.c.bf16 %v3277_v1, %v3276_v3  ;;  %v3310_v41 = vrot.slane %v3308_v19, 7  ;;  %v3392_v15 = vrot.slane %v3311_v46, 1 }
 0x472   : > { %v3218_v51 = vpop.permute.xlu0 %3217 }
 0x473   : > { %v3324_v24 = vshrl.u32 %v3293_v55, 16  ;;  %v3327_v12 = vshll.u32 %v3293_v55, 16  ;;  %7148 = vmatpush3.bf16.msra.mxu0 %v7316_v30  ;;  %v3322_v56 = vsel %vm750_vm2, %v3310_v41, %v3321_v57  ;;  %v3313_v10 = vor.u32 %v3311_v46, %v3310_v41 }
 0x474   : > { %3678 = vmatmul.mubr.bf16.vlgmr.msra.gmra.mrb[0].mxu1 %v3322_v56  ;;  %7149 = vmatprep.subr.bf16.mxu0 %v7317_v11  ;;  %v3393_v62 = vsel %vm914_vm1, %v3391_v13, %v3392_v15  ;;  %v3394_v39 = vor.u32 %v3392_v15, %v3308_v19 }
 0x475   : > { %3685 = vmatprep.mubr.bf16.mxu1 %v3293_v55  ;;  %v3314_v37 = vsel %vm750_vm2, %v3303_v29, %v3313_v10  ;;  %v3326_v21 = vrot.slane %v3324_v24, 7  ;;  %v3398_v40 = vrot.slane %v3327_v12, 1 }
 0x476   : > { %3670 = vmatmul.mubr.bf16.gmra.mrb[204].mxu0 %v3314_v37  ;;  %v3396_v33 = vsel %vm914_vm1, %v3394_v39, %v3395_v42  ;;  %v3228_v9 = vpop.permute.xlu0 %3227  ;;  %v3233_v37 = vpop.permute.xlu1 %3232 }
 0x477   : > { %7150 = vmatpush3.bf16.msra.mxu0 %v7317_v11  ;;  %7161 = vmatprep.mubr.bf16.mxu0 %v3393_v62  ;;  %v3329_v48 = vor.u32 %v3327_v12, %v3326_v21  ;;  %v3399_v31 = vsel %vm914_vm1, %v3397_v32, %v3398_v40  ;;  %v3400_v4 = vor.u32 %v3398_v40, %v3324_v24 }
 0x478   : > { %7151 = vmatprep.subr.bf16.mxu0 %v7318_v22 }
 0x479   : > { %v3330_v49 = vsel %vm750_vm2, %v3318_v58, %v3329_v48 }
 0x47b   : > { %7152 = vmatpush3.bf16.msra.mxu0 %v7318_v22 }
 0x47c   : > { %3686 = vmatmul.mubr.bf16.gmra.mrb[4].mxu1 %v3330_v49  ;;  %7153 = vmatprep.subr.bf16.mxu0 %v7319_v38 }
 0x47f   : > { %7154 = vmatpush3.bf16.msra.mxu0 %v7319_v38 }
 0x480   : > { %7155 = vmatprep.subr.bf16.mxu0 %v7320_v25 }
 0x483   : > { %7156 = vmatpush3.bf16.msra.mxu0 %v7320_v25 }
 0x484   : > { %7157 = vmatprep.subr.bf16.mxu0 %v7321_v14 }
 0x487   : > { %7158 = vmatpush3.bf16.msra.mxu0 %v7321_v14 }
 0x488   : > { %7159 = vmatprep.subr.bf16.mxu0 %v7322_v53 }
 0x48b   : > { %7160 = vmatpush3.bf16.msra.mxu0 %v7322_v53 }
 0x48e   : > { %7162 = vmatmul.mubr.bf16.vlgmr.msra.gmra.mrb[208].mxu0 %v3396_v33 }
 0x48f   : > { %7165 = vmatprep.mubr.bf16.mxu0 %v3399_v31 }
 0x496   : > { %v3103_v23 = vpop.f32.mrb[176].mxu0 }
 0x497   : > { %v3104_v28 = vadd.f32 %v9421_v26, %v3103_v23  ;;  %v3105_v27 = vpop.f32.mrb[177].mxu0 }
 0x498   : > { %v3106_v63 = vpop.f32.mrb[178].mxu0 }
 0x499   : > { %v3158_v43 = vmax.f32 %v3104_v28, 0.0  ;;  %v3107_v20 = vadd.f32 %v9421_v26, %v3106_v63  ;;  %v3108_v5 = vpop.f32.mrb[179].mxu0 }
 0x49b   : > { %v3159_v6 = vmax.f32 %v3107_v20, 0.0  ;;  %v3278_v52 = vmul.f32 %v3213_v47, %v3158_v43 }
 0x49d   : > { %v3279_v35 = vmul.f32 %v3218_v51, %v3159_v6  ;;  %v3243_v51 = vpop.permute.xlu1 %3242 }
 0x49f   : > { %v3294_v61 = vpack.c.bf16 %v3279_v35, %v3278_v52 }
 0x4a1   : > { %v3332_v18 = vshrl.u32 %v3294_v61, 16  ;;  %3693 = vmatprep.mubr.bf16.mxu1 %v3294_v61  ;;  %v3335_v29 = vshll.u32 %v3294_v61, 16 }
 0x4a3   : > { %v3401_v2 = vrot.slane %v3335_v29, 1  ;;  %v3334_v0 = vrot.slane %v3332_v18, 7 }
 0x4a5   : > { %v3402_v54 = vsel %vm914_vm1, %v3400_v4, %v3401_v2  ;;  %v3337_v34 = vor.u32 %v3335_v29, %v3334_v0  ;;  %v3403_v42 = vor.u32 %v3401_v2, %v3332_v18 }
 0x4a6   : > { %7166 = vmatmul.mubr.bf16.gmra.mrb[212].mxu0 %v3402_v54 }
 0x4a7   : > { %v3338_v44 = vsel %vm750_vm2, %v3326_v21, %v3337_v34  ;;  %v3238_v21 = vpop.permute.xlu0 %3237 }
 0x4a8   : > { %3694 = vmatmul.mubr.bf16.gmra.mrb[8].mxu1 %v3338_v44 }
 0x4ab   : > { %v3248_v52 = vpop.permute.xlu0 %3247 }
 0x4af   : > { %v3111_v16 = vpop.f32.mrb[180].mxu0 }
 0x4b0   : > { %v3112_v45 = vadd.f32 %v9421_v26, %v3111_v16  ;;  %v3113_v60 = vpop.f32.mrb[181].mxu0 }
 0x4b1   : > { %v3114_v30 = vpop.f32.mrb[182].mxu0 }
 0x4b2   : > { %v3160_v36 = vmax.f32 %v3112_v45, 0.0  ;;  %v3115_v17 = vadd.f32 %v9421_v26, %v3114_v30  ;;  %v3116_v59 = vpop.f32.mrb[183].mxu0 }
 0x4b4   : > { %v3161_v58 = vmax.f32 %v3115_v17, 0.0  ;;  %v3280_v7 = vmul.f32 %v3223_v8, %v3160_v36 }
 0x4b6   : > { %v3281_v3 = vmul.f32 %v3228_v9, %v3161_v58  ;;  %v3253_v9 = vpop.permute.xlu1 %3252 }
 0x4b8   : > { %v3295_v19 = vpack.c.bf16 %v3281_v3, %v3280_v7  ;;  %v3258_v7 = vpop.permute.xlu0 %3257 }
 0x4ba   : > { %v3340_v46 = vshrl.u32 %v3295_v19, 16  ;;  %3701 = vmatprep.mubr.bf16.mxu1 %v3295_v19  ;;  %v3343_v1 = vshll.u32 %v3295_v19, 16 }
 0x4bc   : > { %v3404_v11 = vrot.slane %v3343_v1, 1  ;;  %v3342_v55 = vrot.slane %v3340_v46, 7 }
 0x4be   : > { %v3405_v41 = vsel %vm914_vm1, %v3403_v42, %v3404_v11  ;;  %v3345_v57 = vor.u32 %v3343_v1, %v3342_v55  ;;  %v3406_v38 = vor.u32 %v3404_v11, %v3340_v46 }
 0x4bf   : > { %v3119_v15 = vpop.f32.mrb[184].mxu0  ;;  %7169 = vmatprep.mubr.bf16.mxu0 %v3405_v41 }
 0x4c0   : > { %v3120_v13 = vadd.f32 %v9421_v26, %v3119_v15  ;;  %v3121_v24 = vpop.f32.mrb[185].mxu0  ;;  %v3346_v12 = vsel %vm750_vm2, %v3334_v0, %v3345_v57 }
 0x4c1   : > { %v3122_v56 = vpop.f32.mrb[186].mxu0  ;;  %3702 = vmatmul.mubr.bf16.gmra.mrb[12].mxu1 %v3346_v12 }
 0x4c2   : > { %v3162_v10 = vmax.f32 %v3120_v13, 0.0  ;;  %v3123_v62 = vadd.f32 %v9421_v26, %v3122_v56  ;;  %v3124_v39 = vpop.f32.mrb[187].mxu0 }
 0x4c4   : > { %v3163_v22 = vmax.f32 %v3123_v62, 0.0  ;;  %v3282_v32 = vmul.f32 %v3233_v37, %v3162_v10 }
 0x4c6   : > { %v3283_v40 = vmul.f32 %v3238_v21, %v3163_v22 }
 0x4c8   : > { %v3296_v33 = vpack.c.bf16 %v3283_v40, %v3282_v32  ;;  %v3263_v32 = vpop.permute.xlu1 %3262  ;;  %v3268_v40 = vpop.permute.xlu0 %3267 }
 0x4ca   : > { %v3348_v48 = vshrl.u32 %v3296_v33, 16  ;;  %3709 = vmatprep.mubr.bf16.mxu1 %v3296_v33  ;;  %v3351_v31 = vshll.u32 %v3296_v33, 16 }
 0x4cc   : > { %v3407_v49 = vrot.slane %v3351_v31, 1  ;;  %v3350_v25 = vrot.slane %v3348_v48, 7 }
 0x4ce   : > { %v3408_v14 = vsel %vm914_vm1, %v3406_v38, %v3407_v49  ;;  %v3353_v53 = vor.u32 %v3351_v31, %v3350_v25  ;;  %v3409_v2 = vor.u32 %v3407_v49, %v3348_v48 }
 0x4cf   : > { %v3127_v23 = vpop.f32.mrb[188].mxu0  ;;  %7170 = vmatmul.mubr.bf16.gmra.mrb[216].mxu0 %v3408_v14 }
 0x4d0   : > { %v3128_v28 = vadd.f32 %v9421_v26, %v3127_v23  ;;  %v3129_v27 = vpop.f32.mrb[189].mxu0  ;;  %v3354_v63 = vsel %vm750_vm2, %v3342_v55, %v3353_v53 }
 0x4d1   : > { %v3130_v43 = vpop.f32.mrb[190].mxu0  ;;  %3710 = vmatmul.mubr.bf16.gmra.mrb[16].mxu1 %v3354_v63 }
 0x4d2   : > { %v3164_v20 = vmax.f32 %v3128_v28, 0.0  ;;  %v3131_v5 = vadd.f32 %v9421_v26, %v3130_v43  ;;  %v3132_v6 = vpop.f32.mrb[191].mxu0 }
 0x4d4   : > { %v3165_v47 = vmax.f32 %v3131_v5, 0.0  ;;  %v3284_v35 = vmul.f32 %v3243_v51, %v3164_v20 }
 0x4d6   : > { %v3285_v61 = vmul.f32 %v3248_v52, %v3165_v47 }
 0x4d8   : > { %v3297_v18 = vpack.c.bf16 %v3285_v61, %v3284_v35 }
 0x4da   : > { %v3356_v29 = vshrl.u32 %v3297_v18, 16  ;;  %3717 = vmatprep.mubr.bf16.mxu1 %v3297_v18  ;;  %v3359_v4 = vshll.u32 %v3297_v18, 16 }
 0x4dc   : > { %v3410_v0 = vrot.slane %v3359_v4, 1  ;;  %v3358_v54 = vrot.slane %v3356_v29, 7 }
 0x4de   : > { %v3411_v34 = vsel %vm914_vm1, %v3409_v2, %v3410_v0  ;;  %v3361_v44 = vor.u32 %v3359_v4, %v3358_v54  ;;  %v3412_v11 = vor.u32 %v3410_v0, %v3356_v29  ;;  %v7325_v2 = vld [vmem:[%s10560_s11 + $0x4] ss:$8 sps:$4 sm:$0xff]  }
 0x4df   : > { %v3135_v16 = vpop.f32.mrb[192].mxu0  ;;  %7173 = vmatprep.mubr.bf16.mxu0 %v3411_v34  ;;  %5688 = vmatprep.subr.bf16.mxu1 %v7325_v2 }
 0x4e0   : > { %v3136_v45 = vadd.f32 %v9421_v26, %v3135_v16  ;;  %v3137_v60 = vpop.f32.mrb[193].mxu0  ;;  %v3362_v30 = vsel %vm750_vm2, %v3350_v25, %v3361_v44  ;;  %v7328_v44 = vld [vmem:[%s10560_s11 + $0x14] ss:$8 sps:$4 sm:$0xff]   ;;  %5689 = vmatpush1.bf16.msra.mxu1 %v7323_v50 }
 0x4e1   : > { %v3138_v36 = vpop.f32.mrb[194].mxu0  ;;  %3718 = vmatmul.mubr.bf16.gmra.mrb[20].mxu1 %v3362_v30  ;;  %v7326_v60 = vld [vmem:[%s10560_s11 + $0x10] ss:$8 sps:$4 sm:$0xff]   ;;  %5690 = vmatprep.subr.bf16.mxu1 %v7328_v44  ;;  %v7331_v30 = vld [vmem:[%s10560_s11 + $0x24] ss:$8 sps:$4 sm:$0xff]  }
 0x4e2   : > { %v3166_v17 = vmax.f32 %v3136_v45, 0.0  ;;  %v3139_v59 = vadd.f32 %v9421_v26, %v3138_v36  ;;  %v3140_v58 = vpop.f32.mrb[195].mxu0 }
 0x4e4   : > { %v3167_v8 = vmax.f32 %v3139_v59, 0.0  ;;  %v3286_v3 = vmul.f32 %v3253_v9, %v3166_v17  ;;  %5691 = vmatpush1.bf16.msra.mxu1 %v7326_v60 }
 0x4e5   : > { %5692 = vmatprep.subr.bf16.mxu1 %v7331_v30 }
 0x4e6   : > { %v3287_v19 = vmul.f32 %v3258_v7, %v3167_v8  ;;  %v7329_v8 = vld [vmem:[%s10560_s11 + $0x20] ss:$8 sps:$4 sm:$0xff]   ;;  %v7334_v7 = vld [vmem:[%s10560_s11 + $0x34] ss:$8 sps:$4 sm:$0xff]  }
 0x4e8   : > { %v3298_v46 = vpack.c.bf16 %v3287_v19, %v3286_v3  ;;  %5693 = vmatpush1.bf16.msra.mxu1 %v7329_v8  ;;  %v7332_v19 = vld [vmem:[%s10560_s11 + $0x30] ss:$8 sps:$4 sm:$0xff]  }
 0x4e9   : > { %5694 = vmatprep.subr.bf16.mxu1 %v7334_v7 }
 0x4ea   : > { %v3364_v1 = vshrl.u32 %v3298_v46, 16  ;;  %3725 = vmatprep.mubr.bf16.mxu1 %v3298_v46  ;;  %v3367_v42 = vshll.u32 %v3298_v46, 16  ;;  %v7337_v46 = vld [vmem:[%s10560_s11 + $0x44] ss:$8 sps:$4 sm:$0xff]  }
 0x4ec   : > { %v3413_v55 = vrot.slane %v3367_v42, 1  ;;  %v3366_v41 = vrot.slane %v3364_v1, 7  ;;  %5695 = vmatpush1.bf16.msra.mxu1 %v7332_v19 }
 0x4ed   : > { %5696 = vmatprep.subr.bf16.mxu1 %v7337_v46 }
 0x4ee   : > { %v3414_v57 = vsel %vm914_vm1, %v3412_v11, %v3413_v55  ;;  %v3369_v15 = vor.u32 %v3367_v42, %v3366_v41  ;;  %v3415_v13 = vor.u32 %v3413_v55, %v3364_v1  ;;  %v7335_v1 = vld [vmem:[%s10560_s11 + $0x40] ss:$8 sps:$4 sm:$0xff]   ;;  %v7340_v42 = vld [vmem:[%s10560_s11 + $0x54] ss:$8 sps:$4 sm:$0xff]   ;;  %v7338_v11 = vld [vmem:[%s10560_s11 + $0x50] ss:$8 sps:$4 sm:$0xff]  }
 0x4ef   : > { %7174 = vmatmul.mubr.bf16.gmra.mrb[220].mxu0 %v3414_v57  ;;  %v9534_v55 = vld [vmem:[%s10559_s10] ss:$0 sm:$0xff] }
 0x4f0   : > { %v3370_v24 = vsel %vm750_vm2, %v3358_v54, %v3369_v15  ;;  %5697 = vmatpush1.bf16.msra.mxu1 %v7335_v1 }
 0x4f1   : > { %3726 = vmatmul.mubr.bf16.gmra.mrb[24].mxu1 %v3370_v24  ;;  %5698 = vmatprep.subr.bf16.mxu1 %v7340_v42  ;;  %v7341_v24 = vld [vmem:[%s10560_s11 + $0x60] ss:$8 sps:$4 sm:$0xff]   ;;  %v7368_v42 = vld [vmem:[%s10560_s11 + $0xf0] ss:$8 sps:$4 sm:$0xff]  }
 0x4f4   : > { %5699 = vmatpush1.bf16.msra.mxu1 %v7338_v11  ;;  %v7370_v11 = vld [vmem:[%s10560_s11 + $0xf4] ss:$8 sps:$4 sm:$0xff]  }
 0x526   : > { %v3143_v12 = vpop.f32.mrb[196].mxu0 }
 0x527   : > { %v3144_v56 = vadd.f32 %v9421_v26, %v3143_v12  ;;  %v3145_v10 = vpop.f32.mrb[197].mxu0 }
 0x528   : > { %v3146_v62 = vpop.f32.mrb[198].mxu0 }
 0x529   : > { %v3168_v39 = vmax.f32 %v3144_v56, 0.0  ;;  %v3147_v22 = vadd.f32 %v9421_v26, %v3146_v62  ;;  %v3148_v37 = vpop.f32.mrb[199].mxu0  ;;  %v7346_v62 = vld [vmem:[%s10560_s11 + $0x74] ss:$8 sps:$4 sm:$0xff]  }
 0x52b   : > { %v3169_v21 = vmax.f32 %v3147_v22, 0.0  ;;  %v3288_v33 = vmul.f32 %v3263_v32, %v3168_v39 }
 0x52d   : > { %v3289_v48 = vmul.f32 %v3268_v40, %v3169_v21 }
 0x52f   : > { %v3299_v31 = vpack.c.bf16 %v3289_v48, %v3288_v33 }
 0x531   : > { %v3372_v38 = vshrl.u32 %v3299_v31, 16  ;;  %3733 = vmatprep.mubr.bf16.mxu1 %v3299_v31  ;;  %v3375_v49 = vshll.u32 %v3299_v31, 16  ;;  %v7344_v31 = vld [vmem:[%s10560_s11 + $0x70] ss:$8 sps:$4 sm:$0xff]  }
 0x533   : > { %v3416_v25 = vrot.slane %v3375_v49, 1  ;;  %v3374_v14 = vrot.slane %v3372_v38, 7 }
 0x535   : > { %v3417_v53 = vsel %vm914_vm1, %v3415_v13, %v3416_v25  ;;  %v3377_v23 = vor.u32 %v3375_v49, %v3374_v14  ;;  %v3418_v28 = vor.u32 %v3416_v25, %v3372_v38  ;;  %v7349_v49 = vld [vmem:[%s10560_s11 + $0x84] ss:$8 sps:$4 sm:$0xff]   ;;  %v7347_v14 = vld [vmem:[%s10560_s11 + $0x80] ss:$8 sps:$4 sm:$0xff]  }
 0x536   : > { %7177 = vmatprep.mubr.bf16.mxu0 %v3417_v53  ;;  %v7352_v53 = vld [vmem:[%s10560_s11 + $0x94] ss:$8 sps:$4 sm:$0xff]  }
 0x537   : > { %v3378_v27 = vsel %vm750_vm2, %v3366_v41, %v3377_v23  ;;  %v3429_v26 = vsel %vm8383_vm6, %v3418_v28, 0  ;;  %v7343_v41 = vld [vmem:[%s10560_s11 + $0x64] ss:$8 sps:$4 sm:$0xff]   ;;  %v7350_v23 = vld [vmem:[%s10560_s11 + $0x90] ss:$8 sps:$4 sm:$0xff]  }
 0x538   : > { %3734 = vmatmul.mubr.bf16.gmra.mrb[28].mxu1 %v3378_v27  ;;  %7178 = vmatmul.mubr.bf16.gmra.mrb[224].mxu0 %v3429_v26  ;;  %v7355_v28 = vld [vmem:[%s10560_s11 + $0xa4] ss:$8 sps:$4 sm:$0xff]   ;;  %v7353_v27 = vld [vmem:[%s10560_s11 + $0xa0] ss:$8 sps:$4 sm:$0xff]   ;;  %v7358_v26 = vld [vmem:[%s10560_s11 + $0xb4] ss:$8 sps:$4 sm:$0xff]  }
 0x539   : > { %5700 = vmatprep.subr.bf16.mxu1 %v7343_v41 }
 0x53a   : > { %5701 = vmatpush1.bf16.msra.mxu1 %v7341_v24 }
 0x53b   : > { %5702 = vmatprep.subr.bf16.mxu1 %v7346_v62 }
 0x53e   : > { %5703 = vmatpush1.bf16.msra.mxu1 %v7344_v31 }
 0x53f   : > { %5704 = vmatprep.subr.bf16.mxu1 %v7349_v49 }
 0x541   : > { %v7045_v63 = vpop.f32.mrb[200].mxu0 }
 0x542   : > { %v7046_v43 = vpop.f32.mrb[201].mxu0  ;;  %5705 = vmatpush1.bf16.msra.mxu1 %v7347_v14 }
 0x543   : > { %v7047_v20 = vadd.f32 %v7046_v43, %v7045_v63  ;;  %v7048_v5 = vpop.f32.mrb[202].mxu0  ;;  %5706 = vmatprep.subr.bf16.mxu1 %v7352_v53  ;;  %v7356_v63 = vld [vmem:[%s10560_s11 + $0xb0] ss:$8 sps:$4 sm:$0xff]  }
 0x544   : > { %v7049_v6 = vpop.f32.mrb[203].mxu0 }
 0x545   : > { %v7050_v47 = vadd.f32 %v7049_v6, %v7048_v5  ;;  %v3664_v13 = vadd.f32 %v7047_v20, %v9534_v55 }
 0x546   : > { %5707 = vmatpush1.bf16.msra.mxu1 %v7350_v23 }
 0x547   : > { %v7057_v51 = vpop.f32.mrb[0].mxu1  ;;  %v3667_v37 = vadd.f32 %v7050_v47, %v9534_v55  ;;  %5708 = vmatprep.subr.bf16.mxu1 %v7355_v28 }
 0x548   : > { %v7058_v52 = vpop.f32.mrb[1].mxu1 }
 0x549   : > { %v9487_v35 = vadd.f32 %v7058_v52, %v7057_v51  ;;  %v7051_v61 = vpop.f32.mrb[204].mxu0  ;;  %v7060_v18 = vpop.f32.mrb[2].mxu1 }
 0x54a   : > { %v7052_v29 = vpop.f32.mrb[205].mxu0  ;;  %v7061_v4 = vpop.f32.mrb[3].mxu1  ;;  %5709 = vmatpush1.bf16.msra.mxu1 %v7353_v27 }
 0x54b   : > { %v7053_v0 = vadd.f32 %v7052_v29, %v7051_v61  ;;  %v9495_v54 = vadd.f32 %v7061_v4, %v7060_v18  ;;  %v7054_v34 = vpop.f32.mrb[206].mxu0  ;;  %5710 = vmatprep.subr.bf16.mxu1 %v7358_v26  ;;  %v3680_v5 = vadd.f32 %v9487_v35, %v9534_v55 }
 0x54c   : > { %v7055_v16 = vpop.f32.mrb[207].mxu0 }
 0x54d   : > { %v7056_v45 = vadd.f32 %v7055_v16, %v7054_v34  ;;  %v3672_v57 = vadd.f32 %v7053_v0, %v9534_v55  ;;  %v3683_v29 = vadd.f32 %v9495_v54, %v9534_v55  ;;  %v7361_v54 = vld [vmem:[%s10560_s11 + $0xc4] ss:$8 sps:$4 sm:$0xff]  }
 0x54e   : > { %5711 = vmatpush1.bf16.msra.mxu1 %v7356_v63 }
 0x54f   : > { %v7063_v36 = vpop.f32.mrb[4].mxu1  ;;  %v3675_v10 = vadd.f32 %v7056_v45, %v9534_v55  ;;  %5712 = vmatprep.subr.bf16.mxu1 %v7361_v54 }
 0x550   : > { %v7064_v17 = vpop.f32.mrb[5].mxu1 }
 0x551   : > { %v9506_v59 = vadd.f32 %v7064_v17, %v7063_v36  ;;  %v7066_v58 = vpop.f32.mrb[6].mxu1  ;;  %v7359_v17 = vld [vmem:[%s10560_s11 + $0xc0] ss:$8 sps:$4 sm:$0xff]  }
 0x552   : > { %v7067_v9 = vpop.f32.mrb[7].mxu1  ;;  %5713 = vmatpush1.bf16.msra.mxu1 %v7359_v17 }
 0x553   : > { %v9514_v3 = vadd.f32 %v7067_v9, %v7066_v58  ;;  %v3688_v43 = vadd.f32 %v9506_v59, %v9534_v55  ;;  %v7364_v59 = vld [vmem:[%s10560_s11 + $0xd4] ss:$8 sps:$4 sm:$0xff]   ;;  %v7362_v58 = vld [vmem:[%s10560_s11 + $0xd0] ss:$8 sps:$4 sm:$0xff]   ;;  %v7367_v9 = vld [vmem:[%s10560_s11 + $0xe4] ss:$8 sps:$4 sm:$0xff]  }
 0x554   : > { %5714 = vmatprep.subr.bf16.mxu1 %v7364_v59 }
 0x555   : > { %v3691_v51 = vadd.f32 %v9514_v3, %v9534_v55  ;;  %v7365_v3 = vld [vmem:[%s10560_s11 + $0xe0] ss:$8 sps:$4 sm:$0xff]  }
 0x556   : > { %5715 = vmatpush1.bf16.msra.mxu1 %v7362_v58 }
 0x557   : > { %5716 = vmatprep.subr.bf16.mxu1 %v7367_v9 }
 0x55a   : > { %5717 = vmatpush1.bf16.msra.mxu1 %v7365_v3 }
 0x55b   : > { %5718 = vmatprep.subr.bf16.mxu1 %v7370_v11 }
 0x55e   : > { %5719 = vmatpush1.bf16.msra.mxu1 %v7368_v42 }
 0x561   : > { %v7163_v15 = vpop.f32.mrb[208].mxu0 }
 0x562   : > { %v3785_v12 = vadd.f32 %v7163_v15, %v3672_v57  ;;  %v3776_v56 = vpop.f32.mrb[209].mxu0  ;;  %v7373_v57 = vld [vmem:[%s10560_s11 + $0x104] ss:$8 sps:$4 sm:$0xff]  }
 0x563   : > { %v3777_v39 = vadd.f32 %v3776_v56, %v3664_v13  ;;  %v7164_v22 = vpop.f32.mrb[210].mxu0  ;;  %5729 = vmatprep.subr.bf16.mxu1 %v7373_v57 }
 0x564   : > { %v3857_v21 = vmax.f32 %v3785_v12, 0.0  ;;  %v3788_v32 = vadd.f32 %v7164_v22, %v3675_v10  ;;  %v3779_v40 = vpop.f32.mrb[211].mxu0 }
 0x565   : > { %v3855_v33 = vmax.f32 %v3777_v39, 0.0  ;;  %v3780_v48 = vadd.f32 %v3779_v40, %v3667_v37 }
 0x566   : > { %3877 = vst [vmem:[#allocation3 + $0x10] sm:$0xff] %v3857_v21  ;;  %v3858_v38 = vmax.f32 %v3788_v32, 0.0 }
 0x567   : > { %3875 = vst [vmem:[#allocation3] sm:$0xff] %v3855_v33  ;;  %v3856_v25 = vmax.f32 %v3780_v48, 0.0 }
 0x568   : > { %3878 = vst [vmem:[#allocation3 + $0x18] sm:$0xff] %v3858_v38 }
 0x569   : > { %3876 = vst [vmem:[#allocation3 + $0x8] sm:$0xff] %v3856_v25 }
 0x579   : > { %v7167_v20 = vpop.f32.mrb[212].mxu0 }
 0x57a   : > { %v3801_v6 = vadd.f32 %v7167_v20, %v3688_v43  ;;  %v3792_v47 = vpop.f32.mrb[213].mxu0 }
 0x57b   : > { %v3793_v52 = vadd.f32 %v3792_v47, %v3680_v5  ;;  %v7069_v61 = vpop.f32.mrb[8].mxu1  ;;  %v7168_v18 = vpop.f32.mrb[214].mxu0 }
 0x57c   : > { %v3861_v4 = vmax.f32 %v3801_v6, 0.0  ;;  %v3804_v50 = vadd.f32 %v7168_v18, %v3691_v51  ;;  %v7070_v2 = vpop.f32.mrb[9].mxu1  ;;  %v3795_v0 = vpop.f32.mrb[215].mxu0 }
 0x57d   : > { %v3859_v34 = vmax.f32 %v3793_v52, 0.0  ;;  %v7071_v44 = vadd.f32 %v7070_v2, %v7069_v61  ;;  %v3796_v16 = vadd.f32 %v3795_v0, %v3683_v29  ;;  %v7072_v35 = vpop.f32.mrb[10].mxu1 }
 0x57e   : > { %3881 = vst [vmem:[#allocation3 + $0x30] sm:$0xff] %v3861_v4  ;;  %v3862_v45 = vmax.f32 %v3804_v50, 0.0  ;;  %v7073_v60 = vpop.f32.mrb[11].mxu1 }
 0x57f   : > { %3879 = vst [vmem:[#allocation3 + $0x20] sm:$0xff] %v3859_v34  ;;  %v3860_v30 = vmax.f32 %v3796_v16, 0.0  ;;  %v7074_v36 = vadd.f32 %v7073_v60, %v7072_v35  ;;  %v3696_v24 = vadd.f32 %v7071_v44, %v9534_v55 }
 0x580   : > { %3882 = vst [vmem:[#allocation3 + $0x38] sm:$0xff] %v3862_v45 }
 0x581   : > { %3880 = vst [vmem:[#allocation3 + $0x28] sm:$0xff] %v3860_v30  ;;  %v3699_v37 = vadd.f32 %v7074_v36, %v9534_v55 }
 0x594   : > { %v7075_v8 = vpop.f32.mrb[12].mxu1 }
 0x595   : > { %v7076_v7 = vpop.f32.mrb[13].mxu1 }
 0x596   : > { %v7077_v19 = vadd.f32 %v7076_v7, %v7075_v8  ;;  %v7078_v46 = vpop.f32.mrb[14].mxu1 }
 0x597   : > { %v7079_v1 = vpop.f32.mrb[15].mxu1 }
 0x598   : > { %v7080_v41 = vadd.f32 %v7079_v1, %v7078_v46  ;;  %v3704_v15 = vadd.f32 %v7077_v19, %v9534_v55 }
 0x59a   : > { %v3707_v10 = vadd.f32 %v7080_v41, %v9534_v55 }
 0x5a2   : > { %v7171_v13 = vpop.f32.mrb[216].mxu0 }
 0x5a3   : > { %v3817_v12 = vadd.f32 %v7171_v13, %v3704_v15  ;;  %v3808_v56 = vpop.f32.mrb[217].mxu0 }
 0x5a4   : > { %v3809_v62 = vadd.f32 %v3808_v56, %v3696_v24  ;;  %v7081_v39 = vpop.f32.mrb[16].mxu1  ;;  %v7172_v22 = vpop.f32.mrb[218].mxu0 }
 0x5a5   : > { %v3865_v21 = vmax.f32 %v3817_v12, 0.0  ;;  %v3820_v32 = vadd.f32 %v7172_v22, %v3707_v10  ;;  %v7082_v40 = vpop.f32.mrb[17].mxu1  ;;  %v3811_v33 = vpop.f32.mrb[219].mxu0 }
 0x5a6   : > { %v3863_v48 = vmax.f32 %v3809_v62, 0.0  ;;  %v7083_v31 = vadd.f32 %v7082_v40, %v7081_v39  ;;  %v3812_v38 = vadd.f32 %v3811_v33, %v3699_v37  ;;  %v7084_v49 = vpop.f32.mrb[18].mxu1  ;;  %v7371_v33 = vld [vmem:[%s10560_s11 + $0x100] ss:$8 sps:$4 sm:$0xff]  }
 0x5a7   : > { %3885 = vst [vmem:[#allocation3 + $0x50] sm:$0xff] %v3865_v21  ;;  %v3866_v25 = vmax.f32 %v3820_v32, 0.0  ;;  %v7085_v14 = vpop.f32.mrb[19].mxu1 }
 0x5a8   : > { %3883 = vst [vmem:[#allocation3 + $0x40] sm:$0xff] %v3863_v48  ;;  %v3864_v53 = vmax.f32 %v3812_v38, 0.0  ;;  %v7086_v23 = vadd.f32 %v7085_v14, %v7084_v49  ;;  %v3712_v47 = vadd.f32 %v7083_v31, %v9534_v55  ;;  %v7374_v38 = vld [vmem:[%s10560_s11 + $0x110] ss:$8 sps:$4 sm:$0xff]   ;;  %v7379_v49 = vld [vmem:[%s10560_s11 + $0x124] ss:$8 sps:$4 sm:$0xff]  }
 0x5a9   : > { %3886 = vst [vmem:[#allocation3 + $0x58] sm:$0xff] %v3866_v25  ;;  %v7377_v25 = vld [vmem:[%s10560_s11 + $0x120] ss:$8 sps:$4 sm:$0xff]   ;;  %v7382_v14 = vld [vmem:[%s10560_s11 + $0x134] ss:$8 sps:$4 sm:$0xff]  }
 0x5aa   : > { %3884 = vst [vmem:[#allocation3 + $0x48] sm:$0xff] %v3864_v53  ;;  %v3715_v50 = vadd.f32 %v7086_v23, %v9534_v55  ;;  %v7380_v53 = vld [vmem:[%s10560_s11 + $0x130] ss:$8 sps:$4 sm:$0xff]   ;;  %v7385_v23 = vld [vmem:[%s10560_s11 + $0x144] ss:$8 sps:$4 sm:$0xff]  }
 0x5b4   : > { %v7087_v28 = vpop.f32.mrb[20].mxu1 }
 0x5b5   : > { %v7088_v27 = vpop.f32.mrb[21].mxu1 }
 0x5b6   : > { %v7089_v26 = vadd.f32 %v7088_v27, %v7087_v28  ;;  %v7090_v63 = vpop.f32.mrb[22].mxu1  ;;  %v7383_v28 = vld [vmem:[%s10560_s11 + $0x140] ss:$8 sps:$4 sm:$0xff]   ;;  %v7388_v27 = vld [vmem:[%s10560_s11 + $0x154] ss:$8 sps:$4 sm:$0xff]  }
 0x5b7   : > { %v7091_v43 = vpop.f32.mrb[23].mxu1 }
 0x5b8   : > { %v7092_v20 = vadd.f32 %v7091_v43, %v7090_v63  ;;  %v3720_v5 = vadd.f32 %v7089_v26, %v9534_v55  ;;  %v7386_v26 = vld [vmem:[%s10560_s11 + $0x150] ss:$8 sps:$4 sm:$0xff]   ;;  %v7391_v63 = vld [vmem:[%s10560_s11 + $0x164] ss:$8 sps:$4 sm:$0xff]   ;;  %v7389_v43 = vld [vmem:[%s10560_s11 + $0x160] ss:$8 sps:$4 sm:$0xff]  }
 0x5ba   : > { %v3723_v61 = vadd.f32 %v7092_v20, %v9534_v55  ;;  %v7394_v20 = vld [vmem:[%s10560_s11 + $0x174] ss:$8 sps:$4 sm:$0xff]  }
 0x5c2   : > { %v7175_v6 = vpop.f32.mrb[220].mxu0 }
 0x5c3   : > { %v3833_v51 = vadd.f32 %v7175_v6, %v3720_v5  ;;  %v3824_v52 = vpop.f32.mrb[221].mxu0  ;;  %v7392_v5 = vld [vmem:[%s10560_s11 + $0x170] ss:$8 sps:$4 sm:$0xff]   ;;  %v7397_v6 = vld [vmem:[%s10560_s11 + $0x184] ss:$8 sps:$4 sm:$0xff]  }
 0x5c4   : > { %v3825_v18 = vadd.f32 %v3824_v52, %v3712_v47  ;;  %v7093_v29 = vpop.f32.mrb[24].mxu1  ;;  %v7176_v4 = vpop.f32.mrb[222].mxu0  ;;  %v7395_v47 = vld [vmem:[%s10560_s11 + $0x180] ss:$8 sps:$4 sm:$0xff]   ;;  %v7398_v52 = vld [vmem:[%s10560_s11 + $0x190] ss:$8 sps:$4 sm:$0xff]  }
 0x5c5   : > { %v3869_v2 = vmax.f32 %v3833_v51, 0.0  ;;  %v3836_v0 = vadd.f32 %v7176_v4, %v3723_v61  ;;  %v7094_v34 = vpop.f32.mrb[25].mxu1  ;;  %v3827_v44 = vpop.f32.mrb[223].mxu0  ;;  %v7400_v51 = vld [vmem:[%s10560_s11 + $0x194] ss:$8 sps:$4 sm:$0xff]  }
 0x5c6   : > { %v3867_v16 = vmax.f32 %v3825_v18, 0.0  ;;  %v7095_v35 = vadd.f32 %v7094_v34, %v7093_v29  ;;  %v3828_v45 = vadd.f32 %v3827_v44, %v3715_v50  ;;  %v7096_v60 = vpop.f32.mrb[26].mxu1  ;;  %v7403_v61 = vld [vmem:[%s10560_s11 + $0x1a4] ss:$8 sps:$4 sm:$0xff]   ;;  %v7401_v18 = vld [vmem:[%s10560_s11 + $0x1a0] ss:$8 sps:$4 sm:$0xff]  }
 0x5c7   : > { %3889 = vst [vmem:[#allocation3 + $0x70] sm:$0xff] %v3869_v2  ;;  %v3870_v30 = vmax.f32 %v3836_v0, 0.0  ;;  %v7097_v36 = vpop.f32.mrb[27].mxu1  ;;  %v7406_v29 = vld [vmem:[%s10560_s11 + $0x1b4] ss:$8 sps:$4 sm:$0xff]  }
 0x5c8   : > { %3887 = vst [vmem:[#allocation3 + $0x60] sm:$0xff] %v3867_v16  ;;  %v3868_v54 = vmax.f32 %v3828_v45, 0.0  ;;  %v7098_v17 = vadd.f32 %v7097_v36, %v7096_v60  ;;  %v3728_v8 = vadd.f32 %v7095_v35, %v9534_v55  ;;  %v7404_v4 = vld [vmem:[%s10560_s11 + $0x1b0] ss:$8 sps:$4 sm:$0xff]   ;;  %v7409_v50 = vld [vmem:[%s10560_s11 + $0x1c4] ss:$8 sps:$4 sm:$0xff]  }
 0x5c9   : > { %3890 = vst [vmem:[#allocation3 + $0x78] sm:$0xff] %v3870_v30  ;;  %v7407_v2 = vld [vmem:[%s10560_s11 + $0x1c0] ss:$8 sps:$4 sm:$0xff]   ;;  %v7412_v0 = vld [vmem:[%s10560_s11 + $0x1d4] ss:$8 sps:$4 sm:$0xff]  }
 0x5ca   : > { %3888 = vst [vmem:[#allocation3 + $0x68] sm:$0xff] %v3868_v54  ;;  %v3731_v42 = vadd.f32 %v7098_v17, %v9534_v55  ;;  %v7410_v34 = vld [vmem:[%s10560_s11 + $0x1d0] ss:$8 sps:$4 sm:$0xff]   ;;  %v7415_v44 = vld [vmem:[%s10560_s11 + $0x1e4] ss:$8 sps:$4 sm:$0xff]  }
 0x5cb   : > { %v7413_v16 = vld [vmem:[%s10560_s11 + $0x1e0] ss:$8 sps:$4 sm:$0xff]   ;;  %v7418_v35 = vld [vmem:[%s10560_s11 + $0x1f4] ss:$8 sps:$4 sm:$0xff]   ;;  %v7416_v45 = vld [vmem:[%s10560_s11 + $0x1f0] ss:$8 sps:$4 sm:$0xff]  }
 0x5cc   : > { %v7421_v60 = vld [vmem:[%s10560_s11 + $0x204] ss:$8 sps:$4 sm:$0xff]   ;;  %v7419_v54 = vld [vmem:[%s10560_s11 + $0x200] ss:$8 sps:$4 sm:$0xff]  }
 0x60b   : > { %v7099_v59 = vpop.f32.mrb[28].mxu1  ;;  %v7179_v58 = vpop.f32.mrb[224].mxu0 }
 0x60c   : > { %v7100_v9 = vpop.f32.mrb[29].mxu1  ;;  %v3840_v7 = vpop.f32.mrb[225].mxu0 }
 0x60d   : > { %v7101_v3 = vadd.f32 %v7100_v9, %v7099_v59  ;;  %v3841_v19 = vadd.f32 %v3840_v7, %v3728_v8  ;;  %v7102_v46 = vpop.f32.mrb[30].mxu1  ;;  %v7180_v1 = vpop.f32.mrb[226].mxu0  ;;  %v7424_v59 = vld [vmem:[%s10560_s11 + $0x214] ss:$8 sps:$4 sm:$0xff]   ;;  %v7422_v8 = vld [vmem:[%s10560_s11 + $0x210] ss:$8 sps:$4 sm:$0xff]  }
 0x60e   : > { %v7103_v11 = vpop.f32.mrb[31].mxu1  ;;  %v3843_v41 = vpop.f32.mrb[227].mxu0  ;;  %v7427_v9 = vld [vmem:[%s10560_s11 + $0x224] ss:$8 sps:$4 sm:$0xff]   ;;  %v7425_v7 = vld [vmem:[%s10560_s11 + $0x220] ss:$8 sps:$4 sm:$0xff]  }
 0x60f   : > { %v3736_v57 = vadd.f32 %v7101_v3, %v9534_v55  ;;  %v3871_v15 = vmax.f32 %v3841_v19, 0.0  ;;  %v7104_v13 = vadd.f32 %v7103_v11, %v7102_v46  ;;  %v3844_v24 = vadd.f32 %v3843_v41, %v3731_v42  ;;  %v7430_v3 = vld [vmem:[%s10560_s11 + $0x234] ss:$8 sps:$4 sm:$0xff]   ;;  %v7428_v19 = vld [vmem:[%s10560_s11 + $0x230] ss:$8 sps:$4 sm:$0xff]  }
 0x610   : > { %v7433_v46 = vld [vmem:[%s10560_s11 + $0x244] ss:$8 sps:$4 sm:$0xff]   ;;  %v7436_v42 = vld [vmem:[%s10560_s11 + $0x254] ss:$8 sps:$4 sm:$0xff]   ;;  %v7434_v11 = vld [vmem:[%s10560_s11 + $0x250] ss:$8 sps:$4 sm:$0xff]  }
 0x611   : > { %v3849_v12 = vadd.f32 %v7179_v58, %v3736_v57  ;;  %3891 = vst [vmem:[#allocation3 + $0x80] sm:$0xff] %v3871_v15  ;;  %v3739_v56 = vadd.f32 %v7104_v13, %v9534_v55  ;;  %v3872_v10 = vmax.f32 %v3844_v24, 0.0  ;;  %v7376_v55 = vld [vmem:[%s10560_s11 + $0x114] ss:$8 sps:$4 sm:$0xff]   ;;  %v7439_v41 = vld [vmem:[%s10560_s11 + $0x264] ss:$8 sps:$4 sm:$0xff]  }
 0x612   : > { %v7437_v57 = vld [vmem:[%s10560_s11 + $0x260] ss:$8 sps:$4 sm:$0xff]   ;;  %v7442_v15 = vld [vmem:[%s10560_s11 + $0x274] ss:$8 sps:$4 sm:$0xff]   ;;  %v7440_v13 = vld [vmem:[%s10560_s11 + $0x270] ss:$8 sps:$4 sm:$0xff]  }
 0x613   : > { %v3873_v62 = vmax.f32 %v3849_v12, 0.0  ;;  %v3852_v39 = vadd.f32 %v7180_v1, %v3739_v56  ;;  %3892 = vst [vmem:[#allocation3 + $0x88] sm:$0xff] %v3872_v10  ;;  %v7431_v1 = vld [vmem:[%s10560_s11 + $0x240] ss:$8 sps:$4 sm:$0xff]   ;;  %v7445_v24 = vld [vmem:[%s10560_s11 + $0x284] ss:$8 sps:$4 sm:$0xff]  }
 0x614   : > { %v7443_v12 = vld [vmem:[%s10560_s11 + $0x280] ss:$8 sps:$4 sm:$0xff]   ;;  %v7448_v56 = vld [vmem:[%s10560_s11 + $0x294] ss:$8 sps:$4 sm:$0xff]   ;;  %v7446_v10 = vld [vmem:[%s10560_s11 + $0x290] ss:$8 sps:$4 sm:$0xff]  }
 0x615   : > { %3893 = vst [vmem:[#allocation3 + $0x90] sm:$0xff] %v3873_v62  ;;  %v3874_v22 = vmax.f32 %v3852_v39, 0.0  ;;  %v7451_v62 = vld [vmem:[%s10560_s11 + $0x2a4] ss:$8 sps:$4 sm:$0xff]   ;;  %v7449_v39 = vld [vmem:[%s10560_s11 + $0x2a0] ss:$8 sps:$4 sm:$0xff]  }
 0x617   : > { %3894 = vst [vmem:[#allocation3 + $0x98] sm:$0xff] %v3874_v22  ;;  %v7454_v22 = vld [vmem:[%s10560_s11 + $0x2b4] ss:$8 sps:$4 sm:$0xff]  }
 0x61a   : > { %v3897_v37 = vld [vmem:[#allocation3 + $0x1] ss:$20 sm:$0xff]  ;;  %v3895_v21 = vld [vmem:[#allocation3] ss:$20 sm:$0xff]  ;;  %v3901_v32 = vld [vmem:[#allocation3 + $0x3] ss:$20 sm:$0xff] }
 0x61b   : > { %v3931_v40 = vpack.c.bf16 %v3897_v37, %v3897_v37  ;;  %v3930_v48 = vpack.c.bf16 %v3895_v21, %v3895_v21  ;;  %v3933_v31 = vpack.c.bf16 %v3901_v32, %v3901_v32  ;;  %v3899_v30 = vld [vmem:[#allocation3 + $0x2] ss:$20 sm:$0xff] }
 0x61c   : > { %v3905_v36 = vld [vmem:[#allocation3 + $0x5] ss:$20 sm:$0xff]  ;;  %v3932_v17 = vpack.c.bf16 %v3899_v30, %v3899_v30 }
 0x61d   : > { %5720 = vmatprep.mubr.bf16.mxu1 %v3931_v40  ;;  %v3935_v58 = vpack.c.bf16 %v3905_v36, %v3905_v36  ;;  %v7452_v37 = vld [vmem:[%s10560_s11 + $0x2b0] ss:$8 sps:$4 sm:$0xff]   ;;  %v7457_v21 = vld [vmem:[%s10560_s11 + $0x2c4] ss:$8 sps:$4 sm:$0xff]   ;;  %v7455_v32 = vld [vmem:[%s10560_s11 + $0x2c0] ss:$8 sps:$4 sm:$0xff]  }
 0x61e   : > { %5721 = vmatmul.mubr.bf16.vlgmr.msra.gmra.mrb[32].mxu1 %v3930_v48  ;;  %v7460_v40 = vld [vmem:[%s10560_s11 + $0x2d4] ss:$8 sps:$4 sm:$0xff]   ;;  %v7463_v48 = vld [vmem:[%s10560_s11 + $0x2e4] ss:$8 sps:$4 sm:$0xff]   ;;  %v7503_v30 = vld [vmem:[%s10560_s11 + $0x3c0] ss:$8 sps:$4 sm:$0xff]  }
 0x61f   : > { %5730 = vmatpush1.bf16.msra.mxu1 %v7371_v33  ;;  %5761 = vmatprep.mubr.bf16.mxu1 %v3933_v31  ;;  %v7458_v33 = vld [vmem:[%s10560_s11 + $0x2d0] ss:$8 sps:$4 sm:$0xff]   ;;  %v7466_v31 = vld [vmem:[%s10560_s11 + $0x2f4] ss:$8 sps:$4 sm:$0xff]  }
 0x620   : > { %5731 = vmatprep.subr.bf16.mxu1 %v7376_v55  ;;  %v7461_v55 = vld [vmem:[%s10560_s11 + $0x2e0] ss:$8 sps:$4 sm:$0xff]   ;;  %v7508_v36 = vld [vmem:[%s10560_s11 + $0x3d4] ss:$8 sps:$4 sm:$0xff]  }
 0x623   : > { %5732 = vmatpush1.bf16.msra.mxu1 %v7374_v38  ;;  %v7464_v38 = vld [vmem:[%s10560_s11 + $0x2f0] ss:$8 sps:$4 sm:$0xff]  }
 0x624   : > { %5733 = vmatprep.subr.bf16.mxu1 %v7379_v49  ;;  %v7469_v49 = vld [vmem:[%s10560_s11 + $0x304] ss:$8 sps:$4 sm:$0xff]  }
 0x627   : > { %5734 = vmatpush1.bf16.msra.mxu1 %v7377_v25  ;;  %v3903_v25 = vld [vmem:[#allocation3 + $0x4] ss:$20 sm:$0xff] }
 0x628   : > { %5735 = vmatprep.subr.bf16.mxu1 %v7382_v14  ;;  %v3909_v14 = vld [vmem:[#allocation3 + $0x7] ss:$20 sm:$0xff] }
 0x62b   : > { %5736 = vmatpush1.bf16.msra.mxu1 %v7380_v53  ;;  %v7467_v53 = vld [vmem:[%s10560_s11 + $0x300] ss:$8 sps:$4 sm:$0xff]  }
 0x62c   : > { %5737 = vmatprep.subr.bf16.mxu1 %v7385_v23  ;;  %v3934_v23 = vpack.c.bf16 %v3903_v25, %v3903_v25  ;;  %v7551_v25 = vld [vmem:[%s10560_s11 + $0x4c0] ss:$8 sps:$4 sm:$0xff]  }
 0x62f   : > { %5738 = vmatpush1.bf16.msra.mxu1 %v7383_v28  ;;  %v7472_v28 = vld [vmem:[%s10560_s11 + $0x314] ss:$8 sps:$4 sm:$0xff]  }
 0x630   : > { %5739 = vmatprep.subr.bf16.mxu1 %v7388_v27  ;;  %v3937_v27 = vpack.c.bf16 %v3909_v14, %v3909_v14  ;;  %v7556_v14 = vld [vmem:[%s10560_s11 + $0x4d4] ss:$8 sps:$4 sm:$0xff]  }
 0x633   : > { %5740 = vmatpush1.bf16.msra.mxu1 %v7386_v26  ;;  %v7470_v26 = vld [vmem:[%s10560_s11 + $0x310] ss:$8 sps:$4 sm:$0xff]  }
 0x634   : > { %5741 = vmatprep.subr.bf16.mxu1 %v7391_v63  ;;  %v7475_v63 = vld [vmem:[%s10560_s11 + $0x324] ss:$8 sps:$4 sm:$0xff]  }
 0x637   : > { %5742 = vmatpush1.bf16.msra.mxu1 %v7389_v43  ;;  %v7473_v43 = vld [vmem:[%s10560_s11 + $0x320] ss:$8 sps:$4 sm:$0xff]  }
 0x638   : > { %5743 = vmatprep.subr.bf16.mxu1 %v7394_v20  ;;  %v7478_v20 = vld [vmem:[%s10560_s11 + $0x334] ss:$8 sps:$4 sm:$0xff]  }
 0x63b   : > { %5744 = vmatpush1.bf16.msra.mxu1 %v7392_v5  ;;  %v7476_v5 = vld [vmem:[%s10560_s11 + $0x330] ss:$8 sps:$4 sm:$0xff]  }
 0x63c   : > { %5745 = vmatprep.subr.bf16.mxu1 %v7397_v6  ;;  %v7481_v6 = vld [vmem:[%s10560_s11 + $0x344] ss:$8 sps:$4 sm:$0xff]  }
 0x63f   : > { %5746 = vmatpush1.bf16.msra.mxu1 %v7395_v47  ;;  %v7479_v47 = vld [vmem:[%s10560_s11 + $0x340] ss:$8 sps:$4 sm:$0xff]  }
 0x640   : > { %5747 = vmatprep.subr.bf16.mxu1 %v7400_v51  ;;  %v7484_v51 = vld [vmem:[%s10560_s11 + $0x354] ss:$8 sps:$4 sm:$0xff]  }
 0x643   : > { %5748 = vmatpush1.bf16.msra.mxu1 %v7398_v52  ;;  %v7482_v52 = vld [vmem:[%s10560_s11 + $0x350] ss:$8 sps:$4 sm:$0xff]  }
 0x644   : > { %5749 = vmatprep.subr.bf16.mxu1 %v7403_v61  ;;  %v7487_v61 = vld [vmem:[%s10560_s11 + $0x364] ss:$8 sps:$4 sm:$0xff]  }
 0x647   : > { %5750 = vmatpush1.bf16.msra.mxu1 %v7401_v18  ;;  %v7485_v18 = vld [vmem:[%s10560_s11 + $0x360] ss:$8 sps:$4 sm:$0xff]  }
 0x648   : > { %5751 = vmatprep.subr.bf16.mxu1 %v7406_v29  ;;  %v7490_v29 = vld [vmem:[%s10560_s11 + $0x374] ss:$8 sps:$4 sm:$0xff]  }
 0x64b   : > { %5752 = vmatpush1.bf16.msra.mxu1 %v7404_v4  ;;  %v7488_v4 = vld [vmem:[%s10560_s11 + $0x370] ss:$8 sps:$4 sm:$0xff]  }
 0x64c   : > { %5753 = vmatprep.subr.bf16.mxu1 %v7409_v50  ;;  %v7493_v50 = vld [vmem:[%s10560_s11 + $0x384] ss:$8 sps:$4 sm:$0xff]  }
 0x64f   : > { %5754 = vmatpush1.bf16.msra.mxu1 %v7407_v2  ;;  %v7491_v2 = vld [vmem:[%s10560_s11 + $0x380] ss:$8 sps:$4 sm:$0xff]  }
 0x650   : > { %5755 = vmatprep.subr.bf16.mxu1 %v7412_v0  ;;  %v7496_v0 = vld [vmem:[%s10560_s11 + $0x394] ss:$8 sps:$4 sm:$0xff]  }
 0x653   : > { %5756 = vmatpush1.bf16.msra.mxu1 %v7410_v34  ;;  %v7494_v34 = vld [vmem:[%s10560_s11 + $0x390] ss:$8 sps:$4 sm:$0xff]  }
 0x654   : > { %5757 = vmatprep.subr.bf16.mxu1 %v7415_v44  ;;  %v7499_v44 = vld [vmem:[%s10560_s11 + $0x3a4] ss:$8 sps:$4 sm:$0xff]  }
 0x657   : > { %5758 = vmatpush1.bf16.msra.mxu1 %v7413_v16  ;;  %v7497_v16 = vld [vmem:[%s10560_s11 + $0x3a0] ss:$8 sps:$4 sm:$0xff]  }
 0x658   : > { %5759 = vmatprep.subr.bf16.mxu1 %v7418_v35  ;;  %v7502_v35 = vld [vmem:[%s10560_s11 + $0x3b4] ss:$8 sps:$4 sm:$0xff]  }
 0x65b   : > { %5760 = vmatpush1.bf16.msra.mxu1 %v7416_v45  ;;  %v7500_v45 = vld [vmem:[%s10560_s11 + $0x3b0] ss:$8 sps:$4 sm:$0xff]  }
 0x65c   : > { %5770 = vmatprep.subr.bf16.mxu1 %v7421_v60  ;;  %v7505_v60 = vld [vmem:[%s10560_s11 + $0x3c4] ss:$8 sps:$4 sm:$0xff]  }
 0x65e   : > { %5762 = vmatmul.mubr.bf16.vlgmr.msra.gmra.mrb[32].mxu1 %v3932_v17  ;;  %v7511_v17 = vld [vmem:[%s10560_s11 + $0x3e4] ss:$8 sps:$4 sm:$0xff]  }
 0x65f   : > { %5771 = vmatpush1.bf16.msra.mxu1 %v7419_v54  ;;  %5802 = vmatprep.mubr.bf16.mxu1 %v3935_v58  ;;  %v7506_v54 = vld [vmem:[%s10560_s11 + $0x3d0] ss:$8 sps:$4 sm:$0xff]   ;;  %v7514_v58 = vld [vmem:[%s10560_s11 + $0x3f4] ss:$8 sps:$4 sm:$0xff]  }
 0x660   : > { %5772 = vmatprep.subr.bf16.mxu1 %v7424_v59  ;;  %v7509_v59 = vld [vmem:[%s10560_s11 + $0x3e0] ss:$8 sps:$4 sm:$0xff]  }
 0x663   : > { %5773 = vmatpush1.bf16.msra.mxu1 %v7422_v8  ;;  %v7512_v8 = vld [vmem:[%s10560_s11 + $0x3f0] ss:$8 sps:$4 sm:$0xff]  }
 0x664   : > { %5774 = vmatprep.subr.bf16.mxu1 %v7427_v9  ;;  %v7517_v9 = vld [vmem:[%s10560_s11 + $0x404] ss:$8 sps:$4 sm:$0xff]  }
 0x667   : > { %5775 = vmatpush1.bf16.msra.mxu1 %v7425_v7  ;;  %v3907_v7 = vld [vmem:[#allocation3 + $0x6] ss:$20 sm:$0xff] }
 0x668   : > { %5776 = vmatprep.subr.bf16.mxu1 %v7430_v3  ;;  %v3913_v3 = vld [vmem:[#allocation3 + $0x9] ss:$20 sm:$0xff] }
 0x66b   : > { %5777 = vmatpush1.bf16.msra.mxu1 %v7428_v19  ;;  %v7515_v19 = vld [vmem:[%s10560_s11 + $0x400] ss:$8 sps:$4 sm:$0xff]  }
 0x66c   : > { %5778 = vmatprep.subr.bf16.mxu1 %v7433_v46  ;;  %v3936_v46 = vpack.c.bf16 %v3907_v7, %v3907_v7  ;;  %v7599_v7 = vld [vmem:[%s10560_s11 + $0x5c0] ss:$8 sps:$4 sm:$0xff]  }
 0x66f   : > { %5779 = vmatpush1.bf16.msra.mxu1 %v7431_v1  ;;  %v7520_v1 = vld [vmem:[%s10560_s11 + $0x414] ss:$8 sps:$4 sm:$0xff]  }
 0x670   : > { %5780 = vmatprep.subr.bf16.mxu1 %v7436_v42  ;;  %v3939_v42 = vpack.c.bf16 %v3913_v3, %v3913_v3  ;;  %v7604_v3 = vld [vmem:[%s10560_s11 + $0x5d4] ss:$8 sps:$4 sm:$0xff]  }
 0x673   : > { %5781 = vmatpush1.bf16.msra.mxu1 %v7434_v11  ;;  %v7518_v11 = vld [vmem:[%s10560_s11 + $0x410] ss:$8 sps:$4 sm:$0xff]  }
 0x674   : > { %5782 = vmatprep.subr.bf16.mxu1 %v7439_v41  ;;  %v7523_v41 = vld [vmem:[%s10560_s11 + $0x424] ss:$8 sps:$4 sm:$0xff]  }
 0x677   : > { %5783 = vmatpush1.bf16.msra.mxu1 %v7437_v57  ;;  %v7521_v57 = vld [vmem:[%s10560_s11 + $0x420] ss:$8 sps:$4 sm:$0xff]  }
 0x678   : > { %5784 = vmatprep.subr.bf16.mxu1 %v7442_v15  ;;  %v7526_v15 = vld [vmem:[%s10560_s11 + $0x434] ss:$8 sps:$4 sm:$0xff]  }
 0x67b   : > { %5785 = vmatpush1.bf16.msra.mxu1 %v7440_v13  ;;  %v7524_v13 = vld [vmem:[%s10560_s11 + $0x430] ss:$8 sps:$4 sm:$0xff]  }
 0x67c   : > { %5786 = vmatprep.subr.bf16.mxu1 %v7445_v24  ;;  %v7529_v24 = vld [vmem:[%s10560_s11 + $0x444] ss:$8 sps:$4 sm:$0xff]  }
 0x67f   : > { %5787 = vmatpush1.bf16.msra.mxu1 %v7443_v12  ;;  %v7527_v12 = vld [vmem:[%s10560_s11 + $0x440] ss:$8 sps:$4 sm:$0xff]  }
 0x680   : > { %5788 = vmatprep.subr.bf16.mxu1 %v7448_v56  ;;  %v7532_v56 = vld [vmem:[%s10560_s11 + $0x454] ss:$8 sps:$4 sm:$0xff]  }
 0x683   : > { %5789 = vmatpush1.bf16.msra.mxu1 %v7446_v10  ;;  %v7530_v10 = vld [vmem:[%s10560_s11 + $0x450] ss:$8 sps:$4 sm:$0xff]  }
 0x684   : > { %5790 = vmatprep.subr.bf16.mxu1 %v7451_v62  ;;  %v7535_v62 = vld [vmem:[%s10560_s11 + $0x464] ss:$8 sps:$4 sm:$0xff]  }
 0x687   : > { %5791 = vmatpush1.bf16.msra.mxu1 %v7449_v39  ;;  %v7533_v39 = vld [vmem:[%s10560_s11 + $0x460] ss:$8 sps:$4 sm:$0xff]  }
 0x688   : > { %5792 = vmatprep.subr.bf16.mxu1 %v7454_v22  ;;  %v7538_v22 = vld [vmem:[%s10560_s11 + $0x474] ss:$8 sps:$4 sm:$0xff]  }
 0x68b   : > { %5793 = vmatpush1.bf16.msra.mxu1 %v7452_v37  ;;  %v7536_v37 = vld [vmem:[%s10560_s11 + $0x470] ss:$8 sps:$4 sm:$0xff]  }
 0x68c   : > { %5794 = vmatprep.subr.bf16.mxu1 %v7457_v21  ;;  %v7541_v21 = vld [vmem:[%s10560_s11 + $0x484] ss:$8 sps:$4 sm:$0xff]  }
 0x68f   : > { %5795 = vmatpush1.bf16.msra.mxu1 %v7455_v32  ;;  %v7539_v32 = vld [vmem:[%s10560_s11 + $0x480] ss:$8 sps:$4 sm:$0xff]  }
 0x690   : > { %5796 = vmatprep.subr.bf16.mxu1 %v7460_v40  ;;  %v7544_v40 = vld [vmem:[%s10560_s11 + $0x494] ss:$8 sps:$4 sm:$0xff]  }
 0x693   : > { %5797 = vmatpush1.bf16.msra.mxu1 %v7458_v33  ;;  %v7542_v33 = vld [vmem:[%s10560_s11 + $0x490] ss:$8 sps:$4 sm:$0xff]  }
 0x694   : > { %5798 = vmatprep.subr.bf16.mxu1 %v7463_v48  ;;  %v7547_v48 = vld [vmem:[%s10560_s11 + $0x4a4] ss:$8 sps:$4 sm:$0xff]  }
 0x697   : > { %5799 = vmatpush1.bf16.msra.mxu1 %v7461_v55  ;;  %v7545_v55 = vld [vmem:[%s10560_s11 + $0x4a0] ss:$8 sps:$4 sm:$0xff]  }
 0x698   : > { %5800 = vmatprep.subr.bf16.mxu1 %v7466_v31  ;;  %v7550_v31 = vld [vmem:[%s10560_s11 + $0x4b4] ss:$8 sps:$4 sm:$0xff]  }
 0x69b   : > { %5801 = vmatpush1.bf16.msra.mxu1 %v7464_v38  ;;  %v7548_v38 = vld [vmem:[%s10560_s11 + $0x4b0] ss:$8 sps:$4 sm:$0xff]  }
 0x69c   : > { %5811 = vmatprep.subr.bf16.mxu1 %v7469_v49  ;;  %v7553_v49 = vld [vmem:[%s10560_s11 + $0x4c4] ss:$8 sps:$4 sm:$0xff]  }
 0x69e   : > { %5803 = vmatmul.mubr.bf16.vlgmr.msra.gmra.mrb[32].mxu1 %v3934_v23  ;;  %v7559_v23 = vld [vmem:[%s10560_s11 + $0x4e4] ss:$8 sps:$4 sm:$0xff]  }
 0x69f   : > { %5812 = vmatpush1.bf16.msra.mxu1 %v7467_v53  ;;  %5843 = vmatprep.mubr.bf16.mxu1 %v3937_v27  ;;  %v7554_v53 = vld [vmem:[%s10560_s11 + $0x4d0] ss:$8 sps:$4 sm:$0xff]   ;;  %v7562_v27 = vld [vmem:[%s10560_s11 + $0x4f4] ss:$8 sps:$4 sm:$0xff]  }
 0x6a0   : > { %5813 = vmatprep.subr.bf16.mxu1 %v7472_v28  ;;  %v7557_v28 = vld [vmem:[%s10560_s11 + $0x4e0] ss:$8 sps:$4 sm:$0xff]  }
 0x6a3   : > { %5814 = vmatpush1.bf16.msra.mxu1 %v7470_v26  ;;  %v7560_v26 = vld [vmem:[%s10560_s11 + $0x4f0] ss:$8 sps:$4 sm:$0xff]  }
 0x6a4   : > { %5815 = vmatprep.subr.bf16.mxu1 %v7475_v63  ;;  %v7565_v63 = vld [vmem:[%s10560_s11 + $0x504] ss:$8 sps:$4 sm:$0xff]  }
 0x6a7   : > { %5816 = vmatpush1.bf16.msra.mxu1 %v7473_v43  ;;  %v3911_v43 = vld [vmem:[#allocation3 + $0x8] ss:$20 sm:$0xff] }
 0x6a8   : > { %5817 = vmatprep.subr.bf16.mxu1 %v7478_v20  ;;  %v3917_v20 = vld [vmem:[#allocation3 + $0xb] ss:$20 sm:$0xff] }
 0x6ab   : > { %5818 = vmatpush1.bf16.msra.mxu1 %v7476_v5  ;;  %v7563_v5 = vld [vmem:[%s10560_s11 + $0x500] ss:$8 sps:$4 sm:$0xff]  }
 0x6ac   : > { %5819 = vmatprep.subr.bf16.mxu1 %v7481_v6  ;;  %v3938_v6 = vpack.c.bf16 %v3911_v43, %v3911_v43  ;;  %v7647_v43 = vld [vmem:[%s10560_s11 + $0x6c0] ss:$8 sps:$4 sm:$0xff]  }
 0x6af   : > { %5820 = vmatpush1.bf16.msra.mxu1 %v7479_v47  ;;  %v7568_v47 = vld [vmem:[%s10560_s11 + $0x514] ss:$8 sps:$4 sm:$0xff]  }
 0x6b0   : > { %5821 = vmatprep.subr.bf16.mxu1 %v7484_v51  ;;  %v3941_v51 = vpack.c.bf16 %v3917_v20, %v3917_v20  ;;  %v7652_v20 = vld [vmem:[%s10560_s11 + $0x6d4] ss:$8 sps:$4 sm:$0xff]  }
 0x6b3   : > { %5822 = vmatpush1.bf16.msra.mxu1 %v7482_v52  ;;  %v7566_v52 = vld [vmem:[%s10560_s11 + $0x510] ss:$8 sps:$4 sm:$0xff]  }
 0x6b4   : > { %5823 = vmatprep.subr.bf16.mxu1 %v7487_v61  ;;  %v7571_v61 = vld [vmem:[%s10560_s11 + $0x524] ss:$8 sps:$4 sm:$0xff]  }
 0x6b7   : > { %5824 = vmatpush1.bf16.msra.mxu1 %v7485_v18  ;;  %v7569_v18 = vld [vmem:[%s10560_s11 + $0x520] ss:$8 sps:$4 sm:$0xff]  }
 0x6b8   : > { %5825 = vmatprep.subr.bf16.mxu1 %v7490_v29  ;;  %v7574_v29 = vld [vmem:[%s10560_s11 + $0x534] ss:$8 sps:$4 sm:$0xff]  }
 0x6bb   : > { %5826 = vmatpush1.bf16.msra.mxu1 %v7488_v4  ;;  %v7572_v4 = vld [vmem:[%s10560_s11 + $0x530] ss:$8 sps:$4 sm:$0xff]  }
 0x6bc   : > { %5827 = vmatprep.subr.bf16.mxu1 %v7493_v50  ;;  %v7577_v50 = vld [vmem:[%s10560_s11 + $0x544] ss:$8 sps:$4 sm:$0xff]  }
 0x6bf   : > { %5828 = vmatpush1.bf16.msra.mxu1 %v7491_v2  ;;  %v7575_v2 = vld [vmem:[%s10560_s11 + $0x540] ss:$8 sps:$4 sm:$0xff]  }
 0x6c0   : > { %5829 = vmatprep.subr.bf16.mxu1 %v7496_v0  ;;  %v7580_v0 = vld [vmem:[%s10560_s11 + $0x554] ss:$8 sps:$4 sm:$0xff]  }
 0x6c3   : > { %5830 = vmatpush1.bf16.msra.mxu1 %v7494_v34  ;;  %v7578_v34 = vld [vmem:[%s10560_s11 + $0x550] ss:$8 sps:$4 sm:$0xff]  }
 0x6c4   : > { %5831 = vmatprep.subr.bf16.mxu1 %v7499_v44  ;;  %v7583_v44 = vld [vmem:[%s10560_s11 + $0x564] ss:$8 sps:$4 sm:$0xff]  }
 0x6c7   : > { %5832 = vmatpush1.bf16.msra.mxu1 %v7497_v16  ;;  %v7581_v16 = vld [vmem:[%s10560_s11 + $0x560] ss:$8 sps:$4 sm:$0xff]  }
 0x6c8   : > { %5833 = vmatprep.subr.bf16.mxu1 %v7502_v35  ;;  %v7586_v35 = vld [vmem:[%s10560_s11 + $0x574] ss:$8 sps:$4 sm:$0xff]  }
 0x6cb   : > { %5834 = vmatpush1.bf16.msra.mxu1 %v7500_v45  ;;  %v7584_v45 = vld [vmem:[%s10560_s11 + $0x570] ss:$8 sps:$4 sm:$0xff]  }
 0x6cc   : > { %5835 = vmatprep.subr.bf16.mxu1 %v7505_v60  ;;  %v7589_v60 = vld [vmem:[%s10560_s11 + $0x584] ss:$8 sps:$4 sm:$0xff]  }
 0x6cf   : > { %5836 = vmatpush1.bf16.msra.mxu1 %v7503_v30  ;;  %v7587_v30 = vld [vmem:[%s10560_s11 + $0x580] ss:$8 sps:$4 sm:$0xff]  }
 0x6d0   : > { %5837 = vmatprep.subr.bf16.mxu1 %v7508_v36  ;;  %v7592_v36 = vld [vmem:[%s10560_s11 + $0x594] ss:$8 sps:$4 sm:$0xff]  }
 0x6d3   : > { %5838 = vmatpush1.bf16.msra.mxu1 %v7506_v54  ;;  %v7590_v54 = vld [vmem:[%s10560_s11 + $0x590] ss:$8 sps:$4 sm:$0xff]  }
 0x6d4   : > { %5839 = vmatprep.subr.bf16.mxu1 %v7511_v17  ;;  %v7595_v17 = vld [vmem:[%s10560_s11 + $0x5a4] ss:$8 sps:$4 sm:$0xff]  }
 0x6d7   : > { %5840 = vmatpush1.bf16.msra.mxu1 %v7509_v59  ;;  %v7593_v59 = vld [vmem:[%s10560_s11 + $0x5a0] ss:$8 sps:$4 sm:$0xff]  }
 0x6d8   : > { %5841 = vmatprep.subr.bf16.mxu1 %v7514_v58  ;;  %v7598_v58 = vld [vmem:[%s10560_s11 + $0x5b4] ss:$8 sps:$4 sm:$0xff]  }
 0x6db   : > { %5842 = vmatpush1.bf16.msra.mxu1 %v7512_v8  ;;  %v7596_v8 = vld [vmem:[%s10560_s11 + $0x5b0] ss:$8 sps:$4 sm:$0xff]  }
 0x6dc   : > { %5852 = vmatprep.subr.bf16.mxu1 %v7517_v9  ;;  %v7601_v9 = vld [vmem:[%s10560_s11 + $0x5c4] ss:$8 sps:$4 sm:$0xff]  }
 0x6de   : > { %5844 = vmatmul.mubr.bf16.vlgmr.msra.gmra.mrb[32].mxu1 %v3936_v46  ;;  %v7607_v46 = vld [vmem:[%s10560_s11 + $0x5e4] ss:$8 sps:$4 sm:$0xff]  }
 0x6df   : > { %5853 = vmatpush1.bf16.msra.mxu1 %v7515_v19  ;;  %5884 = vmatprep.mubr.bf16.mxu1 %v3939_v42  ;;  %v7602_v19 = vld [vmem:[%s10560_s11 + $0x5d0] ss:$8 sps:$4 sm:$0xff]   ;;  %v7610_v42 = vld [vmem:[%s10560_s11 + $0x5f4] ss:$8 sps:$4 sm:$0xff]  }
 0x6e0   : > { %5854 = vmatprep.subr.bf16.mxu1 %v7520_v1  ;;  %v7605_v1 = vld [vmem:[%s10560_s11 + $0x5e0] ss:$8 sps:$4 sm:$0xff]  }
 0x6e3   : > { %5855 = vmatpush1.bf16.msra.mxu1 %v7518_v11  ;;  %v7608_v11 = vld [vmem:[%s10560_s11 + $0x5f0] ss:$8 sps:$4 sm:$0xff]  }
 0x6e4   : > { %5856 = vmatprep.subr.bf16.mxu1 %v7523_v41  ;;  %v7613_v41 = vld [vmem:[%s10560_s11 + $0x604] ss:$8 sps:$4 sm:$0xff]  }
 0x6e7   : > { %5857 = vmatpush1.bf16.msra.mxu1 %v7521_v57  ;;  %v3915_v57 = vld [vmem:[#allocation3 + $0xa] ss:$20 sm:$0xff] }
 0x6e8   : > { %5858 = vmatprep.subr.bf16.mxu1 %v7526_v15  ;;  %v3921_v15 = vld [vmem:[#allocation3 + $0xd] ss:$20 sm:$0xff] }
 0x6eb   : > { %5859 = vmatpush1.bf16.msra.mxu1 %v7524_v13  ;;  %v7611_v13 = vld [vmem:[%s10560_s11 + $0x600] ss:$8 sps:$4 sm:$0xff]  }
 0x6ec   : > { %5860 = vmatprep.subr.bf16.mxu1 %v7529_v24  ;;  %v3940_v24 = vpack.c.bf16 %v3915_v57, %v3915_v57  ;;  %v7775_v57 = vld [vmem:[%s10562_s13 + $0x64] ss:$8 sps:$4 sm:$0xff]  }
 0x6ef   : > { %5861 = vmatpush1.bf16.msra.mxu1 %v7527_v12  ;;  %v7616_v12 = vld [vmem:[%s10560_s11 + $0x614] ss:$8 sps:$4 sm:$0xff]  }
 0x6f0   : > { %5862 = vmatprep.subr.bf16.mxu1 %v7532_v56  ;;  %v3943_v56 = vpack.c.bf16 %v3921_v15, %v3921_v15  ;;  %v7677_v15 = vld [vmem:[%s10560_s11 + $0x760] ss:$8 sps:$4 sm:$0xff]  }
 0x6f3   : > { %5863 = vmatpush1.bf16.msra.mxu1 %v7530_v10  ;;  %v7614_v10 = vld [vmem:[%s10560_s11 + $0x610] ss:$8 sps:$4 sm:$0xff]  }
 0x6f4   : > { %5864 = vmatprep.subr.bf16.mxu1 %v7535_v62  ;;  %v7619_v62 = vld [vmem:[%s10560_s11 + $0x624] ss:$8 sps:$4 sm:$0xff]  }
 0x6f7   : > { %5865 = vmatpush1.bf16.msra.mxu1 %v7533_v39  ;;  %v7617_v39 = vld [vmem:[%s10560_s11 + $0x620] ss:$8 sps:$4 sm:$0xff]  }
 0x6f8   : > { %5866 = vmatprep.subr.bf16.mxu1 %v7538_v22  ;;  %v7622_v22 = vld [vmem:[%s10560_s11 + $0x634] ss:$8 sps:$4 sm:$0xff]  }
 0x6fb   : > { %5867 = vmatpush1.bf16.msra.mxu1 %v7536_v37  ;;  %v7620_v37 = vld [vmem:[%s10560_s11 + $0x630] ss:$8 sps:$4 sm:$0xff]  }
 0x6fc   : > { %5868 = vmatprep.subr.bf16.mxu1 %v7541_v21  ;;  %v7625_v21 = vld [vmem:[%s10560_s11 + $0x644] ss:$8 sps:$4 sm:$0xff]  }
 0x6ff   : > { %5869 = vmatpush1.bf16.msra.mxu1 %v7539_v32  ;;  %v7623_v32 = vld [vmem:[%s10560_s11 + $0x640] ss:$8 sps:$4 sm:$0xff]  }
 0x700   : > { %5870 = vmatprep.subr.bf16.mxu1 %v7544_v40  ;;  %v7628_v40 = vld [vmem:[%s10560_s11 + $0x654] ss:$8 sps:$4 sm:$0xff]  }
 0x703   : > { %5871 = vmatpush1.bf16.msra.mxu1 %v7542_v33  ;;  %v7626_v33 = vld [vmem:[%s10560_s11 + $0x650] ss:$8 sps:$4 sm:$0xff]  }
 0x704   : > { %5872 = vmatprep.subr.bf16.mxu1 %v7547_v48  ;;  %v7631_v48 = vld [vmem:[%s10560_s11 + $0x664] ss:$8 sps:$4 sm:$0xff]  }
 0x707   : > { %5873 = vmatpush1.bf16.msra.mxu1 %v7545_v55  ;;  %v7629_v55 = vld [vmem:[%s10560_s11 + $0x660] ss:$8 sps:$4 sm:$0xff]  }
 0x708   : > { %5874 = vmatprep.subr.bf16.mxu1 %v7550_v31  ;;  %v7634_v31 = vld [vmem:[%s10560_s11 + $0x674] ss:$8 sps:$4 sm:$0xff]  }
 0x70b   : > { %5875 = vmatpush1.bf16.msra.mxu1 %v7548_v38  ;;  %v7632_v38 = vld [vmem:[%s10560_s11 + $0x670] ss:$8 sps:$4 sm:$0xff]  }
 0x70c   : > { %5876 = vmatprep.subr.bf16.mxu1 %v7553_v49  ;;  %v7637_v49 = vld [vmem:[%s10560_s11 + $0x684] ss:$8 sps:$4 sm:$0xff]  }
 0x70f   : > { %5877 = vmatpush1.bf16.msra.mxu1 %v7551_v25  ;;  %v7635_v25 = vld [vmem:[%s10560_s11 + $0x680] ss:$8 sps:$4 sm:$0xff]  }
 0x710   : > { %5878 = vmatprep.subr.bf16.mxu1 %v7556_v14  ;;  %v7640_v14 = vld [vmem:[%s10560_s11 + $0x694] ss:$8 sps:$4 sm:$0xff]  }
 0x713   : > { %5879 = vmatpush1.bf16.msra.mxu1 %v7554_v53  ;;  %v7638_v53 = vld [vmem:[%s10560_s11 + $0x690] ss:$8 sps:$4 sm:$0xff]  }
 0x714   : > { %5880 = vmatprep.subr.bf16.mxu1 %v7559_v23  ;;  %v7643_v23 = vld [vmem:[%s10560_s11 + $0x6a4] ss:$8 sps:$4 sm:$0xff]  }
 0x717   : > { %5881 = vmatpush1.bf16.msra.mxu1 %v7557_v28  ;;  %v7641_v28 = vld [vmem:[%s10560_s11 + $0x6a0] ss:$8 sps:$4 sm:$0xff]  }
 0x718   : > { %5882 = vmatprep.subr.bf16.mxu1 %v7562_v27  ;;  %v7646_v27 = vld [vmem:[%s10560_s11 + $0x6b4] ss:$8 sps:$4 sm:$0xff]  }
 0x71b   : > { %5883 = vmatpush1.bf16.msra.mxu1 %v7560_v26  ;;  %v7644_v26 = vld [vmem:[%s10560_s11 + $0x6b0] ss:$8 sps:$4 sm:$0xff]  }
 0x71c   : > { %5893 = vmatprep.subr.bf16.mxu1 %v7565_v63  ;;  %v7649_v63 = vld [vmem:[%s10560_s11 + $0x6c4] ss:$8 sps:$4 sm:$0xff]  }
 0x71e   : > { %5885 = vmatmul.mubr.bf16.vlgmr.msra.gmra.mrb[32].mxu1 %v3938_v6  ;;  %v7655_v6 = vld [vmem:[%s10560_s11 + $0x6e4] ss:$8 sps:$4 sm:$0xff]  }
 0x71f   : > { %5894 = vmatpush1.bf16.msra.mxu1 %v7563_v5  ;;  %5925 = vmatprep.mubr.bf16.mxu1 %v3941_v51  ;;  %v7650_v5 = vld [vmem:[%s10560_s11 + $0x6d0] ss:$8 sps:$4 sm:$0xff]   ;;  %v7658_v51 = vld [vmem:[%s10560_s11 + $0x6f4] ss:$8 sps:$4 sm:$0xff]  }
 0x720   : > { %5895 = vmatprep.subr.bf16.mxu1 %v7568_v47  ;;  %v7653_v47 = vld [vmem:[%s10560_s11 + $0x6e0] ss:$8 sps:$4 sm:$0xff]  }
 0x723   : > { %5896 = vmatpush1.bf16.msra.mxu1 %v7566_v52  ;;  %v7656_v52 = vld [vmem:[%s10560_s11 + $0x6f0] ss:$8 sps:$4 sm:$0xff]  }
 0x724   : > { %5897 = vmatprep.subr.bf16.mxu1 %v7571_v61  ;;  %v7661_v61 = vld [vmem:[%s10560_s11 + $0x704] ss:$8 sps:$4 sm:$0xff]  }
 0x727   : > { %5898 = vmatpush1.bf16.msra.mxu1 %v7569_v18  ;;  %v3919_v18 = vld [vmem:[#allocation3 + $0xc] ss:$20 sm:$0xff] }
 0x728   : > { %5899 = vmatprep.subr.bf16.mxu1 %v7574_v29  ;;  %v3925_v29 = vld [vmem:[#allocation3 + $0xf] ss:$20 sm:$0xff] }
 0x72b   : > { %5900 = vmatpush1.bf16.msra.mxu1 %v7572_v4  ;;  %v7659_v4 = vld [vmem:[%s10560_s11 + $0x700] ss:$8 sps:$4 sm:$0xff]  }
 0x72c   : > { %5901 = vmatprep.subr.bf16.mxu1 %v7577_v50  ;;  %v3942_v50 = vpack.c.bf16 %v3919_v18, %v3919_v18  ;;  %v3923_v18 = vld [vmem:[#allocation3 + $0xe] ss:$20 sm:$0xff] }
 0x72f   : > { %5902 = vmatpush1.bf16.msra.mxu1 %v7575_v2  ;;  %v7664_v2 = vld [vmem:[%s10560_s11 + $0x714] ss:$8 sps:$4 sm:$0xff]  }
 0x730   : > { %5903 = vmatprep.subr.bf16.mxu1 %v7580_v0  ;;  %v3945_v0 = vpack.c.bf16 %v3925_v29, %v3925_v29  ;;  %v3929_v29 = vld [vmem:[#allocation3 + $0x11] ss:$20 sm:$0xff] }
 0x733   : > { %5904 = vmatpush1.bf16.msra.mxu1 %v7578_v34  ;;  %v7755_v34 = vld [vmem:[%s10562_s13] ss:$8 sps:$4 sm:$0xff]  }
 0x734   : > { %5905 = vmatprep.subr.bf16.mxu1 %v7583_v44  ;;  %v7757_v44 = vld [vmem:[%s10562_s13 + $0x4] ss:$8 sps:$4 sm:$0xff]  }
 0x735   : > { %6265 = vmatprep.subr.bf16.mxu0 %v7757_v44  ;;  %v7715_v44 = vld [vmem:[%s10560_s11 + $0x824] ss:$8 sps:$4 sm:$0xff]  }
 0x736   : > { %6266 = vmatpush1.bf16.msra.mxu0 %v7755_v34  ;;  %v7710_v34 = vld [vmem:[%s10560_s11 + $0x810] ss:$8 sps:$4 sm:$0xff]  }
 0x737   : > { %5906 = vmatpush1.bf16.msra.mxu1 %v7581_v16  ;;  %v7662_v16 = vld [vmem:[%s10560_s11 + $0x710] ss:$8 sps:$4 sm:$0xff]  }
 0x738   : > { %5907 = vmatprep.subr.bf16.mxu1 %v7586_v35  ;;  %v7760_v35 = vld [vmem:[%s10562_s13 + $0x14] ss:$8 sps:$4 sm:$0xff]  }
 0x739   : > { %6267 = vmatprep.subr.bf16.mxu0 %v7760_v35  ;;  %v7718_v35 = vld [vmem:[%s10560_s11 + $0x834] ss:$8 sps:$4 sm:$0xff]  }
 0x73b   : > { %5908 = vmatpush1.bf16.msra.mxu1 %v7584_v45  ;;  %v7667_v45 = vld [vmem:[%s10560_s11 + $0x724] ss:$8 sps:$4 sm:$0xff]  }
 0x73c   : > { %5909 = vmatprep.subr.bf16.mxu1 %v7589_v60  ;;  %v7758_v60 = vld [vmem:[%s10562_s13 + $0x10] ss:$8 sps:$4 sm:$0xff]  }
 0x73d   : > { %6268 = vmatpush1.bf16.msra.mxu0 %v7758_v60  ;;  %v7721_v60 = vld [vmem:[%s10560_s11 + $0x844] ss:$8 sps:$4 sm:$0xff]  }
 0x73f   : > { %5910 = vmatpush1.bf16.msra.mxu1 %v7587_v30  ;;  %v7763_v30 = vld [vmem:[%s10562_s13 + $0x24] ss:$8 sps:$4 sm:$0xff]  }
 0x740   : > { %5911 = vmatprep.subr.bf16.mxu1 %v7592_v36  ;;  %v7665_v36 = vld [vmem:[%s10560_s11 + $0x720] ss:$8 sps:$4 sm:$0xff]   ;;  %6269 = vmatprep.subr.bf16.mxu0 %v7763_v30 }
 0x741   : > { %v7719_v30 = vld [vmem:[%s10560_s11 + $0x840] ss:$8 sps:$4 sm:$0xff]  }
 0x743   : > { %5912 = vmatpush1.bf16.msra.mxu1 %v7590_v54  ;;  %v7670_v54 = vld [vmem:[%s10560_s11 + $0x734] ss:$8 sps:$4 sm:$0xff]  }
 0x744   : > { %5913 = vmatprep.subr.bf16.mxu1 %v7595_v17  ;;  %v7761_v17 = vld [vmem:[%s10562_s13 + $0x20] ss:$8 sps:$4 sm:$0xff]  }
 0x745   : > { %6270 = vmatpush1.bf16.msra.mxu0 %v7761_v17  ;;  %v7727_v17 = vld [vmem:[%s10560_s11 + $0x864] ss:$8 sps:$4 sm:$0xff]  }
 0x747   : > { %5914 = vmatpush1.bf16.msra.mxu1 %v7593_v59  ;;  %v7766_v59 = vld [vmem:[%s10562_s13 + $0x34] ss:$8 sps:$4 sm:$0xff]  }
 0x748   : > { %5915 = vmatprep.subr.bf16.mxu1 %v7598_v58  ;;  %v7668_v58 = vld [vmem:[%s10560_s11 + $0x730] ss:$8 sps:$4 sm:$0xff]   ;;  %6271 = vmatprep.subr.bf16.mxu0 %v7766_v59  ;;  %v7725_v59 = vld [vmem:[%s10560_s11 + $0x860] ss:$8 sps:$4 sm:$0xff]  }
 0x74b   : > { %5916 = vmatpush1.bf16.msra.mxu1 %v7596_v8  ;;  %v7673_v8 = vld [vmem:[%s10560_s11 + $0x744] ss:$8 sps:$4 sm:$0xff]  }
 0x74c   : > { %5917 = vmatprep.subr.bf16.mxu1 %v7601_v9  ;;  %v7764_v9 = vld [vmem:[%s10562_s13 + $0x30] ss:$8 sps:$4 sm:$0xff]  }
 0x74d   : > { %6272 = vmatpush1.bf16.msra.mxu0 %v7764_v9  ;;  %v7733_v9 = vld [vmem:[%s10560_s11 + $0x884] ss:$8 sps:$4 sm:$0xff]  }
 0x74f   : > { %5918 = vmatpush1.bf16.msra.mxu1 %v7599_v7  ;;  %v7769_v7 = vld [vmem:[%s10562_s13 + $0x44] ss:$8 sps:$4 sm:$0xff]  }
 0x750   : > { %5919 = vmatprep.subr.bf16.mxu1 %v7604_v3  ;;  %v7671_v3 = vld [vmem:[%s10560_s11 + $0x740] ss:$8 sps:$4 sm:$0xff]   ;;  %6273 = vmatprep.subr.bf16.mxu0 %v7769_v7 }
 0x751   : > { %v7731_v7 = vld [vmem:[%s10560_s11 + $0x880] ss:$8 sps:$4 sm:$0xff]  }
 0x753   : > { %5920 = vmatpush1.bf16.msra.mxu1 %v7602_v19  ;;  %v7676_v19 = vld [vmem:[%s10560_s11 + $0x754] ss:$8 sps:$4 sm:$0xff]  }
 0x754   : > { %5921 = vmatprep.subr.bf16.mxu1 %v7607_v46  ;;  %v7767_v46 = vld [vmem:[%s10562_s13 + $0x40] ss:$8 sps:$4 sm:$0xff]  }
 0x755   : > { %6274 = vmatpush1.bf16.msra.mxu0 %v7767_v46  ;;  %v7739_v46 = vld [vmem:[%s10560_s11 + $0x8a4] ss:$8 sps:$4 sm:$0xff]  }
 0x757   : > { %5922 = vmatpush1.bf16.msra.mxu1 %v7605_v1  ;;  %v7772_v1 = vld [vmem:[%s10562_s13 + $0x54] ss:$8 sps:$4 sm:$0xff]  }
 0x758   : > { %5923 = vmatprep.subr.bf16.mxu1 %v7610_v42  ;;  %v7674_v42 = vld [vmem:[%s10560_s11 + $0x750] ss:$8 sps:$4 sm:$0xff]   ;;  %6275 = vmatprep.subr.bf16.mxu0 %v7772_v1  ;;  %v7737_v1 = vld [vmem:[%s10560_s11 + $0x8a0] ss:$8 sps:$4 sm:$0xff]  }
 0x75b   : > { %5924 = vmatpush1.bf16.msra.mxu1 %v7608_v11  ;;  %v7679_v11 = vld [vmem:[%s10560_s11 + $0x764] ss:$8 sps:$4 sm:$0xff]  }
 0x75c   : > { %5934 = vmatprep.subr.bf16.mxu1 %v7613_v41  ;;  %v7770_v41 = vld [vmem:[%s10562_s13 + $0x50] ss:$8 sps:$4 sm:$0xff]  }
 0x75d   : > { %6276 = vmatpush1.bf16.msra.mxu0 %v7770_v41  ;;  %v7745_v41 = vld [vmem:[%s10560_s11 + $0x8c4] ss:$8 sps:$4 sm:$0xff]  }
 0x75e   : > { %5926 = vmatmul.mubr.bf16.vlgmr.msra.gmra.mrb[32].mxu1 %v3940_v24  ;;  %v7773_v24 = vld [vmem:[%s10562_s13 + $0x60] ss:$8 sps:$4 sm:$0xff]   ;;  %6277 = vmatprep.subr.bf16.mxu0 %v7775_v57 }
 0x75f   : > { %5935 = vmatpush1.bf16.msra.mxu1 %v7611_v13  ;;  %5966 = vmatprep.mubr.bf16.mxu1 %v3943_v56  ;;  %v7682_v13 = vld [vmem:[%s10560_s11 + $0x774] ss:$8 sps:$4 sm:$0xff]   ;;  %v7680_v56 = vld [vmem:[%s10560_s11 + $0x770] ss:$8 sps:$4 sm:$0xff]   ;;  %v7743_v57 = vld [vmem:[%s10560_s11 + $0x8c0] ss:$8 sps:$4 sm:$0xff]  }
 0x760   : > { %5936 = vmatprep.subr.bf16.mxu1 %v7616_v12  ;;  %v7778_v12 = vld [vmem:[%s10562_s13 + $0x74] ss:$8 sps:$4 sm:$0xff]  }
 0x761   : > { %6278 = vmatpush1.bf16.msra.mxu0 %v7773_v24  ;;  %v7751_v24 = vld [vmem:[%s10560_s11 + $0x8e4] ss:$8 sps:$4 sm:$0xff]  }
 0x762   : > { %6279 = vmatprep.subr.bf16.mxu0 %v7778_v12  ;;  %v7749_v12 = vld [vmem:[%s10560_s11 + $0x8e0] ss:$8 sps:$4 sm:$0xff]  }
 0x763   : > { %5937 = vmatpush1.bf16.msra.mxu1 %v7614_v10  ;;  %v7685_v10 = vld [vmem:[%s10560_s11 + $0x784] ss:$8 sps:$4 sm:$0xff]  }
 0x764   : > { %5938 = vmatprep.subr.bf16.mxu1 %v7619_v62  ;;  %v7776_v62 = vld [vmem:[%s10562_s13 + $0x70] ss:$8 sps:$4 sm:$0xff]  }
 0x765   : > { %6280 = vmatpush1.bf16.msra.mxu0 %v7776_v62  ;;  %v3927_v62 = vld [vmem:[#allocation3 + $0x10] ss:$20 sm:$0xff] }
 0x767   : > { %5939 = vmatpush1.bf16.msra.mxu1 %v7617_v39  ;;  %v7781_v39 = vld [vmem:[%s10562_s13 + $0x84] ss:$8 sps:$4 sm:$0xff]  }
 0x768   : > { %5940 = vmatprep.subr.bf16.mxu1 %v7622_v22  ;;  %v7683_v22 = vld [vmem:[%s10560_s11 + $0x780] ss:$8 sps:$4 sm:$0xff]   ;;  %6281 = vmatprep.subr.bf16.mxu0 %v7781_v39  ;;  %v3946_v39 = vpack.c.bf16 %v3927_v62, %v3927_v62 }
 0x76b   : > { %5941 = vmatpush1.bf16.msra.mxu1 %v7620_v37  ;;  %v7688_v37 = vld [vmem:[%s10560_s11 + $0x794] ss:$8 sps:$4 sm:$0xff]  }
 0x76c   : > { %5942 = vmatprep.subr.bf16.mxu1 %v7625_v21  ;;  %v7779_v21 = vld [vmem:[%s10562_s13 + $0x80] ss:$8 sps:$4 sm:$0xff]  }
 0x76d   : > { %6282 = vmatpush1.bf16.msra.mxu0 %v7779_v21  ;;  %v7802_v21 = vld [vmem:[%s10562_s13 + $0xf4] ss:$8 sps:$4 sm:$0xff]  }
 0x76f   : > { %5943 = vmatpush1.bf16.msra.mxu1 %v7623_v32  ;;  %v7784_v32 = vld [vmem:[%s10562_s13 + $0x94] ss:$8 sps:$4 sm:$0xff]  }
 0x770   : > { %5944 = vmatprep.subr.bf16.mxu1 %v7628_v40  ;;  %v7686_v40 = vld [vmem:[%s10560_s11 + $0x790] ss:$8 sps:$4 sm:$0xff]   ;;  %6283 = vmatprep.subr.bf16.mxu0 %v7784_v32 }
 0x771   : > { %v7800_v32 = vld [vmem:[%s10562_s13 + $0xf0] ss:$8 sps:$4 sm:$0xff]  }
 0x773   : > { %5945 = vmatpush1.bf16.msra.mxu1 %v7626_v33  ;;  %v7691_v33 = vld [vmem:[%s10560_s11 + $0x7a4] ss:$8 sps:$4 sm:$0xff]  }
 0x774   : > { %5946 = vmatprep.subr.bf16.mxu1 %v7631_v48  ;;  %v7782_v48 = vld [vmem:[%s10562_s13 + $0x90] ss:$8 sps:$4 sm:$0xff]  }
 0x775   : > { %6284 = vmatpush1.bf16.msra.mxu0 %v7782_v48 }
 0x777   : > { %5947 = vmatpush1.bf16.msra.mxu1 %v7629_v55  ;;  %v7787_v55 = vld [vmem:[%s10562_s13 + $0xa4] ss:$8 sps:$4 sm:$0xff]  }
 0x778   : > { %5948 = vmatprep.subr.bf16.mxu1 %v7634_v31  ;;  %v7689_v31 = vld [vmem:[%s10560_s11 + $0x7a0] ss:$8 sps:$4 sm:$0xff]   ;;  %6285 = vmatprep.subr.bf16.mxu0 %v7787_v55 }
 0x77b   : > { %5949 = vmatpush1.bf16.msra.mxu1 %v7632_v38  ;;  %v7694_v38 = vld [vmem:[%s10560_s11 + $0x7b4] ss:$8 sps:$4 sm:$0xff]  }
 0x77c   : > { %5950 = vmatprep.subr.bf16.mxu1 %v7637_v49  ;;  %v7785_v49 = vld [vmem:[%s10562_s13 + $0xa0] ss:$8 sps:$4 sm:$0xff]  }
 0x77d   : > { %6286 = vmatpush1.bf16.msra.mxu0 %v7785_v49 }
 0x77f   : > { %5951 = vmatpush1.bf16.msra.mxu1 %v7635_v25  ;;  %v7790_v25 = vld [vmem:[%s10562_s13 + $0xb4] ss:$8 sps:$4 sm:$0xff]  }
 0x780   : > { %5952 = vmatprep.subr.bf16.mxu1 %v7640_v14  ;;  %v7692_v14 = vld [vmem:[%s10560_s11 + $0x7b0] ss:$8 sps:$4 sm:$0xff]   ;;  %6287 = vmatprep.subr.bf16.mxu0 %v7790_v25 }
 0x783   : > { %5953 = vmatpush1.bf16.msra.mxu1 %v7638_v53  ;;  %v7697_v53 = vld [vmem:[%s10560_s11 + $0x7c4] ss:$8 sps:$4 sm:$0xff]  }
 0x784   : > { %5954 = vmatprep.subr.bf16.mxu1 %v7643_v23  ;;  %v7788_v23 = vld [vmem:[%s10562_s13 + $0xb0] ss:$8 sps:$4 sm:$0xff]  }
 0x785   : > { %6288 = vmatpush1.bf16.msra.mxu0 %v7788_v23 }
 0x787   : > { %5955 = vmatpush1.bf16.msra.mxu1 %v7641_v28  ;;  %v7793_v28 = vld [vmem:[%s10562_s13 + $0xc4] ss:$8 sps:$4 sm:$0xff]  }
 0x788   : > { %5956 = vmatprep.subr.bf16.mxu1 %v7646_v27  ;;  %v7695_v27 = vld [vmem:[%s10560_s11 + $0x7c0] ss:$8 sps:$4 sm:$0xff]   ;;  %6289 = vmatprep.subr.bf16.mxu0 %v7793_v28 }
 0x78b   : > { %5957 = vmatpush1.bf16.msra.mxu1 %v7644_v26  ;;  %v7700_v26 = vld [vmem:[%s10560_s11 + $0x7d4] ss:$8 sps:$4 sm:$0xff]  }
 0x78c   : > { %5958 = vmatprep.subr.bf16.mxu1 %v7649_v63  ;;  %v7791_v63 = vld [vmem:[%s10562_s13 + $0xc0] ss:$8 sps:$4 sm:$0xff]  }
 0x78d   : > { %6290 = vmatpush1.bf16.msra.mxu0 %v7791_v63 }
 0x78f   : > { %5959 = vmatpush1.bf16.msra.mxu1 %v7647_v43  ;;  %v7796_v43 = vld [vmem:[%s10562_s13 + $0xd4] ss:$8 sps:$4 sm:$0xff]  }
 0x790   : > { %5960 = vmatprep.subr.bf16.mxu1 %v7652_v20  ;;  %v7698_v20 = vld [vmem:[%s10560_s11 + $0x7d0] ss:$8 sps:$4 sm:$0xff]   ;;  %6291 = vmatprep.subr.bf16.mxu0 %v7796_v43 }
 0x793   : > { %5961 = vmatpush1.bf16.msra.mxu1 %v7650_v5  ;;  %v7703_v5 = vld [vmem:[%s10560_s11 + $0x7e4] ss:$8 sps:$4 sm:$0xff]  }
 0x794   : > { %5962 = vmatprep.subr.bf16.mxu1 %v7655_v6  ;;  %v7794_v6 = vld [vmem:[%s10562_s13 + $0xd0] ss:$8 sps:$4 sm:$0xff]  }
 0x795   : > { %6292 = vmatpush1.bf16.msra.mxu0 %v7794_v6 }
 0x797   : > { %5963 = vmatpush1.bf16.msra.mxu1 %v7653_v47  ;;  %v7701_v47 = vld [vmem:[%s10560_s11 + $0x7e0] ss:$8 sps:$4 sm:$0xff]  }
 0x798   : > { %5964 = vmatprep.subr.bf16.mxu1 %v7658_v51  ;;  %v7706_v51 = vld [vmem:[%s10560_s11 + $0x7f4] ss:$8 sps:$4 sm:$0xff]  }
 0x79b   : > { %5965 = vmatpush1.bf16.msra.mxu1 %v7656_v52  ;;  %v7704_v52 = vld [vmem:[%s10560_s11 + $0x7f0] ss:$8 sps:$4 sm:$0xff]  }
 0x79c   : > { %5975 = vmatprep.subr.bf16.mxu1 %v7661_v61  ;;  %v7709_v61 = vld [vmem:[%s10560_s11 + $0x804] ss:$8 sps:$4 sm:$0xff]  }
 0x79e   : > { %5967 = vmatmul.mubr.bf16.vlgmr.msra.gmra.mrb[32].mxu1 %v3942_v50  ;;  %v3944_v50 = vpack.c.bf16 %v3923_v18, %v3923_v18  ;;  %v7809_v18 = vld [vmem:[%s10564_s15 + $0x58] sm:$0xff]  }
 0x79f   : > { %5976 = vmatpush1.bf16.msra.mxu1 %v7659_v4  ;;  %6007 = vmatprep.mubr.bf16.mxu1 %v3945_v0  ;;  %v7707_v4 = vld [vmem:[%s10560_s11 + $0x800] ss:$8 sps:$4 sm:$0xff]   ;;  %v3947_v0 = vpack.c.bf16 %v3929_v29, %v3929_v29  ;;  %v7810_v29 = vld [vmem:[%s10564_s15 + $0x18] sm:$0xff]  }
 0x7a0   : > { %5977 = vmatprep.subr.bf16.mxu1 %v7664_v2  ;;  %v7712_v2 = vld [vmem:[%s10560_s11 + $0x814] ss:$8 sps:$4 sm:$0xff]  }
 0x7a3   : > { %5978 = vmatpush1.bf16.msra.mxu1 %v7662_v16  ;;  %v7713_v16 = vld [vmem:[%s10560_s11 + $0x820] ss:$8 sps:$4 sm:$0xff]  }
 0x7a4   : > { %5979 = vmatprep.subr.bf16.mxu1 %v7667_v45  ;;  %v7716_v45 = vld [vmem:[%s10560_s11 + $0x830] ss:$8 sps:$4 sm:$0xff]  }
 0x7a7   : > { %5980 = vmatpush1.bf16.msra.mxu1 %v7665_v36  ;;  %v7724_v36 = vld [vmem:[%s10560_s11 + $0x854] ss:$8 sps:$4 sm:$0xff]  }
 0x7a8   : > { %5981 = vmatprep.subr.bf16.mxu1 %v7670_v54  ;;  %v7722_v54 = vld [vmem:[%s10560_s11 + $0x850] ss:$8 sps:$4 sm:$0xff]  }
 0x7ab   : > { %5982 = vmatpush1.bf16.msra.mxu1 %v7668_v58  ;;  %v7730_v58 = vld [vmem:[%s10560_s11 + $0x874] ss:$8 sps:$4 sm:$0xff]  }
 0x7ac   : > { %5983 = vmatprep.subr.bf16.mxu1 %v7673_v8  ;;  %v7728_v8 = vld [vmem:[%s10560_s11 + $0x870] ss:$8 sps:$4 sm:$0xff]  }
 0x7af   : > { %5984 = vmatpush1.bf16.msra.mxu1 %v7671_v3  ;;  %v7736_v3 = vld [vmem:[%s10560_s11 + $0x894] ss:$8 sps:$4 sm:$0xff]  }
 0x7b0   : > { %5985 = vmatprep.subr.bf16.mxu1 %v7676_v19  ;;  %v7734_v19 = vld [vmem:[%s10560_s11 + $0x890] ss:$8 sps:$4 sm:$0xff]  }
 0x7b3   : > { %5986 = vmatpush1.bf16.msra.mxu1 %v7674_v42  ;;  %v7742_v42 = vld [vmem:[%s10560_s11 + $0x8b4] ss:$8 sps:$4 sm:$0xff]  }
 0x7b4   : > { %5987 = vmatprep.subr.bf16.mxu1 %v7679_v11  ;;  %v7740_v11 = vld [vmem:[%s10560_s11 + $0x8b0] ss:$8 sps:$4 sm:$0xff]  }
 0x7b7   : > { %5988 = vmatpush1.bf16.msra.mxu1 %v7677_v15  ;;  %v7748_v15 = vld [vmem:[%s10560_s11 + $0x8d4] ss:$8 sps:$4 sm:$0xff]  }
 0x7b8   : > { %5989 = vmatprep.subr.bf16.mxu1 %v7682_v13  ;;  %v7746_v13 = vld [vmem:[%s10560_s11 + $0x8d0] ss:$8 sps:$4 sm:$0xff]  }
 0x7bb   : > { %5990 = vmatpush1.bf16.msra.mxu1 %v7680_v56  ;;  %v7754_v56 = vld [vmem:[%s10560_s11 + $0x8f4] ss:$8 sps:$4 sm:$0xff]  }
 0x7bc   : > { %5991 = vmatprep.subr.bf16.mxu1 %v7685_v10  ;;  %v7752_v10 = vld [vmem:[%s10560_s11 + $0x8f0] ss:$8 sps:$4 sm:$0xff]  }
 0x7bf   : > { %5992 = vmatpush1.bf16.msra.mxu1 %v7683_v22  ;;  %v7799_v22 = vld [vmem:[%s10562_s13 + $0xe4] ss:$8 sps:$4 sm:$0xff]  }
 0x7c0   : > { %5993 = vmatprep.subr.bf16.mxu1 %v7688_v37  ;;  %v7797_v37 = vld [vmem:[%s10562_s13 + $0xe0] ss:$8 sps:$4 sm:$0xff]   ;;  %6293 = vmatprep.subr.bf16.mxu0 %v7799_v22 }
 0x7c1   : > { %6294 = vmatpush1.bf16.msra.mxu0 %v7797_v37 }
 0x7c2   : > { %6295 = vmatprep.subr.bf16.mxu0 %v7802_v21 }
 0x7c3   : > { %5994 = vmatpush1.bf16.msra.mxu1 %v7686_v40  ;;  %v7803_v40 = vld [vmem:[%s10564_s15 + $0x40] sm:$0xff]  }
 0x7c4   : > { %5995 = vmatprep.subr.bf16.mxu1 %v7691_v33  ;;  %v4238_v33 = vlaneseq }
 0x7c5   : > { %6296 = vmatpush1.bf16.msra.mxu0 %v7800_v32 }
 0x7c6   : > { %7123 = vmatprep.subr.bf16.mxu0 %v7803_v40  ;;  %v4239_v48 = vshrl.u32 %v4238_v33, 7 }
 0x7c7   : > { %5996 = vmatpush1.bf16.msra.mxu1 %v7689_v31  ;;  %v4236_v31 = vld [vmem:[%s10561_s12] sm:$0x3] }
 0x7c8   : > { %5997 = vmatprep.subr.bf16.mxu1 %v7694_v38  ;;  %v4240_v55 = vsub.s32 0, %v4239_v48  ;;  %v4244_v38 = vsub.s32 1, %v4239_v48 }
 0x7ca   : > { %v4241_v49 = vrot.slane %v4236_v31, %v4240_v55  ;;  %v4245_v25 = vrot.slane %v4236_v31, %v4244_v38 }
 0x7cb   : > { %5998 = vmatpush1.bf16.msra.mxu1 %v7692_v14 }
 0x7cc   : > { %5999 = vmatprep.subr.bf16.mxu1 %v7697_v53 }
 0x7cf   : > { %6000 = vmatpush1.bf16.msra.mxu1 %v7695_v27 }
 0x7d0   : > { %6001 = vmatprep.subr.bf16.mxu1 %v7700_v26 }
 0x7d3   : > { %6002 = vmatpush1.bf16.msra.mxu1 %v7698_v20 }
 0x7d4   : > { %6003 = vmatprep.subr.bf16.mxu1 %v7703_v5  ;;  %v7804_v5 = vld [vmem:[%s10564_s15] sm:$0xff]  }
 0x7d7   : > { %6004 = vmatpush1.bf16.msra.mxu1 %v7701_v47  ;;  %v7805_v47 = vld [vmem:[%s10564_s15 + $0x48] sm:$0xff]  }
 0x7d8   : > { %6005 = vmatprep.subr.bf16.mxu1 %v7706_v51  ;;  %v7806_v51 = vld [vmem:[%s10564_s15 + $0x8] sm:$0xff]  }
 0x7db   : > { %6006 = vmatpush1.bf16.msra.mxu1 %v7704_v52  ;;  %v7807_v52 = vld [vmem:[%s10564_s15 + $0x50] sm:$0xff]  }
 0x7dc   : > { %6016 = vmatprep.subr.bf16.mxu1 %v7709_v61  ;;  %v7808_v61 = vld [vmem:[%s10564_s15 + $0x10] sm:$0xff]  }
 0x7de   : > { %6008 = vmatmul.mubr.bf16.vlgmr.msra.gmra.mrb[32].mxu1 %v3944_v50  ;;  %v7812_v50 = vld [vmem:[%s10564_s15 + $0x20] sm:$0xff]  }
 0x7df   : > { %6017 = vmatpush1.bf16.msra.mxu1 %v7707_v4  ;;  %6048 = vmatprep.mubr.bf16.mxu1 %v3947_v0  ;;  %v7811_v4 = vld [vmem:[%s10564_s15 + $0x60] sm:$0xff]   ;;  %v7814_v0 = vld [vmem:[%s10564_s15 + $0x28] sm:$0xff]  }
 0x7e0   : > { %6018 = vmatprep.subr.bf16.mxu1 %v7712_v2  ;;  %v7813_v2 = vld [vmem:[%s10564_s15 + $0x68] sm:$0xff]  }
 0x7e3   : > { %6019 = vmatpush1.bf16.msra.mxu1 %v7710_v34  ;;  %v7815_v34 = vld [vmem:[%s10564_s15 + $0x70] sm:$0xff]  }
 0x7e4   : > { %6020 = vmatprep.subr.bf16.mxu1 %v7715_v44  ;;  %v7816_v44 = vld [vmem:[%s10564_s15 + $0x30] sm:$0xff]  }
 0x7e7   : > { %6021 = vmatpush1.bf16.msra.mxu1 %v7713_v16  ;;  %v7817_v16 = vld [vmem:[%s10564_s15 + $0x78] sm:$0xff]  }
 0x7e8   : > { %6022 = vmatprep.subr.bf16.mxu1 %v7718_v35  ;;  %v7818_v35 = vld [vmem:[%s10564_s15 + $0x38] sm:$0xff]  }
 0x7eb   : > { %6023 = vmatpush1.bf16.msra.mxu1 %v7716_v45  ;;  %v6093_v45 = vld [vmem:[%s10563_s14] sm:$0x3] }
 0x7ec   : > { %6024 = vmatprep.subr.bf16.mxu1 %v7721_v60  ;;  %v6098_v60 = vrot.slane %v6093_v45, %v4240_v55 }
 0x7ef   : > { %6025 = vmatpush1.bf16.msra.mxu1 %v7719_v30  ;;  %v6102_v30 = vrot.slane %v6093_v45, %v4244_v38 }
 0x7f0   : > { %6026 = vmatprep.subr.bf16.mxu1 %v7724_v36 }
 0x7f3   : > { %6027 = vmatpush1.bf16.msra.mxu1 %v7722_v54 }
 0x7f4   : > { %6028 = vmatprep.subr.bf16.mxu1 %v7727_v17 }
 0x7f7   : > { %6029 = vmatpush1.bf16.msra.mxu1 %v7725_v59 }
 0x7f8   : > { %6030 = vmatprep.subr.bf16.mxu1 %v7730_v58 }
 0x7fb   : > { %6031 = vmatpush1.bf16.msra.mxu1 %v7728_v8 }
 0x7fc   : > { %6032 = vmatprep.subr.bf16.mxu1 %v7733_v9 }
 0x7ff   : > { %6033 = vmatpush1.bf16.msra.mxu1 %v7731_v7 }
 0x800   : > { %6034 = vmatprep.subr.bf16.mxu1 %v7736_v3 }
 0x803   : > { %6035 = vmatpush1.bf16.msra.mxu1 %v7734_v19 }
 0x804   : > { %6036 = vmatprep.subr.bf16.mxu1 %v7739_v46 }
 0x807   : > { %6037 = vmatpush1.bf16.msra.mxu1 %v7737_v1  ;;  %v7010_v1 = vld [vmem:[%s10565_s16] ss:$0 sm:$0xff] }
 0x808   : > { %6038 = vmatprep.subr.bf16.mxu1 %v7742_v42 }
 0x80b   : > { %6039 = vmatpush1.bf16.msra.mxu1 %v7740_v11 }
 0x80c   : > { %6040 = vmatprep.subr.bf16.mxu1 %v7745_v41 }
 0x80f   : > { %6041 = vmatpush1.bf16.msra.mxu1 %v7743_v57 }
 0x810   : > { %6042 = vmatprep.subr.bf16.mxu1 %v7748_v15 }
 0x813   : > { %6043 = vmatpush1.bf16.msra.mxu1 %v7746_v13 }
 0x814   : > { %6044 = vmatprep.subr.bf16.mxu1 %v7751_v24 }
 0x817   : > { %6045 = vmatpush1.bf16.msra.mxu1 %v7749_v12 }
 0x818   : > { %6046 = vmatprep.subr.bf16.mxu1 %v7754_v56 }
 0x81b   : > { %6047 = vmatpush1.bf16.msra.mxu1 %v7752_v10 }
 0x81e   : > { %6049 = vmatmul.mubr.bf16.vlgmr.msra.gmra.mrb[32].mxu1 %v3946_v39 }
 0x8f1   : > { %v6050_v14 = vpop.f32.mrb[32].mxu1 }
 0x8f2   : > { %v7197_v53 = vadd.f32 %v6050_v14, %v4241_v49  ;;  %v6052_v23 = vpop.f32.mrb[33].mxu1 }
 0x8f3   : > { %v7198_v28 = vadd.f32 %v6052_v23, %v4245_v25  ;;  %v6054_v27 = vpop.f32.mrb[34].mxu1 }
 0x8f4   : > { %v6057_v26 = vmax.f32 %v7197_v53, 0.0  ;;  %v6055_v63 = vpop.f32.mrb[35].mxu1 }
 0x8f5   : > { %v6058_v43 = vmax.f32 %v7198_v28, 0.0 }
 0x8f6   : > { %v6059_v6 = vpack.c.bf16 %v6057_v26, %v6057_v26 }
 0x8f7   : > { %v6060_v20 = vpack.c.bf16 %v6058_v43, %v6058_v43 }
 0x8f9   : > { %6297 = vmatprep.mubr.bf16.mxu0 %v6060_v20 }
 0x8fa   : > { %6298 = vmatmul.mubr.bf16.vlgmr.msra.gmra.mrb[228].mxu0 %v6059_v6 }
 0x8fb   : > { %7124 = vmatpush3.bf16.msra.mxu0 %v7804_v5 }
 0x8fc   : > { %7125 = vmatprep.subr.bf16.mxu0 %v7805_v47 }
 0x8ff   : > { %7126 = vmatpush3.bf16.msra.mxu0 %v7806_v51 }
 0x900   : > { %7127 = vmatprep.subr.bf16.mxu0 %v7807_v52 }
 0x903   : > { %7128 = vmatpush3.bf16.msra.mxu0 %v7808_v61 }
 0x904   : > { %7129 = vmatprep.subr.bf16.mxu0 %v7809_v18 }
 0x907   : > { %7130 = vmatpush3.bf16.msra.mxu0 %v7810_v29 }
 0x908   : > { %7131 = vmatprep.subr.bf16.mxu0 %v7811_v4 }
 0x90b   : > { %7132 = vmatpush3.bf16.msra.mxu0 %v7812_v50 }
 0x90c   : > { %7133 = vmatprep.subr.bf16.mxu0 %v7813_v2 }
 0x90f   : > { %7134 = vmatpush3.bf16.msra.mxu0 %v7814_v0 }
 0x910   : > { %7135 = vmatprep.subr.bf16.mxu0 %v7815_v34 }
 0x913   : > { %7136 = vmatpush3.bf16.msra.mxu0 %v7816_v44 }
 0x914   : > { %7137 = vmatprep.subr.bf16.mxu0 %v7817_v16 }
 0x917   : > { %7138 = vmatpush3.bf16.msra.mxu0 %v7818_v35 }
 0x9cd   : > { %v6299_v36 = vpop.f32.mrb[228].mxu0 }
 0x9ce   : > { %v6300_v54 = vadd.f32 %v6299_v36, %v6098_v60  ;;  %v6301_v17 = vpop.f32.mrb[229].mxu0 }
 0x9cf   : > { %v6302_v59 = vadd.f32 %v6301_v17, %v6102_v30  ;;  %v6303_v58 = vpop.f32.mrb[230].mxu0 }
 0x9d0   : > { %v6306_v8 = vmax.f32 %v6300_v54, 0.0  ;;  %v6304_v9 = vpop.f32.mrb[231].mxu0 }
 0x9d1   : > { %v6307_v7 = vmax.f32 %v6302_v59, 0.0 }
 0x9d2   : > { %v6308_v19 = vpack.c.bf16 %v6306_v8, %v6306_v8 }
 0x9d3   : > { %v6309_v3 = vpack.c.bf16 %v6307_v7, %v6307_v7 }
 0x9d5   : > { %6477 = vmatprep.mubr.bf16.mxu0 %v6309_v3 }
 0x9d6   : > { %6478 = vmatmul.mubr.bf16.vlgmr.msra.gmra.mrb[232].mxu0 %v6308_v19 }
 0xaa9   : > { %v7139_v46 = vpop.f32.mrb[232].mxu0 }
 0xaaa   : > { %v7140_v42 = vpop.f32.mrb[233].mxu0 }
 0xaab   : > { %v7141_v11 = vadd.f32 %v7140_v42, %v7139_v46  ;;  %v7142_v41 = vpop.f32.mrb[234].mxu0 }
 0xaac   : > { %v7143_v57 = vpop.f32.mrb[235].mxu0 }
 0xaad   : > { %v6480_v15 = vadd.f32 %v7141_v11, %v7010_v1 }
 0xaaf   : > { %6485 = vmax.xlane.f32.xlu1 %v6480_v15 }
 0xb3c   : > { %v6486_v13 = vpop.xlane.xlu1 %6485 }
 0xb3d   : > { %v6487_v24 = vsub.f32 %v6480_v15, %v6486_v13 }
 0xb3f   : > { %v6488_v12 = vmul.f32 1.442695, %v6487_v24 }
 0xb41   : > { %7819 = vpow2.f32 %v6488_v12 }
 0xb4b   : > { %v7820_v56 = vpop.eup %7819 }
 0xb4c   : > { %6490 = vadd.xlane.f32.xlu0 %v7820_v56 }
 0xbd9   : > { %v6491_v10 = vpop.xlane.xlu0 %6490 }
 0xbda   : > { %7821 = vlog2.f32 %v6491_v10 }
 0xbe4   : > { %v7822_v62 = vpop.eup %7821 }
 0xbe5   : > { %v6493_v39 = vmul.f32 0.6931472, %v7822_v62 }
 0xbe7   : > { %v6494_v22 = vsub.f32 %v6487_v24, %v6493_v39 }
 0xbe9   : > { %6495 = vst [vmem:[%s548_s19] sm:$0xff] %v6494_v22 }
 0xbea PF: > { %s27_s24 = sadd.s32 1, %s7830_s24  }
 0xbeb   : > { %p24_p5 = scmp.ge.s32.totalorder %s27_s24, 4  }
 0xbed   :  { %26 = sbr.rel (!%p24_p5) target bundleno = 3 (0x3), region = 174 }

</bundles_post_ra>
